<compile_context>
chip_gen: v5e
topology: v5e:2x2
jax: 0.10.0
libtpu: 0.0.40
codegen_flags: <defaults>
</compile_context>

<pallas_src>
import numpy as np

import jax
import jax.numpy as jnp
from jax import lax
from jax.experimental import pallas as pl
from jax.experimental.pallas import tpu as pltpu

# ---------------- small config (structure mirrors Guider with DLV2Head branch) ----
B = 2                 # batch
C = 4                 # in_channels / channel_dim
H = W = 16            # spatial_dim == in_spatial (small stand-in for the module's 64)
SR = 4                # sr_ratio -> patch size of PatchEmbed and of Projector
GRID = H // SR        # patches per side = 4
L = GRID * GRID       # num_patches = 16
BL = B * L            # batch fused along token rows = 32
E = 64                # embed_dim (small stand-in for 512), divisible by heads
NH = 4                # num_heads
HD = E // NH          # head dim = 16
MLP = 4 * E           # mlp_ratio = 4
DEPTH = 2             # transformer depth
K = C * SR * SR       # flattened patch length, order (c, i, j) = 64
PPC = SR * SR * C     # decoder_pred output dim, order (i, j, c)
EPS = 1e-6            # LayerNorm eps
NEG = -1e9            # additive mask forbidding cross-batch attention


# ----------------------------- in-kernel helpers ---------------------------------
def _ln(x, w, b):
    # variance via E[x^2] - E[x]^2: the two cross-lane reductions are independent and
    # can overlap on the XLU (latency-bound kernel); f32 over 64 elems is numerically safe.
    mu = jnp.mean(x, axis=-1, keepdims=True)
    mu2 = jnp.mean(x * x, axis=-1, keepdims=True)
    var = mu2 - mu * mu
    return (x - mu) * lax.rsqrt(var + EPS) * w + b


# ----------------------------------- fused kernel --------------------------------
def guider_fused_kernel(x_ref, m_ref, nmask_ref, pos_ref, pe_w_ref,
                        w_attn_ref, w1_ref, w2_ref, vec_ref, b1_ref,
                        dec_w_ref, tok_ref, dvec_ref, o_ref):
    x_p = x_ref[...]                       # (BL, K) f32, patch layout (c,i,j)
    m = m_ref[...]                         # (BL, K) f32 mask broadcast over channels
    not_m = 1.0 - m                        # shared: Aggregation fill & Projector x_ini

    tok = tok_ref[...]                     # (3, K): attn mask token, proj mask token, dec bias
    atok, ptok, dec_b = tok[0:1], tok[1:2], tok[2:3]
    dvec = dvec_ref[...]                   # (3, E): patch-embed bias (z1 folded), dec LN w/b
    pe_b, dec_nw, dec_nb = dvec[0:1], dvec[1:2], dvec[2:3]

    # ---- Aggregation: mask-fill + (z1 folded into patch-embed) + pos embedding ----
    xm = x_p * m + not_m * atok
    tokens = (jnp.dot(xm.astype(jnp.bfloat16), pe_w_ref[...],
                      preferred_element_type=jnp.float32)
              + pe_b + pos_ref[...])                                    # (BL, E) f32

    neg = nmask_ref[...]                   # (BL, BL): 0 within batch, -1e9 across batches

    for d in range(DEPTH):                 # static unroll; tokens never leave VMEM
        vec = vec_ref[d]                   # (9, E) f32 per-block row vectors
        ln1w, ln1b = vec[0:1], vec[1:2]
        bq, bk, bv = vec[2:3], vec[3:4], vec[4:5]
        bproj = vec[5:6]
        ln2w, ln2b = vec[6:7], vec[7:8]
        b2 = vec[8:9]

        # -- multi-head self-attention (1/sqrt(HD) pre-folded into wq/bq) --
        h = _ln(tokens, ln1w, ln1b).astype(jnp.bfloat16)
        q = jnp.dot(h, w_attn_ref[4 * d + 0], preferred_element_type=jnp.float32) + bq
        k = jnp.dot(h, w_attn_ref[4 * d + 1], preferred_element_type=jnp.float32) + bk
        v = jnp.dot(h, w_attn_ref[4 * d + 2], preferred_element_type=jnp.float32) + bv
        q = q.astype(jnp.bfloat16)
        k = k.astype(jnp.bfloat16)
        v = v.astype(jnp.bfloat16)

        heads = []
        for hh in range(NH):               # per-head scores; MXU trans_b, no .T relayout
            sl = slice(hh * HD, (hh + 1) * HD)
            s = lax.dot_general(q[:, sl], k[:, sl], (((1,), (1,)), ((), ())),
                                preferred_element_type=jnp.float32) + neg
            s = s - jnp.max(s, axis=-1, keepdims=True)
            p_exp = jnp.exp(s)
            p_attn = p_exp * pl.reciprocal(jnp.sum(p_exp, axis=-1, keepdims=True),
                                           approx=True)
            heads.append(jnp.dot(p_attn.astype(jnp.bfloat16), v[:, sl],
                                 preferred_element_type=jnp.float32))    # (BL, HD)
        # one full-width output projection instead of 4 tiny K=16 projections
        ctx = jnp.concatenate(heads, axis=-1).astype(jnp.bfloat16)       # (BL, E)
        tokens = tokens + jnp.dot(ctx, w_attn_ref[4 * d + 3],
                                  preferred_element_type=jnp.float32) + bproj

        # -- MLP --
        h2 = _ln(tokens, ln2w, ln2b).astype(jnp.bfloat16)
        # TODO(synk): timm Block uses exact (erf) GELU; tanh-approx GELU used for Mosaic lowering.
        g = jax.nn.gelu(jnp.dot(h2, w1_ref[d], preferred_element_type=jnp.float32)
                        + b1_ref[d], approximate=True)
        tokens = tokens + jnp.dot(g.astype(jnp.bfloat16), w2_ref[d],
                                  preferred_element_type=jnp.float32) + b2

    # ---- Projector: decoder norm + (decoder_pred with z2/unpatchify folded in) ----
    hdec = _ln(tokens, dec_nw, dec_nb).astype(jnp.bfloat16)
    offset = jnp.dot(hdec, dec_w_ref[...], preferred_element_type=jnp.float32) + dec_b
    x_ini = x_p * m + not_m * ptok
    o_ref[...] = x_ini + offset            # (BL, K) patch layout; host does unpatchify


# --------------------------------- pallas wrapper ---------------------------------
def guider_pallas(kp, x_patch, m_k):
    vmem = pl.BlockSpec(memory_space=pltpu.MemorySpace.VMEM)
    args = (x_patch, m_k, kp['nmask'], kp['pos'], kp['pe_w'],
            kp['w_attn'], kp['w1'], kp['w2'], kp['vecE'], kp['b1'],
            kp['dec_w'], kp['tok_dec'], kp['dec_vec'])
    # Single invocation, no grid: everything (<1 MB) stays VMEM-resident for the whole
    # forward.  For the real config (E=512, DEPTH>2) put DEPTH on a grid axis marked
    # "arbitrary" and stream the per-block weight slabs instead.
    return pl.pallas_call(
        guider_fused_kernel,
        out_shape=jax.ShapeDtypeStruct((BL, K), jnp.float32),
        in_specs=[vmem] * len(args),
        out_specs=vmem,
    )(*args)


# ----------------------------------- glue ----------------------------------------
def get_1d_sincos_pos_embed_from_grid(embed_dim, pos):
    assert embed_dim % 2 == 0
    omega = np.arange(embed_dim // 2, dtype=np.float64)
    omega /= embed_dim / 2.0
    omega = 1.0 / 10000 ** omega
    pos = pos.reshape(-1)
    out = np.einsum('m,d->md', pos, omega)
    return np.concatenate([np.sin(out), np.cos(out)], axis=1)


def get_2d_sincos_pos_embed(embed_dim, grid_size):
    assert embed_dim % 2 == 0
    grid_h = np.arange(grid_size, dtype=np.float32)
    grid_w = np.arange(grid_size, dtype=np.float32)
    grid = np.meshgrid(grid_w, grid_h)
    grid = np.stack(grid, axis=0).reshape([2, 1, grid_size, grid_size])
    emb_h = get_1d_sincos_pos_embed_from_grid(embed_dim // 2, grid[0])
    emb_w = get_1d_sincos_pos_embed_from_grid(embed_dim // 2, grid[1])
    return np.concatenate([emb_h, emb_w], axis=1)    # (grid_size**2, embed_dim)


def nearest_resize(m, size):
    # PyTorch F.interpolate(mode='nearest'): out index = floor(out_i * in/out)
    Ho, Wo = size
    Hi, Wi = m.shape[2], m.shape[3]
    ri = (jnp.arange(Ho) * Hi // Ho).astype(jnp.int32)
    ci = (jnp.arange(Wo) * Wi // Wo).astype(jnp.int32)
    return m[:, :, ri][:, :, :, ci]


def _patchify(t):
    # (B, C', H, W) -> (B, L, C'*SR*SR) flattened per patch in (c, i, j) order
    Cc = t.shape[1]
    return jnp.transpose(t.reshape(B, Cc, GRID, SR, GRID, SR),
                         (0, 2, 4, 1, 3, 5)).reshape(B, L, Cc * SR * SR)


def init_params(key):
    """Raw parameters mirroring the PyTorch module's tensors."""
    ks = iter(jax.random.split(key, 24))

    def nrm(shape, std):
        return jax.random.normal(next(ks), shape, jnp.float32) * std

    p = {}
    # ---- Aggregation ----
    p['attn_mask_token'] = nrm((C,), 0.02)                       # nn.Parameter (1,C,1,1)
    pe_std = (2.0 / (E * SR * SR)) ** 0.5                        # kaiming_normal fan_out
    p['pe_W'] = nrm((E, C, SR, SR), pe_std)                      # PatchEmbed conv weight
    p['pe_b'] = jnp.zeros((E,), jnp.float32)
    p['pos_embed'] = jnp.asarray(get_2d_sincos_pos_embed(E, GRID), jnp.float32)   # (L, E)
    # NOTE: the module zero-inits z1/z2; the harness uses random values so the whole
    # path is numerically exercised (set these to zeros to reproduce the module init).
    p['z1_w'] = nrm((C, C), 0.5)
    p['z1_b'] = nrm((C,), 0.1)
    blocks = []
    for _ in range(DEPTH):
        blocks.append(dict(
            ln1w=jnp.ones((E,), jnp.float32), ln1b=jnp.zeros((E,), jnp.float32),
            wqkv=nrm((E, 3 * E), 0.02), bqkv=jnp.zeros((3 * E,), jnp.float32),
            wproj=nrm((E, E), 0.02), bproj=jnp.zeros((E,), jnp.float32),
            ln2w=jnp.ones((E,), jnp.float32), ln2b=jnp.zeros((E,), jnp.float32),
            w1=nrm((E, MLP), 0.02), b1=jnp.zeros((MLP,), jnp.float32),
            w2=nrm((MLP, E), 0.02), b2=jnp.zeros((E,), jnp.float32),
        ))
    p['blocks'] = blocks
    # ---- Projector ----
    p['proj_mask_token'] = nrm((C,), 0.02)
    p['dec_nw'] = jnp.ones((E,), jnp.float32)
    p['dec_nb'] = jnp.zeros((E,), jnp.float32)
    p['dec_pw'] = nrm((E, PPC), 0.02)                            # Linear weight^T, cols (i,j,c)
    p['dec_pb'] = jnp.zeros((PPC,), jnp.float32)
    p['z2_w'] = nrm((C, C), 0.5)
    p['z2_b'] = nrm((C,), 0.1)
    return p


def prepare_params(p):
    """Fold z1/z2 (1x1 convs) and the softmax scale into adjacent linear maps, split
    wq/wk/wv, pack everything into few (mostly bf16) arrays for the kernel."""
    f32, bf16 = jnp.float32, jnp.bfloat16
    kp = {}

    # mask tokens expanded to patch layout (c,i,j)
    atok = jnp.repeat(p['attn_mask_token'], SR * SR).reshape(1, K)
    ptok = jnp.repeat(p['proj_mask_token'], SR * SR).reshape(1, K)

    # z1 folded into patch-embed:  tokens = xm_patch @ pe_w + pe_b
    #   pe_w[(c',i,j), e] = sum_o pe_W[e,o,i,j] * z1_w[o,c'];  pe_b[e] += sum pe_W*z1_b
    pe_w = jnp.einsum('ecij,cd->dije', p['pe_W'], p['z1_w']).reshape(K, E)
    pe_b = (jnp.einsum('ecij,c->e', p['pe_W'], p['z1_b']) + p['pe_b']).reshape(1, E)
    kp['pe_w'] = pe_w.astype(bf16)
    kp['pos'] = jnp.tile(p['pos_embed'], (B, 1)).astype(f32)     # (BL, E)

    # per-block weights: split wqkv, fold scale into q, stack into slabs
    scale = 1.0 / (HD ** 0.5)
    w_attn, vecE, w1s, w2s, b1s = [], [], [], [], []
    for blk in p['blocks']:
        wq = blk['wqkv'][:, :E] * scale
        wk = blk['wqkv'][:, E:2 * E]
        wv = blk['wqkv'][:, 2 * E:]
        bq = blk['bqkv'][:E] * scale
        bk = blk['bqkv'][E:2 * E]
        bv = blk['bqkv'][2 * E:]
        w_attn.append(jnp.stack([wq, wk, wv, blk['wproj']], axis=0))         # (4, E, E)
        vecE.append(jnp.stack([blk['ln1w'], blk['ln1b'], bq, bk, bv,
                               blk['bproj'], blk['ln2w'], blk['ln2b'],
                               blk['b2']], axis=0))                          # (9, E)
        w1s.append(blk['w1'])
        w2s.append(blk['w2'])
        b1s.append(blk['b1'].reshape(1, MLP))
    kp['w_attn'] = jnp.concatenate(w_attn, axis=0).astype(bf16)   # (DEPTH*4, E, E)
    kp['vecE'] = jnp.stack(vecE, axis=0).astype(f32)              # (DEPTH, 9, E)
    kp['w1'] = jnp.stack(w1s, axis=0).astype(bf16)                # (DEPTH, E, MLP)
    kp['w2'] = jnp.stack(w2s, axis=0).astype(bf16)                # (DEPTH, MLP, E)
    kp['b1'] = jnp.stack(b1s, axis=0).astype(f32)                 # (DEPTH, 1, MLP)

    # decoder: z2 and unpatchify-permutation folded into decoder_pred; kernel emits the
    # offset directly in patch layout (c,i,j).
    dpw = p['dec_pw'].reshape(E, SR, SR, C)
    dpb = p['dec_pb'].reshape(SR, SR, C)
    dec_w = jnp.einsum('eijc,oc->eoij', dpw, p['z2_w']).reshape(E, K)
    dec_b = (jnp.einsum('ijc,oc->oij', dpb, p['z2_w'])
             + p['z2_b'][:, None, None]).reshape(1, K)
    kp['dec_w'] = dec_w.astype(bf16)

    # packed small slabs (fewer DMA descriptors / padded VMEM windows)
    kp['tok_dec'] = jnp.concatenate([atok, ptok, dec_b], axis=0).astype(f32)   # (3, K)
    kp['dec_vec'] = jnp.concatenate([pe_b, p['dec_nw'].reshape(1, E),
                                     p['dec_nb'].reshape(1, E)], axis=0).astype(f32)  # (3, E)

    # additive block-diagonal mask forbidding cross-batch attention (batch fused on rows)
    bidx = jnp.arange(BL) // L
    kp['nmask'] = jnp.where(bidx[:, None] == bidx[None, :], 0.0, NEG).astype(f32)
    return kp


def guider_forward(kparams, inputs, mask):
    x = inputs[-1]                                               # (B, C, H, W) NCHW
    m_img = nearest_resize(mask.astype(jnp.float32), (H, W))     # (B, 1, H, W)

    # host-side layout prep (tiny index shuffles): patchify input + mask, fuse batch rows
    x_patch = _patchify(x).reshape(BL, K)                        # (BL, K) order (c,i,j)
    m_p = _patchify(m_img)                                       # (B, L, SR*SR)
    m_k = jnp.tile(m_p, (1, 1, C)).reshape(BL, K)                # broadcast over channels

    out_flat = guider_pallas(kparams, x_patch, m_k)              # (BL, K) single fused call

    # unpatchify: (B, L, (c,i,j)) -> (B, C, H, W)
    out = jnp.transpose(out_flat.reshape(B, GRID, GRID, C, SR, SR),
                        (0, 3, 1, 4, 2, 5)).reshape(B, C, H, W)
    return [out] * 4


# ---------------------- plain-JAX reference (unfused, module order) ----------------
def guider_reference(p, inputs, mask):
    x = inputs[-1]
    m = nearest_resize(mask.astype(jnp.float32), (H, W))

    def ln(z, w, b):
        mu = jnp.mean(z, -1, keepdims=True)
        var = jnp.mean((z - mu) ** 2, -1, keepdims=True)
        return (z - mu) / jnp.sqrt(var + EPS) * w + b

    # Aggregation
    xm = x * m + (1.0 - m) * p['attn_mask_token'].reshape(1, C, 1, 1)
    y = jnp.einsum('oc,bchw->bohw', p['z1_w'], xm) + p['z1_b'].reshape(1, C, 1, 1)
    patches = _patchify(y)
    tokens = (jnp.einsum('blk,ke->ble', patches, p['pe_W'].reshape(E, K).T)
              + p['pe_b'] + p['pos_embed'][None])
    for blk in p['blocks']:
        h = ln(tokens, blk['ln1w'], blk['ln1b'])
        qkv = jnp.einsum('ble,ef->blf', h, blk['wqkv']) + blk['bqkv']
        q, k_, v = qkv[..., :E], qkv[..., E:2 * E], qkv[..., 2 * E:]
        q = q.reshape(B, L, NH, HD).transpose(0, 2, 1, 3)
        k_ = k_.reshape(B, L, NH, HD).transpose(0, 2, 1, 3)
        v = v.reshape(B, L, NH, HD).transpose(0, 2, 1, 3)
        s = jnp.einsum('bhqd,bhkd->bhqk', q, k_) / (HD ** 0.5)
        a = jax.nn.softmax(s, axis=-1)
        o = jnp.einsum('bhqk,bhkd->bhqd', a, v).transpose(0, 2, 1, 3).reshape(B, L, E)
        tokens = tokens + jnp.einsum('ble,ef->blf', o, blk['wproj']) + blk['bproj']
        h2 = ln(tokens, blk['ln2w'], blk['ln2b'])
        g = jax.nn.gelu(jnp.einsum('ble,ef->blf', h2, blk['w1']) + blk['b1'],
                        approximate=True)
        tokens = tokens + jnp.einsum('blf,fe->ble', g, blk['w2']) + blk['b2']
    # Projector
    hdec = ln(tokens, p['dec_nw'], p['dec_nb'])
    pred = jnp.einsum('ble,ep->blp', hdec, p['dec_pw']) + p['dec_pb']   # (B, L, (i,j,c))
    img = jnp.transpose(pred.reshape(B, GRID, GRID, SR, SR, C),
                        (0, 5, 1, 3, 2, 4)).reshape(B, C, H, W)
    off = jnp.einsum('oc,bchw->bohw', p['z2_w'], img) + p['z2_b'].reshape(1, C, 1, 1)
    x_ini = x * m + p['proj_mask_token'].reshape(1, C, 1, 1) * (1.0 - m)
    return [x_ini + off] * 4


# ------------------------------------ main ----------------------------------------
if __name__ == "__main__":
    key = jax.random.PRNGKey(0)
    kx, km, kw = jax.random.split(key, 3)

    x = jax.random.normal(kx, (B, C, H, W), jnp.float32)
    inputs = [x, x, x, x]                                        # Guider uses inputs[-1]
    mask = (jax.random.uniform(km, (B, 1, 8, 8)) > 0.5).astype(jnp.float32)

    raw = init_params(kw)
    kparams = prepare_params(raw)

    outs = jax.block_until_ready(guider_forward(kparams, inputs, mask))
    assert len(outs) == 4
    assert all(o.shape == (B, C, H, W) for o in outs)
    assert all(bool(jnp.all(jnp.isfinite(o))) for o in outs)

    # numerical check against the unfused plain-JAX reference of the module
    # (tolerance accounts for bf16 MXU operands in the kernel; f32 residual stream)
    ref = jax.block_until_ready(guider_reference(raw, inputs, mask))
    err = float(jnp.max(jnp.abs(outs[0] - ref[0])))
    assert err < 2e-2, f"mismatch vs reference: max abs err {err}"
    print("KERNEL_OK")
</pallas_src>

<mosaic_0001>
module attributes {stable_mosaic.version = 11 : i64} {
  func.func @guider_fused_kernel(%arg0: memref<32x64xf32, #tpu.memory_space<vmem>>, %arg1: memref<32x64xf32, #tpu.memory_space<vmem>>, %arg2: memref<32x32xf32, #tpu.memory_space<vmem>>, %arg3: memref<32x64xf32, #tpu.memory_space<vmem>>, %arg4: memref<64x64xbf16, #tpu.memory_space<vmem>>, %arg5: memref<8x64x64xbf16, #tpu.memory_space<vmem>>, %arg6: memref<2x64x256xbf16, #tpu.memory_space<vmem>>, %arg7: memref<2x256x64xbf16, #tpu.memory_space<vmem>>, %arg8: memref<2x9x64xf32, #tpu.memory_space<vmem>>, %arg9: memref<2x1x256xf32, #tpu.memory_space<vmem>>, %arg10: memref<64x64xbf16, #tpu.memory_space<vmem>>, %arg11: memref<3x64xf32, #tpu.memory_space<vmem>>, %arg12: memref<3x64xf32, #tpu.memory_space<vmem>>, %arg13: memref<32x64xf32, #tpu.memory_space<vmem>>) attributes {dimension_semantics = [], scalar_prefetch = 0 : i64, scratch_operands = 0 : i64, tpu.core_type = #tpu.core_type<tc>} {
    %c0 = arith.constant 0 : index
    %c0_0 = arith.constant 0 : index
    %0 = vector.load %arg0[%c0, %c0_0] : memref<32x64xf32, #tpu.memory_space<vmem>>, vector<32x64xf32>
    %c0_1 = arith.constant 0 : index
    %c0_2 = arith.constant 0 : index
    %1 = vector.load %arg1[%c0_1, %c0_2] : memref<32x64xf32, #tpu.memory_space<vmem>>, vector<32x64xf32>
    %cst = arith.constant 1.000000e+00 : f32
    %2 = vector.broadcast %cst : f32 to vector<32x64xf32>
    %3 = arith.subf %2, %1 : vector<32x64xf32>
    %c0_3 = arith.constant 0 : index
    %c0_4 = arith.constant 0 : index
    %4 = vector.load %arg11[%c0_3, %c0_4] : memref<3x64xf32, #tpu.memory_space<vmem>>, vector<3x64xf32>
    %5 = vector.extract_strided_slice %4 {offsets = [0, 0], sizes = [1, 64], strides = [1, 1]} : vector<3x64xf32> to vector<1x64xf32>
    %6 = vector.extract_strided_slice %4 {offsets = [1, 0], sizes = [1, 64], strides = [1, 1]} : vector<3x64xf32> to vector<1x64xf32>
    %7 = vector.extract_strided_slice %4 {offsets = [2, 0], sizes = [1, 64], strides = [1, 1]} : vector<3x64xf32> to vector<1x64xf32>
    %c0_5 = arith.constant 0 : index
    %c0_6 = arith.constant 0 : index
    %8 = vector.load %arg12[%c0_5, %c0_6] : memref<3x64xf32, #tpu.memory_space<vmem>>, vector<3x64xf32>
    %9 = vector.extract_strided_slice %8 {offsets = [0, 0], sizes = [1, 64], strides = [1, 1]} : vector<3x64xf32> to vector<1x64xf32>
    %10 = vector.extract_strided_slice %8 {offsets = [1, 0], sizes = [1, 64], strides = [1, 1]} : vector<3x64xf32> to vector<1x64xf32>
    %11 = vector.extract_strided_slice %8 {offsets = [2, 0], sizes = [1, 64], strides = [1, 1]} : vector<3x64xf32> to vector<1x64xf32>
    %12 = arith.mulf %0, %1 : vector<32x64xf32>
    %13 = vector.broadcast %5 : vector<1x64xf32> to vector<32x64xf32>
    %14 = arith.mulf %3, %13 : vector<32x64xf32>
    %15 = arith.addf %12, %14 : vector<32x64xf32>
    %16 = arith.truncf %15 : vector<32x64xf32> to vector<32x64xbf16>
    %c0_7 = arith.constant 0 : index
    %c0_8 = arith.constant 0 : index
    %17 = vector.load %arg4[%c0_7, %c0_8] : memref<64x64xbf16, #tpu.memory_space<vmem>>, vector<64x64xbf16>
    %cst_9 = arith.constant dense<0.000000e+00> : vector<32x64xf32>
    %18 = tpu.matmul %16, %17, %cst_9 {dimension_numbers = #tpu.dot_dimension_numbers<[1], [0], [0], [1], [0, 0, 1, 1], [], []>} : vector<32x64xbf16>, vector<64x64xbf16>, vector<32x64xf32> -> vector<32x64xf32>
    %19 = vector.broadcast %9 : vector<1x64xf32> to vector<32x64xf32>
    %20 = arith.addf %18, %19 : vector<32x64xf32>
    %c0_10 = arith.constant 0 : index
    %c0_11 = arith.constant 0 : index
    %21 = vector.load %arg3[%c0_10, %c0_11] : memref<32x64xf32, #tpu.memory_space<vmem>>, vector<32x64xf32>
    %22 = arith.addf %20, %21 : vector<32x64xf32>
    %c0_12 = arith.constant 0 : index
    %c0_13 = arith.constant 0 : index
    %23 = vector.load %arg2[%c0_12, %c0_13] : memref<32x32xf32, #tpu.memory_space<vmem>>, vector<32x32xf32>
    %c0_14 = arith.constant 0 : index
    %c0_15 = arith.constant 0 : index
    %c0_16 = arith.constant 0 : index
    %24 = vector.load %arg8[%c0_14, %c0_15, %c0_16] : memref<2x9x64xf32, #tpu.memory_space<vmem>>, vector<1x9x64xf32>
    %25 = vector.shape_cast %24 : vector<1x9x64xf32> to vector<9x64xf32>
    %26 = vector.extract_strided_slice %25 {offsets = [0, 0], sizes = [1, 64], strides = [1, 1]} : vector<9x64xf32> to vector<1x64xf32>
    %27 = vector.extract_strided_slice %25 {offsets = [1, 0], sizes = [1, 64], strides = [1, 1]} : vector<9x64xf32> to vector<1x64xf32>
    %28 = vector.extract_strided_slice %25 {offsets = [2, 0], sizes = [1, 64], strides = [1, 1]} : vector<9x64xf32> to vector<1x64xf32>
    %29 = vector.extract_strided_slice %25 {offsets = [3, 0], sizes = [1, 64], strides = [1, 1]} : vector<9x64xf32> to vector<1x64xf32>
    %30 = vector.extract_strided_slice %25 {offsets = [4, 0], sizes = [1, 64], strides = [1, 1]} : vector<9x64xf32> to vector<1x64xf32>
    %31 = vector.extract_strided_slice %25 {offsets = [5, 0], sizes = [1, 64], strides = [1, 1]} : vector<9x64xf32> to vector<1x64xf32>
    %32 = vector.extract_strided_slice %25 {offsets = [6, 0], sizes = [1, 64], strides = [1, 1]} : vector<9x64xf32> to vector<1x64xf32>
    %33 = vector.extract_strided_slice %25 {offsets = [7, 0], sizes = [1, 64], strides = [1, 1]} : vector<9x64xf32> to vector<1x64xf32>
    %34 = vector.extract_strided_slice %25 {offsets = [8, 0], sizes = [1, 64], strides = [1, 1]} : vector<9x64xf32> to vector<1x64xf32>
    %cst_17 = arith.constant dense<0.000000e+00> : vector<32xf32>
    %35 = vector.multi_reduction <add>, %22, %cst_17 [1] : vector<32x64xf32> to vector<32xf32>
    %36 = vector.shape_cast %35 : vector<32xf32> to vector<32x1xf32>
    %cst_18 = arith.constant 6.400000e+01 : f32
    %37 = vector.broadcast %cst_18 : f32 to vector<32x1xf32>
    %38 = arith.divf %36, %37 : vector<32x1xf32>
    %39 = arith.mulf %22, %22 : vector<32x64xf32>
    %cst_19 = arith.constant dense<0.000000e+00> : vector<32xf32>
    %40 = vector.multi_reduction <add>, %39, %cst_19 [1] : vector<32x64xf32> to vector<32xf32>
    %41 = vector.shape_cast %40 : vector<32xf32> to vector<32x1xf32>
    %cst_20 = arith.constant 6.400000e+01 : f32
    %42 = vector.broadcast %cst_20 : f32 to vector<32x1xf32>
    %43 = arith.divf %41, %42 : vector<32x1xf32>
    %44 = arith.mulf %38, %38 : vector<32x1xf32>
    %45 = arith.subf %43, %44 : vector<32x1xf32>
    %46 = vector.broadcast %38 : vector<32x1xf32> to vector<32x64xf32>
    %47 = arith.subf %22, %46 : vector<32x64xf32>
    %cst_21 = arith.constant 9.99999997E-7 : f32
    %48 = vector.broadcast %cst_21 : f32 to vector<32x1xf32>
    %49 = arith.addf %45, %48 : vector<32x1xf32>
    %50 = math.rsqrt %49 : vector<32x1xf32>
    %51 = vector.broadcast %50 : vector<32x1xf32> to vector<32x64xf32>
    %52 = arith.mulf %47, %51 : vector<32x64xf32>
    %53 = vector.broadcast %26 : vector<1x64xf32> to vector<32x64xf32>
    %54 = arith.mulf %52, %53 : vector<32x64xf32>
    %55 = vector.broadcast %27 : vector<1x64xf32> to vector<32x64xf32>
    %56 = arith.addf %54, %55 : vector<32x64xf32>
    %57 = arith.truncf %56 : vector<32x64xf32> to vector<32x64xbf16>
    %c0_22 = arith.constant 0 : index
    %c0_23 = arith.constant 0 : index
    %c0_24 = arith.constant 0 : index
    %58 = vector.load %arg5[%c0_22, %c0_23, %c0_24] : memref<8x64x64xbf16, #tpu.memory_space<vmem>>, vector<1x64x64xbf16>
    %59 = vector.shape_cast %58 : vector<1x64x64xbf16> to vector<64x64xbf16>
    %cst_25 = arith.constant dense<0.000000e+00> : vector<32x64xf32>
    %60 = tpu.matmul %57, %59, %cst_25 {dimension_numbers = #tpu.dot_dimension_numbers<[1], [0], [0], [1], [0, 0, 1, 1], [], []>} : vector<32x64xbf16>, vector<64x64xbf16>, vector<32x64xf32> -> vector<32x64xf32>
    %61 = vector.broadcast %28 : vector<1x64xf32> to vector<32x64xf32>
    %62 = arith.addf %60, %61 : vector<32x64xf32>
    %c1 = arith.constant 1 : index
    %c0_26 = arith.constant 0 : index
    %c0_27 = arith.constant 0 : index
    %63 = vector.load %arg5[%c1, %c0_26, %c0_27] : memref<8x64x64xbf16, #tpu.memory_space<vmem>>, vector<1x64x64xbf16>
    %64 = vector.shape_cast %63 : vector<1x64x64xbf16> to vector<64x64xbf16>
    %cst_28 = arith.constant dense<0.000000e+00> : vector<32x64xf32>
    %65 = tpu.matmul %57, %64, %cst_28 {dimension_numbers = #tpu.dot_dimension_numbers<[1], [0], [0], [1], [0, 0, 1, 1], [], []>} : vector<32x64xbf16>, vector<64x64xbf16>, vector<32x64xf32> -> vector<32x64xf32>
    %66 = vector.broadcast %29 : vector<1x64xf32> to vector<32x64xf32>
    %67 = arith.addf %65, %66 : vector<32x64xf32>
    %c2 = arith.constant 2 : index
    %c0_29 = arith.constant 0 : index
    %c0_30 = arith.constant 0 : index
    %68 = vector.load %arg5[%c2, %c0_29, %c0_30] : memref<8x64x64xbf16, #tpu.memory_space<vmem>>, vector<1x64x64xbf16>
    %69 = vector.shape_cast %68 : vector<1x64x64xbf16> to vector<64x64xbf16>
    %cst_31 = arith.constant dense<0.000000e+00> : vector<32x64xf32>
    %70 = tpu.matmul %57, %69, %cst_31 {dimension_numbers = #tpu.dot_dimension_numbers<[1], [0], [0], [1], [0, 0, 1, 1], [], []>} : vector<32x64xbf16>, vector<64x64xbf16>, vector<32x64xf32> -> vector<32x64xf32>
    %71 = vector.broadcast %30 : vector<1x64xf32> to vector<32x64xf32>
    %72 = arith.addf %70, %71 : vector<32x64xf32>
    %73 = arith.truncf %62 : vector<32x64xf32> to vector<32x64xbf16>
    %74 = arith.truncf %67 : vector<32x64xf32> to vector<32x64xbf16>
    %75 = arith.truncf %72 : vector<32x64xf32> to vector<32x64xbf16>
    %76 = vector.extract_strided_slice %73 {offsets = [0, 0], sizes = [32, 16], strides = [1, 1]} : vector<32x64xbf16> to vector<32x16xbf16>
    %77 = vector.extract_strided_slice %74 {offsets = [0, 0], sizes = [32, 16], strides = [1, 1]} : vector<32x64xbf16> to vector<32x16xbf16>
    %cst_32 = arith.constant dense<0.000000e+00> : vector<32x32xf32>
    %78 = tpu.matmul %76, %77, %cst_32 {dimension_numbers = #tpu.dot_dimension_numbers<[1], [1], [0], [0], [0, 0, 1, 0], [], []>} : vector<32x16xbf16>, vector<32x16xbf16>, vector<32x32xf32> -> vector<32x32xf32>
    %79 = arith.addf %78, %23 : vector<32x32xf32>
    %cst_33 = arith.constant dense<0xFF800000> : vector<32xf32>
    %80 = vector.multi_reduction <maximumf>, %79, %cst_33 [1] : vector<32x32xf32> to vector<32xf32>
    %81 = vector.shape_cast %80 : vector<32xf32> to vector<32x1xf32>
    %82 = vector.broadcast %81 : vector<32x1xf32> to vector<32x32xf32>
    %83 = arith.subf %79, %82 : vector<32x32xf32>
    %84 = math.exp %83 : vector<32x32xf32>
    %cst_34 = arith.constant dense<0.000000e+00> : vector<32xf32>
    %85 = vector.multi_reduction <add>, %84, %cst_34 [1] : vector<32x32xf32> to vector<32xf32>
    %86 = vector.shape_cast %85 : vector<32xf32> to vector<32x1xf32>
    %87 = tpu.reciprocal %86 {approx = true} : vector<32x1xf32> -> vector<32x1xf32>
    %88 = vector.broadcast %87 : vector<32x1xf32> to vector<32x32xf32>
    %89 = arith.mulf %84, %88 : vector<32x32xf32>
    %90 = arith.truncf %89 : vector<32x32xf32> to vector<32x32xbf16>
    %91 = vector.extract_strided_slice %75 {offsets = [0, 0], sizes = [32, 16], strides = [1, 1]} : vector<32x64xbf16> to vector<32x16xbf16>
    %cst_35 = arith.constant dense<0.000000e+00> : vector<32x16xf32>
    %92 = tpu.matmul %90, %91, %cst_35 {dimension_numbers = #tpu.dot_dimension_numbers<[1], [0], [0], [1], [0, 0, 1, 1], [], []>} : vector<32x32xbf16>, vector<32x16xbf16>, vector<32x16xf32> -> vector<32x16xf32>
    %93 = vector.extract_strided_slice %73 {offsets = [0, 16], sizes = [32, 16], strides = [1, 1]} : vector<32x64xbf16> to vector<32x16xbf16>
    %94 = vector.extract_strided_slice %74 {offsets = [0, 16], sizes = [32, 16], strides = [1, 1]} : vector<32x64xbf16> to vector<32x16xbf16>
    %cst_36 = arith.constant dense<0.000000e+00> : vector<32x32xf32>
    %95 = tpu.matmul %93, %94, %cst_36 {dimension_numbers = #tpu.dot_dimension_numbers<[1], [1], [0], [0], [0, 0, 1, 0], [], []>} : vector<32x16xbf16>, vector<32x16xbf16>, vector<32x32xf32> -> vector<32x32xf32>
    %96 = arith.addf %95, %23 : vector<32x32xf32>
    %cst_37 = arith.constant dense<0xFF800000> : vector<32xf32>
    %97 = vector.multi_reduction <maximumf>, %96, %cst_37 [1] : vector<32x32xf32> to vector<32xf32>
    %98 = vector.shape_cast %97 : vector<32xf32> to vector<32x1xf32>
    %99 = vector.broadcast %98 : vector<32x1xf32> to vector<32x32xf32>
    %100 = arith.subf %96, %99 : vector<32x32xf32>
    %101 = math.exp %100 : vector<32x32xf32>
    %cst_38 = arith.constant dense<0.000000e+00> : vector<32xf32>
    %102 = vector.multi_reduction <add>, %101, %cst_38 [1] : vector<32x32xf32> to vector<32xf32>
    %103 = vector.shape_cast %102 : vector<32xf32> to vector<32x1xf32>
    %104 = tpu.reciprocal %103 {approx = true} : vector<32x1xf32> -> vector<32x1xf32>
    %105 = vector.broadcast %104 : vector<32x1xf32> to vector<32x32xf32>
    %106 = arith.mulf %101, %105 : vector<32x32xf32>
    %107 = arith.truncf %106 : vector<32x32xf32> to vector<32x32xbf16>
    %108 = vector.extract_strided_slice %75 {offsets = [0, 16], sizes = [32, 16], strides = [1, 1]} : vector<32x64xbf16> to vector<32x16xbf16>
    %cst_39 = arith.constant dense<0.000000e+00> : vector<32x16xf32>
    %109 = tpu.matmul %107, %108, %cst_39 {dimension_numbers = #tpu.dot_dimension_numbers<[1], [0], [0], [1], [0, 0, 1, 1], [], []>} : vector<32x32xbf16>, vector<32x16xbf16>, vector<32x16xf32> -> vector<32x16xf32>
    %110 = vector.extract_strided_slice %73 {offsets = [0, 32], sizes = [32, 16], strides = [1, 1]} : vector<32x64xbf16> to vector<32x16xbf16>
    %111 = vector.extract_strided_slice %74 {offsets = [0, 32], sizes = [32, 16], strides = [1, 1]} : vector<32x64xbf16> to vector<32x16xbf16>
    %cst_40 = arith.constant dense<0.000000e+00> : vector<32x32xf32>
    %112 = tpu.matmul %110, %111, %cst_40 {dimension_numbers = #tpu.dot_dimension_numbers<[1], [1], [0], [0], [0, 0, 1, 0], [], []>} : vector<32x16xbf16>, vector<32x16xbf16>, vector<32x32xf32> -> vector<32x32xf32>
    %113 = arith.addf %112, %23 : vector<32x32xf32>
    %cst_41 = arith.constant dense<0xFF800000> : vector<32xf32>
    %114 = vector.multi_reduction <maximumf>, %113, %cst_41 [1] : vector<32x32xf32> to vector<32xf32>
    %115 = vector.shape_cast %114 : vector<32xf32> to vector<32x1xf32>
    %116 = vector.broadcast %115 : vector<32x1xf32> to vector<32x32xf32>
    %117 = arith.subf %113, %116 : vector<32x32xf32>
    %118 = math.exp %117 : vector<32x32xf32>
    %cst_42 = arith.constant dense<0.000000e+00> : vector<32xf32>
    %119 = vector.multi_reduction <add>, %118, %cst_42 [1] : vector<32x32xf32> to vector<32xf32>
    %120 = vector.shape_cast %119 : vector<32xf32> to vector<32x1xf32>
    %121 = tpu.reciprocal %120 {approx = true} : vector<32x1xf32> -> vector<32x1xf32>
    %122 = vector.broadcast %121 : vector<32x1xf32> to vector<32x32xf32>
    %123 = arith.mulf %118, %122 : vector<32x32xf32>
    %124 = arith.truncf %123 : vector<32x32xf32> to vector<32x32xbf16>
    %125 = vector.extract_strided_slice %75 {offsets = [0, 32], sizes = [32, 16], strides = [1, 1]} : vector<32x64xbf16> to vector<32x16xbf16>
    %cst_43 = arith.constant dense<0.000000e+00> : vector<32x16xf32>
    %126 = tpu.matmul %124, %125, %cst_43 {dimension_numbers = #tpu.dot_dimension_numbers<[1], [0], [0], [1], [0, 0, 1, 1], [], []>} : vector<32x32xbf16>, vector<32x16xbf16>, vector<32x16xf32> -> vector<32x16xf32>
    %127 = vector.extract_strided_slice %73 {offsets = [0, 48], sizes = [32, 16], strides = [1, 1]} : vector<32x64xbf16> to vector<32x16xbf16>
    %128 = vector.extract_strided_slice %74 {offsets = [0, 48], sizes = [32, 16], strides = [1, 1]} : vector<32x64xbf16> to vector<32x16xbf16>
    %cst_44 = arith.constant dense<0.000000e+00> : vector<32x32xf32>
    %129 = tpu.matmul %127, %128, %cst_44 {dimension_numbers = #tpu.dot_dimension_numbers<[1], [1], [0], [0], [0, 0, 1, 0], [], []>} : vector<32x16xbf16>, vector<32x16xbf16>, vector<32x32xf32> -> vector<32x32xf32>
    %130 = arith.addf %129, %23 : vector<32x32xf32>
    %cst_45 = arith.constant dense<0xFF800000> : vector<32xf32>
    %131 = vector.multi_reduction <maximumf>, %130, %cst_45 [1] : vector<32x32xf32> to vector<32xf32>
    %132 = vector.shape_cast %131 : vector<32xf32> to vector<32x1xf32>
    %133 = vector.broadcast %132 : vector<32x1xf32> to vector<32x32xf32>
    %134 = arith.subf %130, %133 : vector<32x32xf32>
    %135 = math.exp %134 : vector<32x32xf32>
    %cst_46 = arith.constant dense<0.000000e+00> : vector<32xf32>
    %136 = vector.multi_reduction <add>, %135, %cst_46 [1] : vector<32x32xf32> to vector<32xf32>
    %137 = vector.shape_cast %136 : vector<32xf32> to vector<32x1xf32>
    %138 = tpu.reciprocal %137 {approx = true} : vector<32x1xf32> -> vector<32x1xf32>
    %139 = vector.broadcast %138 : vector<32x1xf32> to vector<32x32xf32>
    %140 = arith.mulf %135, %139 : vector<32x32xf32>
    %141 = arith.truncf %140 : vector<32x32xf32> to vector<32x32xbf16>
    %142 = vector.extract_strided_slice %75 {offsets = [0, 48], sizes = [32, 16], strides = [1, 1]} : vector<32x64xbf16> to vector<32x16xbf16>
    %cst_47 = arith.constant dense<0.000000e+00> : vector<32x16xf32>
    %143 = tpu.matmul %141, %142, %cst_47 {dimension_numbers = #tpu.dot_dimension_numbers<[1], [0], [0], [1], [0, 0, 1, 1], [], []>} : vector<32x32xbf16>, vector<32x16xbf16>, vector<32x16xf32> -> vector<32x16xf32>
    %144 = tpu.concatenate %92, %109, %126, %143 in 1 : vector<32x16xf32>, vector<32x16xf32>, vector<32x16xf32>, vector<32x16xf32> -> vector<32x64xf32>
    %145 = arith.truncf %144 : vector<32x64xf32> to vector<32x64xbf16>
    %c3 = arith.constant 3 : index
    %c0_48 = arith.constant 0 : index
    %c0_49 = arith.constant 0 : index
    %146 = vector.load %arg5[%c3, %c0_48, %c0_49] : memref<8x64x64xbf16, #tpu.memory_space<vmem>>, vector<1x64x64xbf16>
    %147 = vector.shape_cast %146 : vector<1x64x64xbf16> to vector<64x64xbf16>
    %cst_50 = arith.constant dense<0.000000e+00> : vector<32x64xf32>
    %148 = tpu.matmul %145, %147, %cst_50 {dimension_numbers = #tpu.dot_dimension_numbers<[1], [0], [0], [1], [0, 0, 1, 1], [], []>} : vector<32x64xbf16>, vector<64x64xbf16>, vector<32x64xf32> -> vector<32x64xf32>
    %149 = arith.addf %22, %148 : vector<32x64xf32>
    %150 = vector.broadcast %31 : vector<1x64xf32> to vector<32x64xf32>
    %151 = arith.addf %149, %150 : vector<32x64xf32>
    %cst_51 = arith.constant dense<0.000000e+00> : vector<32xf32>
    %152 = vector.multi_reduction <add>, %151, %cst_51 [1] : vector<32x64xf32> to vector<32xf32>
    %153 = vector.shape_cast %152 : vector<32xf32> to vector<32x1xf32>
    %cst_52 = arith.constant 6.400000e+01 : f32
    %154 = vector.broadcast %cst_52 : f32 to vector<32x1xf32>
    %155 = arith.divf %153, %154 : vector<32x1xf32>
    %156 = arith.mulf %151, %151 : vector<32x64xf32>
    %cst_53 = arith.constant dense<0.000000e+00> : vector<32xf32>
    %157 = vector.multi_reduction <add>, %156, %cst_53 [1] : vector<32x64xf32> to vector<32xf32>
    %158 = vector.shape_cast %157 : vector<32xf32> to vector<32x1xf32>
    %cst_54 = arith.constant 6.400000e+01 : f32
    %159 = vector.broadcast %cst_54 : f32 to vector<32x1xf32>
    %160 = arith.divf %158, %159 : vector<32x1xf32>
    %161 = arith.mulf %155, %155 : vector<32x1xf32>
    %162 = arith.subf %160, %161 : vector<32x1xf32>
    %163 = vector.broadcast %155 : vector<32x1xf32> to vector<32x64xf32>
    %164 = arith.subf %151, %163 : vector<32x64xf32>
    %cst_55 = arith.constant 9.99999997E-7 : f32
    %165 = vector.broadcast %cst_55 : f32 to vector<32x1xf32>
    %166 = arith.addf %162, %165 : vector<32x1xf32>
    %167 = math.rsqrt %166 : vector<32x1xf32>
    %168 = vector.broadcast %167 : vector<32x1xf32> to vector<32x64xf32>
    %169 = arith.mulf %164, %168 : vector<32x64xf32>
    %170 = vector.broadcast %32 : vector<1x64xf32> to vector<32x64xf32>
    %171 = arith.mulf %169, %170 : vector<32x64xf32>
    %172 = vector.broadcast %33 : vector<1x64xf32> to vector<32x64xf32>
    %173 = arith.addf %171, %172 : vector<32x64xf32>
    %174 = arith.truncf %173 : vector<32x64xf32> to vector<32x64xbf16>
    %c0_56 = arith.constant 0 : index
    %c0_57 = arith.constant 0 : index
    %c0_58 = arith.constant 0 : index
    %175 = vector.load %arg6[%c0_56, %c0_57, %c0_58] : memref<2x64x256xbf16, #tpu.memory_space<vmem>>, vector<1x64x256xbf16>
    %176 = vector.shape_cast %175 : vector<1x64x256xbf16> to vector<64x256xbf16>
    %cst_59 = arith.constant dense<0.000000e+00> : vector<32x256xf32>
    %177 = tpu.matmul %174, %176, %cst_59 {dimension_numbers = #tpu.dot_dimension_numbers<[1], [0], [0], [1], [0, 0, 1, 1], [], []>} : vector<32x64xbf16>, vector<64x256xbf16>, vector<32x256xf32> -> vector<32x256xf32>
    %c0_60 = arith.constant 0 : index
    %c0_61 = arith.constant 0 : index
    %c0_62 = arith.constant 0 : index
    %178 = vector.load %arg9[%c0_60, %c0_61, %c0_62] : memref<2x1x256xf32, #tpu.memory_space<vmem>>, vector<1x1x256xf32>
    %179 = vector.shape_cast %178 : vector<1x1x256xf32> to vector<1x256xf32>
    %180 = vector.broadcast %179 : vector<1x256xf32> to vector<32x256xf32>
    %181 = arith.addf %177, %180 : vector<32x256xf32>
    %182 = arith.mulf %181, %181 : vector<32x256xf32>
    %183 = arith.mulf %181, %182 : vector<32x256xf32>
    %cst_63 = arith.constant 4.471500e-02 : f32
    %184 = vector.broadcast %cst_63 : f32 to vector<32x256xf32>
    %185 = arith.mulf %184, %183 : vector<32x256xf32>
    %186 = arith.addf %181, %185 : vector<32x256xf32>
    %cst_64 = arith.constant 0.797884583 : f32
    %187 = vector.broadcast %cst_64 : f32 to vector<32x256xf32>
    %188 = arith.mulf %187, %186 : vector<32x256xf32>
    %189 = math.tanh %188 : vector<32x256xf32>
    %cst_65 = arith.constant 1.000000e+00 : f32
    %190 = vector.broadcast %cst_65 : f32 to vector<32x256xf32>
    %191 = arith.addf %190, %189 : vector<32x256xf32>
    %cst_66 = arith.constant 5.000000e-01 : f32
    %192 = vector.broadcast %cst_66 : f32 to vector<32x256xf32>
    %193 = arith.mulf %192, %191 : vector<32x256xf32>
    %194 = arith.mulf %181, %193 : vector<32x256xf32>
    %195 = arith.truncf %194 : vector<32x256xf32> to vector<32x256xbf16>
    %c0_67 = arith.constant 0 : index
    %c0_68 = arith.constant 0 : index
    %c0_69 = arith.constant 0 : index
    %196 = vector.load %arg7[%c0_67, %c0_68, %c0_69] : memref<2x256x64xbf16, #tpu.memory_space<vmem>>, vector<1x256x64xbf16>
    %197 = vector.shape_cast %196 : vector<1x256x64xbf16> to vector<256x64xbf16>
    %cst_70 = arith.constant dense<0.000000e+00> : vector<32x64xf32>
    %198 = tpu.matmul %195, %197, %cst_70 {dimension_numbers = #tpu.dot_dimension_numbers<[1], [0], [0], [1], [0, 0, 1, 1], [], []>} : vector<32x256xbf16>, vector<256x64xbf16>, vector<32x64xf32> -> vector<32x64xf32>
    %199 = arith.addf %151, %198 : vector<32x64xf32>
    %200 = vector.broadcast %34 : vector<1x64xf32> to vector<32x64xf32>
    %201 = arith.addf %199, %200 : vector<32x64xf32>
    %c1_71 = arith.constant 1 : index
    %c0_72 = arith.constant 0 : index
    %c0_73 = arith.constant 0 : index
    %202 = vector.load %arg8[%c1_71, %c0_72, %c0_73] : memref<2x9x64xf32, #tpu.memory_space<vmem>>, vector<1x9x64xf32>
    %203 = vector.shape_cast %202 : vector<1x9x64xf32> to vector<9x64xf32>
    %204 = vector.extract_strided_slice %203 {offsets = [0, 0], sizes = [1, 64], strides = [1, 1]} : vector<9x64xf32> to vector<1x64xf32>
    %205 = vector.extract_strided_slice %203 {offsets = [1, 0], sizes = [1, 64], strides = [1, 1]} : vector<9x64xf32> to vector<1x64xf32>
    %206 = vector.extract_strided_slice %203 {offsets = [2, 0], sizes = [1, 64], strides = [1, 1]} : vector<9x64xf32> to vector<1x64xf32>
    %207 = vector.extract_strided_slice %203 {offsets = [3, 0], sizes = [1, 64], strides = [1, 1]} : vector<9x64xf32> to vector<1x64xf32>
    %208 = vector.extract_strided_slice %203 {offsets = [4, 0], sizes = [1, 64], strides = [1, 1]} : vector<9x64xf32> to vector<1x64xf32>
    %209 = vector.extract_strided_slice %203 {offsets = [5, 0], sizes = [1, 64], strides = [1, 1]} : vector<9x64xf32> to vector<1x64xf32>
    %210 = vector.extract_strided_slice %203 {offsets = [6, 0], sizes = [1, 64], strides = [1, 1]} : vector<9x64xf32> to vector<1x64xf32>
    %211 = vector.extract_strided_slice %203 {offsets = [7, 0], sizes = [1, 64], strides = [1, 1]} : vector<9x64xf32> to vector<1x64xf32>
    %212 = vector.extract_strided_slice %203 {offsets = [8, 0], sizes = [1, 64], strides = [1, 1]} : vector<9x64xf32> to vector<1x64xf32>
    %cst_74 = arith.constant dense<0.000000e+00> : vector<32xf32>
    %213 = vector.multi_reduction <add>, %201, %cst_74 [1] : vector<32x64xf32> to vector<32xf32>
    %214 = vector.shape_cast %213 : vector<32xf32> to vector<32x1xf32>
    %cst_75 = arith.constant 6.400000e+01 : f32
    %215 = vector.broadcast %cst_75 : f32 to vector<32x1xf32>
    %216 = arith.divf %214, %215 : vector<32x1xf32>
    %217 = arith.mulf %201, %201 : vector<32x64xf32>
    %cst_76 = arith.constant dense<0.000000e+00> : vector<32xf32>
    %218 = vector.multi_reduction <add>, %217, %cst_76 [1] : vector<32x64xf32> to vector<32xf32>
    %219 = vector.shape_cast %218 : vector<32xf32> to vector<32x1xf32>
    %cst_77 = arith.constant 6.400000e+01 : f32
    %220 = vector.broadcast %cst_77 : f32 to vector<32x1xf32>
    %221 = arith.divf %219, %220 : vector<32x1xf32>
    %222 = arith.mulf %216, %216 : vector<32x1xf32>
    %223 = arith.subf %221, %222 : vector<32x1xf32>
    %224 = vector.broadcast %216 : vector<32x1xf32> to vector<32x64xf32>
    %225 = arith.subf %201, %224 : vector<32x64xf32>
    %cst_78 = arith.constant 9.99999997E-7 : f32
    %226 = vector.broadcast %cst_78 : f32 to vector<32x1xf32>
    %227 = arith.addf %223, %226 : vector<32x1xf32>
    %228 = math.rsqrt %227 : vector<32x1xf32>
    %229 = vector.broadcast %228 : vector<32x1xf32> to vector<32x64xf32>
    %230 = arith.mulf %225, %229 : vector<32x64xf32>
    %231 = vector.broadcast %204 : vector<1x64xf32> to vector<32x64xf32>
    %232 = arith.mulf %230, %231 : vector<32x64xf32>
    %233 = vector.broadcast %205 : vector<1x64xf32> to vector<32x64xf32>
    %234 = arith.addf %232, %233 : vector<32x64xf32>
    %235 = arith.truncf %234 : vector<32x64xf32> to vector<32x64xbf16>
    %c4 = arith.constant 4 : index
    %c0_79 = arith.constant 0 : index
    %c0_80 = arith.constant 0 : index
    %236 = vector.load %arg5[%c4, %c0_79, %c0_80] : memref<8x64x64xbf16, #tpu.memory_space<vmem>>, vector<1x64x64xbf16>
    %237 = vector.shape_cast %236 : vector<1x64x64xbf16> to vector<64x64xbf16>
    %cst_81 = arith.constant dense<0.000000e+00> : vector<32x64xf32>
    %238 = tpu.matmul %235, %237, %cst_81 {dimension_numbers = #tpu.dot_dimension_numbers<[1], [0], [0], [1], [0, 0, 1, 1], [], []>} : vector<32x64xbf16>, vector<64x64xbf16>, vector<32x64xf32> -> vector<32x64xf32>
    %239 = vector.broadcast %206 : vector<1x64xf32> to vector<32x64xf32>
    %240 = arith.addf %238, %239 : vector<32x64xf32>
    %c5 = arith.constant 5 : index
    %c0_82 = arith.constant 0 : index
    %c0_83 = arith.constant 0 : index
    %241 = vector.load %arg5[%c5, %c0_82, %c0_83] : memref<8x64x64xbf16, #tpu.memory_space<vmem>>, vector<1x64x64xbf16>
    %242 = vector.shape_cast %241 : vector<1x64x64xbf16> to vector<64x64xbf16>
    %cst_84 = arith.constant dense<0.000000e+00> : vector<32x64xf32>
    %243 = tpu.matmul %235, %242, %cst_84 {dimension_numbers = #tpu.dot_dimension_numbers<[1], [0], [0], [1], [0, 0, 1, 1], [], []>} : vector<32x64xbf16>, vector<64x64xbf16>, vector<32x64xf32> -> vector<32x64xf32>
    %244 = vector.broadcast %207 : vector<1x64xf32> to vector<32x64xf32>
    %245 = arith.addf %243, %244 : vector<32x64xf32>
    %c6 = arith.constant 6 : index
    %c0_85 = arith.constant 0 : index
    %c0_86 = arith.constant 0 : index
    %246 = vector.load %arg5[%c6, %c0_85, %c0_86] : memref<8x64x64xbf16, #tpu.memory_space<vmem>>, vector<1x64x64xbf16>
    %247 = vector.shape_cast %246 : vector<1x64x64xbf16> to vector<64x64xbf16>
    %cst_87 = arith.constant dense<0.000000e+00> : vector<32x64xf32>
    %248 = tpu.matmul %235, %247, %cst_87 {dimension_numbers = #tpu.dot_dimension_numbers<[1], [0], [0], [1], [0, 0, 1, 1], [], []>} : vector<32x64xbf16>, vector<64x64xbf16>, vector<32x64xf32> -> vector<32x64xf32>
    %249 = vector.broadcast %208 : vector<1x64xf32> to vector<32x64xf32>
    %250 = arith.addf %248, %249 : vector<32x64xf32>
    %251 = arith.truncf %240 : vector<32x64xf32> to vector<32x64xbf16>
    %252 = arith.truncf %245 : vector<32x64xf32> to vector<32x64xbf16>
    %253 = arith.truncf %250 : vector<32x64xf32> to vector<32x64xbf16>
    %254 = vector.extract_strided_slice %251 {offsets = [0, 0], sizes = [32, 16], strides = [1, 1]} : vector<32x64xbf16> to vector<32x16xbf16>
    %255 = vector.extract_strided_slice %252 {offsets = [0, 0], sizes = [32, 16], strides = [1, 1]} : vector<32x64xbf16> to vector<32x16xbf16>
    %cst_88 = arith.constant dense<0.000000e+00> : vector<32x32xf32>
    %256 = tpu.matmul %254, %255, %cst_88 {dimension_numbers = #tpu.dot_dimension_numbers<[1], [1], [0], [0], [0, 0, 1, 0], [], []>} : vector<32x16xbf16>, vector<32x16xbf16>, vector<32x32xf32> -> vector<32x32xf32>
    %257 = arith.addf %256, %23 : vector<32x32xf32>
    %cst_89 = arith.constant dense<0xFF800000> : vector<32xf32>
    %258 = vector.multi_reduction <maximumf>, %257, %cst_89 [1] : vector<32x32xf32> to vector<32xf32>
    %259 = vector.shape_cast %258 : vector<32xf32> to vector<32x1xf32>
    %260 = vector.broadcast %259 : vector<32x1xf32> to vector<32x32xf32>
    %261 = arith.subf %257, %260 : vector<32x32xf32>
    %262 = math.exp %261 : vector<32x32xf32>
    %cst_90 = arith.constant dense<0.000000e+00> : vector<32xf32>
    %263 = vector.multi_reduction <add>, %262, %cst_90 [1] : vector<32x32xf32> to vector<32xf32>
    %264 = vector.shape_cast %263 : vector<32xf32> to vector<32x1xf32>
    %265 = tpu.reciprocal %264 {approx = true} : vector<32x1xf32> -> vector<32x1xf32>
    %266 = vector.broadcast %265 : vector<32x1xf32> to vector<32x32xf32>
    %267 = arith.mulf %262, %266 : vector<32x32xf32>
    %268 = arith.truncf %267 : vector<32x32xf32> to vector<32x32xbf16>
    %269 = vector.extract_strided_slice %253 {offsets = [0, 0], sizes = [32, 16], strides = [1, 1]} : vector<32x64xbf16> to vector<32x16xbf16>
    %cst_91 = arith.constant dense<0.000000e+00> : vector<32x16xf32>
    %270 = tpu.matmul %268, %269, %cst_91 {dimension_numbers = #tpu.dot_dimension_numbers<[1], [0], [0], [1], [0, 0, 1, 1], [], []>} : vector<32x32xbf16>, vector<32x16xbf16>, vector<32x16xf32> -> vector<32x16xf32>
    %271 = vector.extract_strided_slice %251 {offsets = [0, 16], sizes = [32, 16], strides = [1, 1]} : vector<32x64xbf16> to vector<32x16xbf16>
    %272 = vector.extract_strided_slice %252 {offsets = [0, 16], sizes = [32, 16], strides = [1, 1]} : vector<32x64xbf16> to vector<32x16xbf16>
    %cst_92 = arith.constant dense<0.000000e+00> : vector<32x32xf32>
    %273 = tpu.matmul %271, %272, %cst_92 {dimension_numbers = #tpu.dot_dimension_numbers<[1], [1], [0], [0], [0, 0, 1, 0], [], []>} : vector<32x16xbf16>, vector<32x16xbf16>, vector<32x32xf32> -> vector<32x32xf32>
    %274 = arith.addf %273, %23 : vector<32x32xf32>
    %cst_93 = arith.constant dense<0xFF800000> : vector<32xf32>
    %275 = vector.multi_reduction <maximumf>, %274, %cst_93 [1] : vector<32x32xf32> to vector<32xf32>
    %276 = vector.shape_cast %275 : vector<32xf32> to vector<32x1xf32>
    %277 = vector.broadcast %276 : vector<32x1xf32> to vector<32x32xf32>
    %278 = arith.subf %274, %277 : vector<32x32xf32>
    %279 = math.exp %278 : vector<32x32xf32>
    %cst_94 = arith.constant dense<0.000000e+00> : vector<32xf32>
    %280 = vector.multi_reduction <add>, %279, %cst_94 [1] : vector<32x32xf32> to vector<32xf32>
    %281 = vector.shape_cast %280 : vector<32xf32> to vector<32x1xf32>
    %282 = tpu.reciprocal %281 {approx = true} : vector<32x1xf32> -> vector<32x1xf32>
    %283 = vector.broadcast %282 : vector<32x1xf32> to vector<32x32xf32>
    %284 = arith.mulf %279, %283 : vector<32x32xf32>
    %285 = arith.truncf %284 : vector<32x32xf32> to vector<32x32xbf16>
    %286 = vector.extract_strided_slice %253 {offsets = [0, 16], sizes = [32, 16], strides = [1, 1]} : vector<32x64xbf16> to vector<32x16xbf16>
    %cst_95 = arith.constant dense<0.000000e+00> : vector<32x16xf32>
    %287 = tpu.matmul %285, %286, %cst_95 {dimension_numbers = #tpu.dot_dimension_numbers<[1], [0], [0], [1], [0, 0, 1, 1], [], []>} : vector<32x32xbf16>, vector<32x16xbf16>, vector<32x16xf32> -> vector<32x16xf32>
    %288 = vector.extract_strided_slice %251 {offsets = [0, 32], sizes = [32, 16], strides = [1, 1]} : vector<32x64xbf16> to vector<32x16xbf16>
    %289 = vector.extract_strided_slice %252 {offsets = [0, 32], sizes = [32, 16], strides = [1, 1]} : vector<32x64xbf16> to vector<32x16xbf16>
    %cst_96 = arith.constant dense<0.000000e+00> : vector<32x32xf32>
    %290 = tpu.matmul %288, %289, %cst_96 {dimension_numbers = #tpu.dot_dimension_numbers<[1], [1], [0], [0], [0, 0, 1, 0], [], []>} : vector<32x16xbf16>, vector<32x16xbf16>, vector<32x32xf32> -> vector<32x32xf32>
    %291 = arith.addf %290, %23 : vector<32x32xf32>
    %cst_97 = arith.constant dense<0xFF800000> : vector<32xf32>
    %292 = vector.multi_reduction <maximumf>, %291, %cst_97 [1] : vector<32x32xf32> to vector<32xf32>
    %293 = vector.shape_cast %292 : vector<32xf32> to vector<32x1xf32>
    %294 = vector.broadcast %293 : vector<32x1xf32> to vector<32x32xf32>
    %295 = arith.subf %291, %294 : vector<32x32xf32>
    %296 = math.exp %295 : vector<32x32xf32>
    %cst_98 = arith.constant dense<0.000000e+00> : vector<32xf32>
    %297 = vector.multi_reduction <add>, %296, %cst_98 [1] : vector<32x32xf32> to vector<32xf32>
    %298 = vector.shape_cast %297 : vector<32xf32> to vector<32x1xf32>
    %299 = tpu.reciprocal %298 {approx = true} : vector<32x1xf32> -> vector<32x1xf32>
    %300 = vector.broadcast %299 : vector<32x1xf32> to vector<32x32xf32>
    %301 = arith.mulf %296, %300 : vector<32x32xf32>
    %302 = arith.truncf %301 : vector<32x32xf32> to vector<32x32xbf16>
    %303 = vector.extract_strided_slice %253 {offsets = [0, 32], sizes = [32, 16], strides = [1, 1]} : vector<32x64xbf16> to vector<32x16xbf16>
    %cst_99 = arith.constant dense<0.000000e+00> : vector<32x16xf32>
    %304 = tpu.matmul %302, %303, %cst_99 {dimension_numbers = #tpu.dot_dimension_numbers<[1], [0], [0], [1], [0, 0, 1, 1], [], []>} : vector<32x32xbf16>, vector<32x16xbf16>, vector<32x16xf32> -> vector<32x16xf32>
    %305 = vector.extract_strided_slice %251 {offsets = [0, 48], sizes = [32, 16], strides = [1, 1]} : vector<32x64xbf16> to vector<32x16xbf16>
    %306 = vector.extract_strided_slice %252 {offsets = [0, 48], sizes = [32, 16], strides = [1, 1]} : vector<32x64xbf16> to vector<32x16xbf16>
    %cst_100 = arith.constant dense<0.000000e+00> : vector<32x32xf32>
    %307 = tpu.matmul %305, %306, %cst_100 {dimension_numbers = #tpu.dot_dimension_numbers<[1], [1], [0], [0], [0, 0, 1, 0], [], []>} : vector<32x16xbf16>, vector<32x16xbf16>, vector<32x32xf32> -> vector<32x32xf32>
    %308 = arith.addf %307, %23 : vector<32x32xf32>
    %cst_101 = arith.constant dense<0xFF800000> : vector<32xf32>
    %309 = vector.multi_reduction <maximumf>, %308, %cst_101 [1] : vector<32x32xf32> to vector<32xf32>
    %310 = vector.shape_cast %309 : vector<32xf32> to vector<32x1xf32>
    %311 = vector.broadcast %310 : vector<32x1xf32> to vector<32x32xf32>
    %312 = arith.subf %308, %311 : vector<32x32xf32>
    %313 = math.exp %312 : vector<32x32xf32>
    %cst_102 = arith.constant dense<0.000000e+00> : vector<32xf32>
    %314 = vector.multi_reduction <add>, %313, %cst_102 [1] : vector<32x32xf32> to vector<32xf32>
    %315 = vector.shape_cast %314 : vector<32xf32> to vector<32x1xf32>
    %316 = tpu.reciprocal %315 {approx = true} : vector<32x1xf32> -> vector<32x1xf32>
    %317 = vector.broadcast %316 : vector<32x1xf32> to vector<32x32xf32>
    %318 = arith.mulf %313, %317 : vector<32x32xf32>
    %319 = arith.truncf %318 : vector<32x32xf32> to vector<32x32xbf16>
    %320 = vector.extract_strided_slice %253 {offsets = [0, 48], sizes = [32, 16], strides = [1, 1]} : vector<32x64xbf16> to vector<32x16xbf16>
    %cst_103 = arith.constant dense<0.000000e+00> : vector<32x16xf32>
    %321 = tpu.matmul %319, %320, %cst_103 {dimension_numbers = #tpu.dot_dimension_numbers<[1], [0], [0], [1], [0, 0, 1, 1], [], []>} : vector<32x32xbf16>, vector<32x16xbf16>, vector<32x16xf32> -> vector<32x16xf32>
    %322 = tpu.concatenate %270, %287, %304, %321 in 1 : vector<32x16xf32>, vector<32x16xf32>, vector<32x16xf32>, vector<32x16xf32> -> vector<32x64xf32>
    %323 = arith.truncf %322 : vector<32x64xf32> to vector<32x64xbf16>
    %c7 = arith.constant 7 : index
    %c0_104 = arith.constant 0 : index
    %c0_105 = arith.constant 0 : index
    %324 = vector.load %arg5[%c7, %c0_104, %c0_105] : memref<8x64x64xbf16, #tpu.memory_space<vmem>>, vector<1x64x64xbf16>
    %325 = vector.shape_cast %324 : vector<1x64x64xbf16> to vector<64x64xbf16>
    %cst_106 = arith.constant dense<0.000000e+00> : vector<32x64xf32>
    %326 = tpu.matmul %323, %325, %cst_106 {dimension_numbers = #tpu.dot_dimension_numbers<[1], [0], [0], [1], [0, 0, 1, 1], [], []>} : vector<32x64xbf16>, vector<64x64xbf16>, vector<32x64xf32> -> vector<32x64xf32>
    %327 = arith.addf %201, %326 : vector<32x64xf32>
    %328 = vector.broadcast %209 : vector<1x64xf32> to vector<32x64xf32>
    %329 = arith.addf %327, %328 : vector<32x64xf32>
    %cst_107 = arith.constant dense<0.000000e+00> : vector<32xf32>
    %330 = vector.multi_reduction <add>, %329, %cst_107 [1] : vector<32x64xf32> to vector<32xf32>
    %331 = vector.shape_cast %330 : vector<32xf32> to vector<32x1xf32>
    %cst_108 = arith.constant 6.400000e+01 : f32
    %332 = vector.broadcast %cst_108 : f32 to vector<32x1xf32>
    %333 = arith.divf %331, %332 : vector<32x1xf32>
    %334 = arith.mulf %329, %329 : vector<32x64xf32>
    %cst_109 = arith.constant dense<0.000000e+00> : vector<32xf32>
    %335 = vector.multi_reduction <add>, %334, %cst_109 [1] : vector<32x64xf32> to vector<32xf32>
    %336 = vector.shape_cast %335 : vector<32xf32> to vector<32x1xf32>
    %cst_110 = arith.constant 6.400000e+01 : f32
    %337 = vector.broadcast %cst_110 : f32 to vector<32x1xf32>
    %338 = arith.divf %336, %337 : vector<32x1xf32>
    %339 = arith.mulf %333, %333 : vector<32x1xf32>
    %340 = arith.subf %338, %339 : vector<32x1xf32>
    %341 = vector.broadcast %333 : vector<32x1xf32> to vector<32x64xf32>
    %342 = arith.subf %329, %341 : vector<32x64xf32>
    %cst_111 = arith.constant 9.99999997E-7 : f32
    %343 = vector.broadcast %cst_111 : f32 to vector<32x1xf32>
    %344 = arith.addf %340, %343 : vector<32x1xf32>
    %345 = math.rsqrt %344 : vector<32x1xf32>
    %346 = vector.broadcast %345 : vector<32x1xf32> to vector<32x64xf32>
    %347 = arith.mulf %342, %346 : vector<32x64xf32>
    %348 = vector.broadcast %210 : vector<1x64xf32> to vector<32x64xf32>
    %349 = arith.mulf %347, %348 : vector<32x64xf32>
    %350 = vector.broadcast %211 : vector<1x64xf32> to vector<32x64xf32>
    %351 = arith.addf %349, %350 : vector<32x64xf32>
    %352 = arith.truncf %351 : vector<32x64xf32> to vector<32x64xbf16>
    %c1_112 = arith.constant 1 : index
    %c0_113 = arith.constant 0 : index
    %c0_114 = arith.constant 0 : index
    %353 = vector.load %arg6[%c1_112, %c0_113, %c0_114] : memref<2x64x256xbf16, #tpu.memory_space<vmem>>, vector<1x64x256xbf16>
    %354 = vector.shape_cast %353 : vector<1x64x256xbf16> to vector<64x256xbf16>
    %cst_115 = arith.constant dense<0.000000e+00> : vector<32x256xf32>
    %355 = tpu.matmul %352, %354, %cst_115 {dimension_numbers = #tpu.dot_dimension_numbers<[1], [0], [0], [1], [0, 0, 1, 1], [], []>} : vector<32x64xbf16>, vector<64x256xbf16>, vector<32x256xf32> -> vector<32x256xf32>
    %c1_116 = arith.constant 1 : index
    %c0_117 = arith.constant 0 : index
    %c0_118 = arith.constant 0 : index
    %356 = vector.load %arg9[%c1_116, %c0_117, %c0_118] : memref<2x1x256xf32, #tpu.memory_space<vmem>>, vector<1x1x256xf32>
    %357 = vector.shape_cast %356 : vector<1x1x256xf32> to vector<1x256xf32>
    %358 = vector.broadcast %357 : vector<1x256xf32> to vector<32x256xf32>
    %359 = arith.addf %355, %358 : vector<32x256xf32>
    %360 = arith.mulf %359, %359 : vector<32x256xf32>
    %361 = arith.mulf %359, %360 : vector<32x256xf32>
    %cst_119 = arith.constant 4.471500e-02 : f32
    %362 = vector.broadcast %cst_119 : f32 to vector<32x256xf32>
    %363 = arith.mulf %362, %361 : vector<32x256xf32>
    %364 = arith.addf %359, %363 : vector<32x256xf32>
    %cst_120 = arith.constant 0.797884583 : f32
    %365 = vector.broadcast %cst_120 : f32 to vector<32x256xf32>
    %366 = arith.mulf %365, %364 : vector<32x256xf32>
    %367 = math.tanh %366 : vector<32x256xf32>
    %cst_121 = arith.constant 1.000000e+00 : f32
    %368 = vector.broadcast %cst_121 : f32 to vector<32x256xf32>
    %369 = arith.addf %368, %367 : vector<32x256xf32>
    %cst_122 = arith.constant 5.000000e-01 : f32
    %370 = vector.broadcast %cst_122 : f32 to vector<32x256xf32>
    %371 = arith.mulf %370, %369 : vector<32x256xf32>
    %372 = arith.mulf %359, %371 : vector<32x256xf32>
    %373 = arith.truncf %372 : vector<32x256xf32> to vector<32x256xbf16>
    %c1_123 = arith.constant 1 : index
    %c0_124 = arith.constant 0 : index
    %c0_125 = arith.constant 0 : index
    %374 = vector.load %arg7[%c1_123, %c0_124, %c0_125] : memref<2x256x64xbf16, #tpu.memory_space<vmem>>, vector<1x256x64xbf16>
    %375 = vector.shape_cast %374 : vector<1x256x64xbf16> to vector<256x64xbf16>
    %cst_126 = arith.constant dense<0.000000e+00> : vector<32x64xf32>
    %376 = tpu.matmul %373, %375, %cst_126 {dimension_numbers = #tpu.dot_dimension_numbers<[1], [0], [0], [1], [0, 0, 1, 1], [], []>} : vector<32x256xbf16>, vector<256x64xbf16>, vector<32x64xf32> -> vector<32x64xf32>
    %377 = arith.addf %329, %376 : vector<32x64xf32>
    %378 = vector.broadcast %212 : vector<1x64xf32> to vector<32x64xf32>
    %379 = arith.addf %377, %378 : vector<32x64xf32>
    %cst_127 = arith.constant dense<0.000000e+00> : vector<32xf32>
    %380 = vector.multi_reduction <add>, %379, %cst_127 [1] : vector<32x64xf32> to vector<32xf32>
    %381 = vector.shape_cast %380 : vector<32xf32> to vector<32x1xf32>
    %cst_128 = arith.constant 6.400000e+01 : f32
    %382 = vector.broadcast %cst_128 : f32 to vector<32x1xf32>
    %383 = arith.divf %381, %382 : vector<32x1xf32>
    %384 = arith.mulf %379, %379 : vector<32x64xf32>
    %cst_129 = arith.constant dense<0.000000e+00> : vector<32xf32>
    %385 = vector.multi_reduction <add>, %384, %cst_129 [1] : vector<32x64xf32> to vector<32xf32>
    %386 = vector.shape_cast %385 : vector<32xf32> to vector<32x1xf32>
    %cst_130 = arith.constant 6.400000e+01 : f32
    %387 = vector.broadcast %cst_130 : f32 to vector<32x1xf32>
    %388 = arith.divf %386, %387 : vector<32x1xf32>
    %389 = arith.mulf %383, %383 : vector<32x1xf32>
    %390 = arith.subf %388, %389 : vector<32x1xf32>
    %391 = vector.broadcast %383 : vector<32x1xf32> to vector<32x64xf32>
    %392 = arith.subf %379, %391 : vector<32x64xf32>
    %cst_131 = arith.constant 9.99999997E-7 : f32
    %393 = vector.broadcast %cst_131 : f32 to vector<32x1xf32>
    %394 = arith.addf %390, %393 : vector<32x1xf32>
    %395 = math.rsqrt %394 : vector<32x1xf32>
    %396 = vector.broadcast %395 : vector<32x1xf32> to vector<32x64xf32>
    %397 = arith.mulf %392, %396 : vector<32x64xf32>
    %398 = vector.broadcast %10 : vector<1x64xf32> to vector<32x64xf32>
    %399 = arith.mulf %397, %398 : vector<32x64xf32>
    %400 = vector.broadcast %11 : vector<1x64xf32> to vector<32x64xf32>
    %401 = arith.addf %399, %400 : vector<32x64xf32>
    %402 = arith.truncf %401 : vector<32x64xf32> to vector<32x64xbf16>
    %c0_132 = arith.constant 0 : index
    %c0_133 = arith.constant 0 : index
    %403 = vector.load %arg10[%c0_132, %c0_133] : memref<64x64xbf16, #tpu.memory_space<vmem>>, vector<64x64xbf16>
    %cst_134 = arith.constant dense<0.000000e+00> : vector<32x64xf32>
    %404 = tpu.matmul %402, %403, %cst_134 {dimension_numbers = #tpu.dot_dimension_numbers<[1], [0], [0], [1], [0, 0, 1, 1], [], []>} : vector<32x64xbf16>, vector<64x64xbf16>, vector<32x64xf32> -> vector<32x64xf32>
    %405 = vector.broadcast %7 : vector<1x64xf32> to vector<32x64xf32>
    %406 = arith.addf %404, %405 : vector<32x64xf32>
    %407 = arith.mulf %0, %1 : vector<32x64xf32>
    %408 = vector.broadcast %6 : vector<1x64xf32> to vector<32x64xf32>
    %409 = arith.mulf %3, %408 : vector<32x64xf32>
    %410 = arith.addf %407, %409 : vector<32x64xf32>
    %411 = arith.addf %410, %406 : vector<32x64xf32>
    %c0_135 = arith.constant 0 : index
    %c0_136 = arith.constant 0 : index
    %412 = vector.load %arg13[%c0_135, %c0_136] : memref<32x64xf32, #tpu.memory_space<vmem>>, vector<32x64xf32>
    tpu.vector_store %arg13[%c0_135, %c0_136], %411 {strides = array<i32>} : memref<32x64xf32, #tpu.memory_space<vmem>>, vector<32x64xf32>,
    return
  }
}

</mosaic_0001>

<bundles_post_ra>
// kernel: tpu_custom_call.1
= control target key start
LH: loop header
LB: loop body
LE: loop exit
PB: predicated region body
PF: predicated region fallthrough
CT: control target
= control target key end

     0   :  { %18 = vsyncpa [#allocation3], 0  ;;  %s5474_s0 = inlined_call_operand.vmem [shape: f32[32,64], index: 0, kind: input, shape index: {}]   ;;  %s5475_s1 = inlined_call_operand.hbm [shape: f32[32,64], index: 1, kind: input, shape index: {}]   ;;  %s5476_s2 = inlined_call_operand.hbm [shape: f32[32,32], index: 2, kind: input, shape index: {}]   ;;  %s5477_s3 = inlined_call_operand.hbm [shape: f32[32,64], index: 3, kind: input, shape index: {}]   ;;  %s5478_s4 = inlined_call_operand.hbm [shape: bf16[64,64], index: 4, kind: input, shape index: {}]   ;;  %s5479_s5 = inlined_call_operand.vmem [shape: bf16[8,64,64], index: 5, kind: input, shape index: {}]   ;;  %s5480_s6 = inlined_call_operand.vmem [shape: bf16[2,64,256], index: 6, kind: input, shape index: {}]   ;;  %s5481_s7 = inlined_call_operand.vmem [shape: bf16[2,256,64], index: 7, kind: input, shape index: {}]   ;;  %s5482_s8 = inlined_call_operand.vmem [shape: f32[2,9,64], index: 8, kind: input, shape index: {}]   ;;  %s5483_s9 = inlined_call_operand.vmem [shape: f32[2,1,256], index: 9, kind: input, shape index: {}]   ;;  %s5484_s10 = inlined_call_operand.hbm [shape: bf16[64,64], index: 10, kind: input, shape index: {}]   ;;  %s5485_s11 = inlined_call_operand.vmem [shape: f32[3,64], index: 11, kind: input, shape index: {}]   ;;  %s5486_s12 = inlined_call_operand.vmem [shape: f32[3,64], index: 12, kind: input, shape index: {}]   ;;  %s5487_s13 = inlined_call_operand.hbm [shape: f32[32,64], index: 13, kind: output, shape index: {}]  }
   0x1   :  { %19 = vsyncpa [#allocation6], 0 }
   0x2   :  { %20 = vsyncpa [#allocation9], 0 }
   0x3   :  { %21 = vsyncpa [#allocation4], 0  ;;  %s41_s27 = sshll.u32 %s5476_s2, 4  ;;  %s4199_s28 = smov [#allocation5]   ;;  %s42_s27 = int_to_ptr.hbm [resolvable:$true] %s41_s27 }
   0x4   :  { %s43_s29 = sshll.u32 %s4199_s28, 4  ;;  %s67_s15 = sshll.u32 %s5478_s4, 4  ;;  %s44_s29 = int_to_ptr.vmem [resolvable:$true] %s43_s29  ;;  %s68_s15 = int_to_ptr.hbm [resolvable:$true] %s67_s15 }
   0x5   :  { %s4200_s16 = smov 128   ;;  %s4201_s17 = smov 8  }
   0x6   :  { %49 = dma.hbm_to_vmem [thread:$0]  %s42_s27, 512, %s44_s29, [#allocation6], %s4200_s16, %s4200_s16, %s4201_s17  }
   0x7   :  { %s4202_s18 = smov [#allocation8]   ;;  %s4203_s20 = smov 64  }
   0x8   :  { %s69_s19 = sshll.u32 %s4202_s18, 4  ;;  %s4204_s2 = smov 4   ;;  %s70_s19 = int_to_ptr.vmem [resolvable:$true] %s69_s19 }
   0x9   :  { %75 = dma.hbm_to_vmem [thread:$0]  %s68_s15, 512, %s70_s19, [#allocation9], %s4203_s20, %s4203_s20, %s4204_s2  }
   0xa   :  { %s28_s23 = sshll.u32 %s5475_s1, 4  ;;  %s4205_s24 = smov [#allocation2]   ;;  %s29_s23 = int_to_ptr.hbm [resolvable:$true] %s28_s23 }
   0xb   :  { %s30_s4 = sshll.u32 %s4205_s24, 4  ;;  %s54_s28 = sshll.u32 %s5477_s3, 4  ;;  %s31_s4 = int_to_ptr.vmem [resolvable:$true] %s30_s4  ;;  %s55_s28 = int_to_ptr.hbm [resolvable:$true] %s54_s28 }
   0xc   :  { %36 = dma.hbm_to_vmem [thread:$0]  %s29_s23, 512, %s31_s4, [#allocation3], %s4200_s16, %s4200_s16, %s4201_s17  }
   0xd   :  { %s4206_s27 = smov [#allocation7]   ;;  %s90_s15 = sshll.u32 %s5484_s10, 4  ;;  %s91_s15 = int_to_ptr.hbm [resolvable:$true] %s90_s15 }
   0xe   :  { %s56_s29 = sshll.u32 %s4206_s27, 4  ;;  %s4207_s1 = smov [#allocation10]   ;;  %s57_s29 = int_to_ptr.vmem [resolvable:$true] %s56_s29 }
   0xf   :  { %62 = dma.hbm_to_vmem [thread:$0]  %s55_s28, 512, %s57_s29, [#allocation6], %s4200_s16, %s4200_s16, %s4201_s17  }
  0x10   :  { %s92_s18 = sshll.u32 %s4207_s1, 4  ;;  %s93_s18 = int_to_ptr.vmem [resolvable:$true] %s92_s18 }
  0x11   :  { %98 = dma.hbm_to_vmem [thread:$0]  %s91_s15, 512, %s93_s18, [#allocation9], %s4203_s20, %s4203_s20, %s4204_s2  }
  0x12   :  { %4191 = dma.done.wait [#allocation3], 512  }
  0x13   :  { %4192 = vsyncadd [#allocation3], 4294966784 }
  0x14   :  { %4193 = dma.done.wait [#allocation6], 1024  }
  0x15   :  { %4194 = vsyncadd [#allocation6], 4294966272 }
  0x16   :  { %4195 = dma.done.wait [#allocation9], 1024  }
  0x17   :  { %4196 = vsyncadd [#allocation9], 4294966272  ;;  %v3665_v0 = vld [vmem:[#allocation8 + $0x18] sm:$0xff]  ;;  %v3664_v1 = vld [vmem:[#allocation8 + $0x10] sm:$0xff]  ;;  %vm186_vm0 = vcmask 523264   ;;  %v4208_v62 = vmov 64.0  }
  0x18   :  { %v124_v2 = vld [vmem:[%s5474_s0] sm:$0xff]  ;;  %v125_v3 = vld [vmem:[%s5474_s0 + $0x8] sm:$0xff]  ;;  %197 = vmatpush.bf16.msra.mxu0 %v3665_v0  ;;  %3750 = vmatpush.bf16.msra.mxu2 %v3665_v0  ;;  %v126_v9 = vld [vmem:[%s5474_s0 + $0x10] sm:$0xff]  ;;  %3837 = vrcp.f32 %v4208_v62  ;;  %s4209_s14 = smov 112   ;;  %vm537_vm14 = vcmask 130048   ;;  %s4210_s15 = smov 96  }
  0x19   :  { %v4316_v4 = vld [vmem:[#allocation2] sm:$0xff]  ;;  %v4318_v5 = vld [vmem:[#allocation2 + $0x8] sm:$0xff]  ;;  %v127_v10 = vld [vmem:[%s5474_s0 + $0x18] sm:$0xff]  ;;  %s4211_s1 = smov 80   ;;  %vm569_vm15 = vcmask 261120   ;;  %s4212_s18 = smov 16  }
  0x1a   :  { %v136_v6 = vld [vmem:[%s5485_s11] sm:$0x7]  ;;  %v132_v7 = vsub.f32 1.0, %v4316_v4  ;;  %v133_v8 = vsub.f32 1.0, %v4318_v5  ;;  %v4331_v11 = vld [vmem:[#allocation2 + $0x10] sm:$0xff]  ;;  %v4334_v12 = vmul.f32 %v4316_v4, %v124_v2  ;;  %v4336_v14 = vld [vmem:[#allocation2 + $0x18] sm:$0xff]  ;;  %v4340_v16 = vmul.f32 %v4318_v5, %v125_v3 }
  0x1b   :  { %v142_v13 = vperm.slane %v136_v6, 0  ;;  %v134_v15 = vsub.f32 1.0, %v4331_v11  ;;  %v135_v17 = vsub.f32 1.0, %v4336_v14  ;;  %v4344_v18 = vmul.f32 %v4331_v11, %v126_v9  ;;  %v3663_v20 = vld [vmem:[#allocation8 + $0x8] sm:$0xff]  ;;  %v3662_v29 = vld [vmem:[#allocation8] sm:$0xff]  ;;  %v214_v41 = vld [vmem:[#allocation7 + $0x10] sm:$0xff] }
  0x1c   :  { %v4347_v19 = vmul.f32 %v4336_v14, %v127_v10  ;;  %198 = vmatpush.bf16.msra.mxu0 %v3664_v1  ;;  %3751 = vmatpush.bf16.msra.mxu2 %v3664_v1  ;;  %v137_v32 = vld [vmem:[%s5486_s12] sm:$0x7]  ;;  %v213_v45 = vld [vmem:[#allocation7 + $0x8] sm:$0xff]  ;;  %v215_v53 = vld [vmem:[#allocation7 + $0x18] sm:$0xff]  ;;  %s4213_s3 = smov 48   ;;  %s4214_s10 = smov 32  }
  0x1d   :  { %v143_v21 = vmul.f32 %v142_v13, %v132_v7  ;;  %v144_v22 = vmul.f32 %v142_v13, %v133_v8  ;;  %v145_v23 = vmul.f32 %v142_v13, %v134_v15  ;;  %v146_v24 = vmul.f32 %v142_v13, %v135_v17  ;;  %v212_v35 = vld [vmem:[#allocation7] sm:$0xff]  ;;  %v3669_v6 = vld [vmem:[%s5479_s5 + $0x18] sm:$0xff]  ;;  %v3668_v13 = vld [vmem:[%s5479_s5 + $0x10] sm:$0xff]  ;;  %s3136_s23 = sshll.u32 %s5487_s13, 4  ;;  %s3137_s23 = int_to_ptr.hbm [resolvable:$true] %s3136_s23 }
  0x1e   :  { %v161_v33 = vperm.slane %v137_v32, 0  ;;  %v3838_v63 = vpop.eup %3837  ;;  %v3673_v9 = vld [vmem:[%s5479_s5 + $0x38] sm:$0xff]  ;;  %384 = vmatpush.bf16.msra.mxu1 %v3669_v6  ;;  %3754 = vmatpush.bf16.msra.mxu3 %v3669_v6  ;;  %v3670_v32 = vld [vmem:[%s5479_s5 + $0x20] sm:$0xff]  ;;  %v3675_v6 = vld [vmem:[%s5479_s5 + $0x48] sm:$0xff] }
  0x1f   :  { %v147_v25 = vadd.f32 %v143_v21, %v4334_v12  ;;  %v148_v26 = vadd.f32 %v144_v22, %v4340_v16  ;;  %v149_v27 = vadd.f32 %v145_v23, %v4344_v18  ;;  %v150_v28 = vadd.f32 %v146_v24, %v4347_v19 }
  0x20   :  { %199 = vmatpush.bf16.msra.mxu0 %v3663_v20  ;;  %3752 = vmatpush.bf16.msra.mxu2 %v3663_v20  ;;  %v239_v0 = vmul.f32 64.0, %v3838_v63  ;;  %vm243_vm1 = vweird.f32 %v3838_v63  ;;  %v3672_v20 = vld [vmem:[%s5479_s5 + $0x30] sm:$0xff] }
  0x21   :  { %v151_v30 = vpack.c.bf16 %v148_v26, %v147_v25  ;;  %v152_v31 = vpack.c.bf16 %v150_v28, %v149_v27  ;;  %v3667_v26 = vld [vmem:[%s5479_s5 + $0x8] sm:$0xff] }
  0x22   :  { %v240_v1 = vsub.f32 1.0, %v239_v0  ;;  %385 = vmatpush.bf16.msra.mxu1 %v3668_v13  ;;  %3755 = vmatpush.bf16.msra.mxu3 %v3668_v13  ;;  %v3671_v27 = vld [vmem:[%s5479_s5 + $0x28] sm:$0xff]  ;;  %v4456_v13 = vld [vmem:[%s5482_s8] sm:$0xff] }
  0x24   :  { %200 = vmatpush.bf16.msra.mxu0 %v3662_v29  ;;  %3753 = vmatpush.bf16.msra.mxu2 %v3662_v29  ;;  %v241_v2 = vmul.f32 %v3838_v63, %v240_v1 }
  0x26   :  { %v242_v3 = vadd.f32 %v3838_v63, %v241_v2  ;;  %386 = vmatpush.bf16.msra.mxu1 %v3667_v26  ;;  %3756 = vmatpush.bf16.msra.mxu3 %v3667_v26 }
  0x27   :  { %3167 = vmatmul.msk.bf16.vlgmr.msra.gmra.mxu0 %vm186_vm0, %v151_v30  ;;  %3168 = vmatmul.msk.bf16.vlgmr.msra.gmra.mxu2 %vm186_vm0, %v152_v31  ;;  %v3666_v31 = vld [vmem:[%s5479_s5] sm:$0xff] }
  0x28   :  { %437 = vmatpush.bf16.msrb.mxu2 %v3673_v9  ;;  %v4400_v10 = vsel %vm243_vm1, %v3838_v63, %v242_v3  ;;  %vm1057_vm1 = vcmask 392192  }
  0x2a   :  { %387 = vmatpush.bf16.msra.mxu1 %v3666_v31  ;;  %3757 = vmatpush.bf16.msra.mxu3 %v3666_v31 }
  0x2c   :  { %438 = vmatpush.bf16.msrb.mxu2 %v3672_v20 }
  0x30   :  { %439 = vmatpush.bf16.msrb.mxu2 %v3671_v27 }
  0x34   :  { %440 = vmatpush.bf16.msrb.mxu2 %v3670_v32 }
  0xa4   :  { %v202_v34 = vpop.f32.mrf.mxu0 }
  0xa5   :  { %v203_v36 = vadd.f32 %v202_v34, %v161_v33 }
  0xa7   :  { %v4366_v37 = vadd.f32 %v212_v35, %v203_v36 }
  0xa9   :  { %v226_v38 = vsel %vm186_vm0, %v4366_v37, 0.0  ;;  %v249_v39 = vmul.f32 %v4366_v37, %v4366_v37 }
  0xaa   :  { %v207_v40 = vpop.f32.mrf.mxu2  ;;  %227 = vadd.xlane.f32.xlu0 %v226_v38 }
  0xab   :  { %v208_v42 = vadd.f32 %v207_v40, %v161_v33  ;;  %v253_v43 = vsel %vm186_vm0, %v249_v39, 0.0 }
  0xac   :  { %v204_v44 = vpop.f32.mrf.mxu0  ;;  %254 = vadd.xlane.f32.xlu1 %v253_v43 }
  0xad   :  { %v4373_v46 = vadd.f32 %v214_v41, %v208_v42  ;;  %v205_v47 = vadd.f32 %v204_v44, %v161_v33 }
  0xaf   :  { %v4375_v48 = vadd.f32 %v213_v45, %v205_v47  ;;  %v232_v49 = vsel %vm186_vm0, %v4373_v46, 0.0  ;;  %v251_v56 = vmul.f32 %v4373_v46, %v4373_v46 }
  0xb0   :  { %233 = vadd.xlane.f32.xlu2 %v232_v49 }
  0xb1   :  { %v229_v50 = vsel %vm186_vm0, %v4375_v48, 0.0  ;;  %v250_v51 = vmul.f32 %v4375_v48, %v4375_v48  ;;  %v259_v59 = vsel %vm186_vm0, %v251_v56, 0.0  ;;  %v3677_v56 = vld [vmem:[%s5479_s5 + $0x58] sm:$0xff] }
  0xb2   :  { %v209_v52 = vpop.f32.mrf.mxu2  ;;  %230 = vadd.xlane.f32.xlu0 %v229_v50  ;;  %490 = vmatpush.bf16.msrb.mxu3 %v3677_v56 }
  0xb3   :  { %v210_v54 = vadd.f32 %v209_v52, %v161_v33  ;;  %v256_v55 = vsel %vm186_vm0, %v250_v51, 0.0 }
  0xb4   :  { %257 = vadd.xlane.f32.xlu1 %v256_v55 }
  0xb5   :  { %v4386_v57 = vadd.f32 %v215_v53, %v210_v54 }
  0xb7   :  { %v235_v58 = vsel %vm186_vm0, %v4386_v57, 0.0  ;;  %v252_v60 = vmul.f32 %v4386_v57, %v4386_v57 }
  0xb8   :  { %236 = vadd.xlane.f32.xlu2 %v235_v58 }
  0xb9   :  { %v262_v61 = vsel %vm186_vm0, %v252_v60, 0.0 }
  0xba   :  { %260 = vadd.xlane.f32.xlu0 %v259_v59 }
  0xbc   :  { %263 = vadd.xlane.f32.xlu1 %v262_v61  ;;  %v3676_v61 = vld [vmem:[%s5479_s5 + $0x50] sm:$0xff] }
  0xbd   :  { %491 = vmatpush.bf16.msrb.mxu3 %v3676_v61 }
  0xc1   :  { %492 = vmatpush.bf16.msrb.mxu3 %v3675_v6 }
 0x11d   :  { %v228_v21 = vpop.xlane.xlu0 %227 }
 0x11e   :  { %v4409_v22 = vmul.f32 %v4400_v10, %v228_v21 }
 0x11f   :  { %v255_v23 = vpop.xlane.xlu1 %254 }
 0x120   :  { %v269_v24 = vmul.f32 %v4409_v22, %v4409_v22  ;;  %v265_v25 = vmul.f32 %v255_v23, %v4400_v10  ;;  %v277_v21 = vsub.f32 %v4366_v37, %v4409_v22 }
 0x122   :  { %v273_v28 = vsub.f32 %v265_v25, %v269_v24  ;;  %v3674_v24 = vld [vmem:[%s5479_s5 + $0x40] sm:$0xff] }
 0x123   :  { %v234_v29 = vpop.xlane.xlu2 %233  ;;  %493 = vmatpush.bf16.msrb.mxu3 %v3674_v24 }
 0x124   :  { %v281_v30 = vadd.f32 1e-06, %v273_v28  ;;  %v4433_v39 = vmul.f32 %v4400_v10, %v234_v29  ;;  %v329_v29 = vperm.slane %v4456_v13, 0 }
 0x125   :  { %v231_v33 = vpop.xlane.xlu0 %230 }
 0x126   :  { %3839 = vrsqrt.f32 %v281_v30  ;;  %v4427_v34 = vmul.f32 %v4400_v10, %v231_v33  ;;  %v271_v43 = vmul.f32 %v4433_v39, %v4433_v39  ;;  %vm291_vm3 = vweird.f32 %v281_v30 }
 0x127   :  { %v258_v35 = vpop.xlane.xlu1 %257 }
 0x128   :  { %v266_v36 = vmul.f32 %v258_v35, %v4400_v10  ;;  %v270_v38 = vmul.f32 %v4427_v34, %v4427_v34  ;;  %v278_v22 = vsub.f32 %v4375_v48, %v4427_v34 }
 0x12a   :  { %v274_v40 = vsub.f32 %v266_v36, %v270_v38 }
 0x12b   :  { %v237_v41 = vpop.xlane.xlu2 %236 }
 0x12c   :  { %v3840_v42 = vpop.eup %3839  ;;  %v4438_v44 = vmul.f32 %v4400_v10, %v237_v41  ;;  %v282_v47 = vadd.f32 1e-06, %v274_v40  ;;  %v334_v40 = vperm.slane %v4456_v13, 1 }
 0x12d   :  { %v286_v45 = vmul.f32 %v3840_v42, %v281_v30  ;;  %v261_v49 = vpop.xlane.xlu0 %260  ;;  %vm292_vm2 = vweird.f32 %v3840_v42 }
 0x12e   :  { %v272_v50 = vmul.f32 %v4438_v44, %v4438_v44  ;;  %v267_v51 = vmul.f32 %v261_v49, %v4400_v10  ;;  %3841 = vrsqrt.f32 %v282_v47  ;;  %vm293_vm4 = vmor %vm291_vm3, %vm292_vm2  ;;  %vm301_vm6 = vweird.f32 %v282_v47 }
 0x12f   :  { %v287_v52 = vmul.f32 %v3840_v42, %v286_v45  ;;  %v264_v53 = vpop.xlane.xlu1 %263 }
 0x130   :  { %v275_v54 = vsub.f32 %v267_v51, %v271_v43  ;;  %v268_v55 = vmul.f32 %v264_v53, %v4400_v10 }
 0x131   :  { %v288_v58 = vmul.f32 0.5, %v287_v52 }
 0x132   :  { %v283_v59 = vadd.f32 1e-06, %v275_v54  ;;  %v276_v60 = vsub.f32 %v268_v55, %v272_v50  ;;  %v279_v50 = vsub.f32 %v4373_v46, %v4433_v39  ;;  %v280_v54 = vsub.f32 %v4386_v57, %v4438_v44 }
 0x133   :  { %v289_v62 = vsub.f32 1.5, %v288_v58 }
 0x134   :  { %3843 = vrsqrt.f32 %v283_v59  ;;  %v284_v63 = vadd.f32 1e-06, %v276_v60  ;;  %v3842_v0 = vpop.eup %3841  ;;  %vm311_vm9 = vweird.f32 %v283_v59 }
 0x135   :  { %v290_v1 = vmul.f32 %v3840_v42, %v289_v62  ;;  %v296_v2 = vmul.f32 %v3842_v0, %v282_v47  ;;  %vm302_vm5 = vweird.f32 %v3842_v0 }
 0x136   :  { %3845 = vrsqrt.f32 %v284_v63  ;;  %vm303_vm7 = vmor %vm301_vm6, %vm302_vm5  ;;  %vm321_vm12 = vweird.f32 %v284_v63 }
 0x137   :  { %v297_v3 = vmul.f32 %v3842_v0, %v296_v2  ;;  %v294_v9 = vsel %vm293_vm4, %v3840_v42, %v290_v1 }
 0x138   :  { %v325_v28 = vmul.f32 %v294_v9, %v277_v21 }
 0x139   :  { %v298_v23 = vmul.f32 0.5, %v297_v3  ;;  %v408_v3 = vperm.slane %v4456_v13, 3 }
 0x13a   :  { %v3844_v20 = vpop.eup %3843  ;;  %v330_v38 = vmul.f32 %v329_v29, %v325_v28 }
 0x13b   :  { %v306_v25 = vmul.f32 %v3844_v20, %v283_v59  ;;  %v299_v27 = vsub.f32 1.5, %v298_v23  ;;  %vm312_vm8 = vweird.f32 %v3844_v20 }
 0x13c   :  { %v3846_v26 = vpop.eup %3845  ;;  %vm313_vm11 = vmor %vm311_vm9, %vm312_vm8  ;;  %v335_v51 = vadd.f32 %v334_v40, %v330_v38 }
 0x13d   :  { %v307_v30 = vmul.f32 %v3844_v20, %v306_v25  ;;  %v316_v31 = vmul.f32 %v3846_v26, %v284_v63  ;;  %v300_v32 = vmul.f32 %v3842_v0, %v299_v27  ;;  %vm322_vm10 = vweird.f32 %v3846_v26 }
 0x13e   :  { %vm323_vm13 = vmor %vm321_vm12, %vm322_vm10 }
 0x13f   :  { %v308_v33 = vmul.f32 0.5, %v307_v30  ;;  %v317_v35 = vmul.f32 %v3846_v26, %v316_v31  ;;  %v304_v36 = vsel %vm303_vm7, %v3842_v0, %v300_v32  ;;  %v349_v0 = vperm.slane %v4456_v13, 2 }
 0x140   :  { %v326_v43 = vmul.f32 %v304_v36, %v278_v22 }
 0x141   :  { %v309_v41 = vsub.f32 1.5, %v308_v33  ;;  %v318_v42 = vmul.f32 0.5, %v317_v35 }
 0x142   :  { %v331_v47 = vmul.f32 %v329_v29, %v326_v43 }
 0x143   :  { %v310_v45 = vmul.f32 %v3844_v20, %v309_v41  ;;  %v319_v49 = vsub.f32 1.5, %v318_v42 }
 0x144   :  { %v336_v52 = vadd.f32 %v334_v40, %v331_v47 }
 0x145   :  { %v320_v34 = vmul.f32 %v3846_v26, %v319_v49  ;;  %v314_v53 = vsel %vm313_vm11, %v3844_v20, %v310_v45 }
 0x146   :  { %v327_v55 = vmul.f32 %v314_v53, %v279_v50  ;;  %v339_v58 = vpack.c.bf16 %v336_v52, %v335_v51 }
 0x147   :  { %v324_v56 = vsel %vm323_vm13, %v3846_v26, %v320_v34 }
 0x148   :  { %v328_v59 = vmul.f32 %v324_v56, %v280_v54  ;;  %v332_v60 = vmul.f32 %v329_v29, %v327_v55  ;;  %3185 = vmatmul.msk.bf16.vlgmr.msra.gmra.mxu1 %vm186_vm0, %v339_v58  ;;  %3211 = vmatmul.msk.bf16.vlgmr.msrb.gmra.mxu2 %vm186_vm0, %v339_v58  ;;  %v461_v54 = vperm.slane %v4456_v13, 4 }
 0x14a   :  { %v333_v39 = vmul.f32 %v329_v29, %v328_v59  ;;  %v337_v61 = vadd.f32 %v334_v40, %v332_v60 }
 0x14c   :  { %v338_v62 = vadd.f32 %v334_v40, %v333_v39 }
 0x14e   :  { %v340_v63 = vpack.c.bf16 %v338_v62, %v337_v61 }
 0x150   :  { %3186 = vmatmul.msk.bf16.vlgmr.msra.gmra.mxu3 %vm186_vm0, %v340_v63 }
 0x158   :  { %3212 = vmatmul.msk.bf16.gmra.mxu2 %vm186_vm0, %v340_v63 }
 0x160   :  { %3237 = vmatmul.msk.bf16.vlgmr.msrb.gmra.mxu3 %vm186_vm0, %v339_v58 }
 0x170   :  { %3238 = vmatmul.msk.bf16.gmra.mxu3 %vm186_vm0, %v340_v63 }
 0x1c5   :  { %v389_v44 = vpop.f32.mrf.mxu1 }
 0x1c6   :  { %v390_v1 = vadd.f32 %v389_v44, %v349_v0 }
 0x1c8   :  { %v505_v9 = vpack.c.bf16 %v390_v1, %v390_v1 }
 0x1ca   :  { %v521_v24 = vunpack.c.l.b16 %v505_v9 }
 0x1cb   :  { %v442_v2 = vpop.f32.mrf.mxu2 }
 0x1cc   :  { %v443_v21 = vadd.f32 %v442_v2, %v408_v3 }
 0x1cd   :  { %v391_v6 = vpop.f32.mrf.mxu1 }
 0x1ce   :  { %v392_v20 = vadd.f32 %v391_v6, %v349_v0  ;;  %v509_v28 = vpack.c.bf16 %v443_v21, %v443_v21 }
 0x1d0   :  { %v506_v23 = vpack.c.bf16 %v392_v20, %v392_v20  ;;  %v531_v32 = vunpack.c.l.b16 %v509_v28 }
 0x1d2   :  { %v522_v25 = vunpack.c.l.b16 %v506_v23 }
 0x1d3   :  { %v394_v26 = vpop.f32.mrf.mxu3  ;;  %v444_v27 = vpop.f32.mrf.mxu2 }
 0x1d4   :  { %v525_v29 = vpack.c.b16 %v522_v25, %v521_v24  ;;  %v445_v30 = vadd.f32 %v444_v27, %v408_v3  ;;  %v395_v34 = vadd.f32 %v394_v26, %v349_v0 }
 0x1d6   :  { %v510_v31 = vpack.c.bf16 %v445_v30, %v445_v30  ;;  %653 = vrot.lane.b32.xlu1 %v525_v29, %s4209_s14  ;;  %v507_v56 = vpack.c.bf16 %v395_v34, %v395_v34 }
 0x1d8   :  { %v532_v22 = vunpack.c.l.b16 %v510_v31  ;;  %v523_v39 = vunpack.c.l.b16 %v507_v56 }
 0x1da   :  { %v535_v33 = vpack.c.b16 %v532_v22, %v531_v32 }
 0x1db   :  { %v396_v35 = vpop.f32.mrf.mxu3  ;;  %v447_v36 = vpop.f32.mrf.mxu2 }
 0x1dc   :  { %657 = vrot.lane.b32.xlu0 %v535_v33, %s4209_s14  ;;  %v448_v38 = vadd.f32 %v447_v36, %v408_v3  ;;  %v397_v49 = vadd.f32 %v396_v35, %v349_v0  ;;  %v545_v44 = vsel %vm537_vm14, %v535_v33, 0 }
 0x1de   :  { %v511_v42 = vpack.c.bf16 %v448_v38, %v448_v38  ;;  %v508_v53 = vpack.c.bf16 %v397_v49, %v397_v49 }
 0x1e0   :  { %v533_v47 = vunpack.c.l.b16 %v511_v42  ;;  %v524_v59 = vunpack.c.l.b16 %v508_v53 }
 0x1e2   :  { %v526_v63 = vpack.c.b16 %v524_v59, %v523_v39 }
 0x1e3   :  { %v495_v40 = vpop.f32.mrf.mxu3  ;;  %v449_v41 = vpop.f32.mrf.mxu2 }
 0x1e4   :  { %v450_v43 = vadd.f32 %v449_v41, %v408_v3  ;;  %v496_v60 = vadd.f32 %v495_v40, %v461_v54 }
 0x1e6   :  { %v512_v45 = vpack.c.bf16 %v450_v43, %v450_v43  ;;  %v513_v13 = vpack.c.bf16 %v496_v60, %v496_v60  ;;  %v4524_v60 = vld [vmem:[#allocation5 + $0x10] sm:$0xff] }
 0x1e8   :  { %v534_v50 = vunpack.c.l.b16 %v512_v45  ;;  %v620_v2 = vunpack.c.l.b16 %v513_v13 }
 0x1ea   :  { %v536_v51 = vpack.c.b16 %v534_v50, %v533_v47 }
 0x1eb   :  { %v497_v52 = vpop.f32.mrf.mxu3 }
 0x1ec   :  { %775 = vrot.lane.b32.xlu1 %v536_v51, %s4210_s15  ;;  %891 = vrot.lane.b32.xlu0 %v536_v51, %s4211_s1  ;;  %v548_v55 = vsel %vm537_vm14, %v536_v51, 0  ;;  %v498_v58 = vadd.f32 %v497_v52, %v461_v54 }
 0x1ed   :  { %659 = vrot.lane.b32.xlu2 %v536_v51, %s4209_s14  ;;  %556 = vmatpush.bf16.xpose.msrb.mxu0 %v548_v55  ;;  %v4517_v51 = vld [vmem:[#allocation5] sm:$0xff]  ;;  %v221_v55 = vld [vmem:[#allocation5 + $0x8] sm:$0xff] }
 0x1ee   :  { %v514_v61 = vpack.c.bf16 %v498_v58, %v498_v58 }
 0x1f0   :  { %v621_v0 = vunpack.c.l.b16 %v514_v61 }
 0x1f2   :  { %v4490_v3 = vpack.c.b16 %v621_v0, %v620_v2 }
 0x1f3   :  { %v500_v62 = vpop.f32.mrf.mxu3 }
 0x1f4   :  { %769 = vrot.lane.b32.xlu1 %v525_v29, %s4210_s15  ;;  %885 = vrot.lane.b32.xlu0 %v525_v29, %s4211_s1  ;;  %v501_v1 = vadd.f32 %v500_v62, %v461_v54 }
 0x1f5   :  { %655 = vrot.lane.b32.xlu2 %v526_v63, %s4209_s14  ;;  %557 = vmatpush.bf16.xpose.msrb.mxu0 %v545_v44 }
 0x1f6   :  { %v515_v9 = vpack.c.bf16 %v501_v1, %v501_v1 }
 0x1f8   :  { %v622_v23 = vunpack.c.l.b16 %v515_v9 }
 0x1fb   :  { %v502_v6 = vpop.f32.mrf.mxu3 }
 0x1fc   :  { %v503_v20 = vadd.f32 %v502_v6, %v461_v54  ;;  %3239 = vmatmul.msk.bf16.vlgmr.msrb.gmra.mxu0 %vm537_vm14, %v525_v29  ;;  %738 = vrot.lane.b32.xlu1 %v4490_v3, %s4209_s14 }
 0x1fd   :  { %887 = vrot.lane.b32.xlu0 %v526_v63, %s4211_s1  ;;  %889 = vrot.lane.b32.xlu2 %v535_v33, %s4211_s1 }
 0x1fe   :  { %v516_v21 = vpack.c.bf16 %v503_v20, %v503_v20 }
 0x200   :  { %v623_v24 = vunpack.c.l.b16 %v516_v21 }
 0x202   :  { %v4497_v25 = vpack.c.b16 %v623_v24, %v622_v23 }
 0x204   :  { %640 = vmatpush.bf16.msrb.mxu1 %v4497_v25 }
 0x205   :  { %972 = vrot.lane.b32.xlu0 %v4497_v25, %s4211_s1  ;;  %773 = vrot.lane.b32.xlu2 %v535_v33, %s4210_s15 }
 0x208   :  { %641 = vmatpush.bf16.msrb.mxu1 %v4490_v3 }
 0x20c   :  { %3240 = vmatmul.msk.bf16.gmra.mxu0 %vm537_vm14, %v526_v63 }
 0x20d   :  { %771 = vrot.lane.b32.xlu2 %v526_v63, %s4210_s15  ;;  %v4529_v63 = vld [vmem:[#allocation5 + $0x18] sm:$0xff] }
 0x215   :  { %740 = vrot.lane.b32.xlu2 %v4497_v25, %s4209_s14 }
 0x247   :  { %v660_v26 = vpop.permute.xlu2 %659 }
 0x248   :  { %v671_v27 = vsel %vm537_vm14, %v660_v26, 0  ;;  %v654_v31 = vpop.permute.xlu1 %653 }
 0x249   :  { %679 = vmatpush.bf16.xpose.msra.mxu2 %v671_v27 }
 0x24e   :  { %v658_v28 = vpop.permute.xlu0 %657 }
 0x24f   :  { %v656_v29 = vpop.permute.xlu2 %655  ;;  %v668_v30 = vsel %vm537_vm14, %v658_v28, 0 }
 0x251   :  { %680 = vmatpush.bf16.xpose.msra.mxu2 %v668_v30 }
 0x257   :  { %v890_v32 = vpop.permute.xlu2 %889 }
 0x258   :  { %3243 = vmatmul.msk.bf16.vlgmr.msra.gmra.mxu2 %vm537_vm14, %v654_v31  ;;  %v900_v43 = vsel %vm537_vm14, %v890_v32, 0 }
 0x25e   :  { %v776_v22 = vpop.permute.xlu1 %775  ;;  %v892_v33 = vpop.permute.xlu0 %891 }
 0x25f   :  { %v787_v35 = vsel %vm537_vm14, %v776_v22, 0  ;;  %v774_v36 = vpop.permute.xlu2 %773  ;;  %v903_v38 = vsel %vm537_vm14, %v892_v33, 0 }
 0x260   :  { %795 = vmatpush.bf16.xpose.msra.mxu0 %v787_v35  ;;  %911 = vmatpush.bf16.xpose.msrb.mxu2 %v903_v38  ;;  %v784_v41 = vsel %vm537_vm14, %v774_v36, 0 }
 0x266   :  { %v886_v40 = vpop.permute.xlu0 %885  ;;  %v770_v45 = vpop.permute.xlu1 %769 }
 0x267   :  { %v772_v42 = vpop.permute.xlu2 %771 }
 0x268   :  { %3244 = vmatmul.msk.bf16.gmra.mxu2 %vm537_vm14, %v656_v29  ;;  %796 = vmatpush.bf16.xpose.msra.mxu0 %v784_v41 }
 0x269   :  { %912 = vmatpush.bf16.xpose.msrb.mxu2 %v900_v43 }
 0x26e   :  { %v739_v50 = vpop.permute.xlu1 %738 }
 0x26f   :  { %v741_v49 = vpop.permute.xlu2 %740  ;;  %v888_v47 = vpop.permute.xlu0 %887  ;;  %3247 = vmatmul.msk.bf16.vlgmr.msra.gmra.mxu0 %vm537_vm14, %v770_v45 }
 0x270   :  { %756 = vmatpush.bf16.msra.mxu3 %v741_v49 }
 0x274   :  { %757 = vmatpush.bf16.msra.mxu3 %v739_v50 }
 0x277   :  { %v973_v34 = vpop.permute.xlu0 %972 }
 0x278   :  { %3251 = vmatmul.msk.bf16.vlgmr.msrb.gmra.mxu2 %vm537_vm14, %v886_v40  ;;  %988 = vmatpush.bf16.msrb.mxu3 %v973_v34 }
 0x279   :  { %v559_v52 = vpop.f32.mrf.mxu0 }
 0x27a   :  { %v560_v53 = vadd.f32 %v559_v52, %v4517_v51 }
 0x27c   :  { %v570_v54 = vsel %vm569_vm15, %v560_v53, -inf }
 0x27d   :  { %571 = vmax.xlane.f32.xlu2 %v570_v54 }
 0x27f   :  { %3248 = vmatmul.msk.bf16.gmra.mxu0 %vm537_vm14, %v772_v42 }
 0x281   :  { %v561_v56 = vpop.f32.mrf.mxu0 }
 0x282   :  { %v562_v58 = vadd.f32 %v561_v56, %v221_v55 }
 0x284   :  { %v573_v59 = vsel %vm569_vm15, %v562_v58, -inf }
 0x285   :  { %574 = vmax.xlane.f32.xlu1 %v573_v59 }
 0x288   :  { %3252 = vmatmul.msk.bf16.gmra.mxu2 %vm537_vm14, %v888_v47 }
 0x289   :  { %v564_v39 = vpop.f32.mrf.mxu0 }
 0x28a   :  { %v565_v61 = vadd.f32 %v564_v39, %v4524_v60 }
 0x28c   :  { %v576_v62 = vsel %vm569_vm15, %v565_v61, -inf }
 0x28d   :  { %577 = vmax.xlane.f32.xlu1 %v576_v62 }
 0x291   :  { %v566_v13 = vpop.f32.mrf.mxu0 }
 0x292   :  { %v567_v44 = vadd.f32 %v566_v13, %v4529_v63 }
 0x294   :  { %v579_v0 = vsel %vm569_vm15, %v567_v44, -inf }
 0x295   :  { %580 = vmax.xlane.f32.xlu0 %v579_v0 }
 0x2db   :  { %v682_v1 = vpop.f32.mrf.mxu2 }
 0x2dc   :  { %v4534_v2 = vadd.f32 %v682_v1, %v4517_v51 }
 0x2de   :  { %v692_v6 = vsel %vm569_vm15, %v4534_v2, -inf }
 0x2df   :  { %693 = vmax.xlane.f32.xlu1 %v692_v6 }
 0x2e3   :  { %v684_v9 = vpop.f32.mrf.mxu2 }
 0x2e4   :  { %v4543_v28 = vadd.f32 %v684_v9, %v221_v55 }
 0x2e6   :  { %v695_v33 = vsel %vm569_vm15, %v4543_v28, -inf }
 0x2eb   :  { %v687_v20 = vpop.f32.mrf.mxu2 }
 0x2ec   :  { %v798_v21 = vpop.f32.mrf.mxu0 }
 0x2ed   :  { %v4539_v23 = vadd.f32 %v798_v21, %v4517_v51 }
 0x2ef   :  { %v808_v24 = vsel %vm569_vm15, %v4539_v23, -inf }
 0x2f0   :  { %v572_v26 = vpop.xlane.xlu2 %571  ;;  %809 = vmax.xlane.f32.xlu0 %v808_v24 }
 0x2f1   :  { %v582_v27 = vsub.f32 %v560_v53, %v572_v26 }
 0x2f3   :  { %v586_v29 = vmul.f32 1.442695, %v582_v27  ;;  %v689_v30 = vpop.f32.mrf.mxu2 }
 0x2f4   :  { %v800_v31 = vpop.f32.mrf.mxu0  ;;  %v4577_v0 = vadd.f32 %v689_v30, %v4529_v63 }
 0x2f5   :  { %3847 = vpow2.f32 %v586_v29  ;;  %v4545_v32 = vadd.f32 %v800_v31, %v221_v55 }
 0x2f7   :  { %v811_v22 = vsel %vm569_vm15, %v4545_v32, -inf }
 0x2f8   :  { %v575_v35 = vpop.xlane.xlu1 %574  ;;  %812 = vmax.xlane.f32.xlu2 %v811_v22  ;;  %696 = vmax.xlane.f32.xlu0 %v695_v33 }
 0x2f9   :  { %v583_v36 = vsub.f32 %v562_v58, %v575_v35 }
 0x2fb   :  { %v4551_v38 = vpop.eup %3847  ;;  %v588_v40 = vmul.f32 1.442695, %v583_v36  ;;  %v914_v41 = vpop.f32.mrf.mxu2 }
 0x2fc   :  { %v803_v42 = vpop.f32.mrf.mxu0  ;;  %v594_v43 = vsel %vm569_vm15, %v4551_v38, 0.0  ;;  %v4597_v30 = vadd.f32 %v914_v41, %v4517_v51 }
 0x2fd   :  { %v4556_v45 = vadd.f32 %v803_v42, %v4524_v60  ;;  %595 = vadd.xlane.f32.xlu1 %v594_v43  ;;  %3849 = vpow2.f32 %v588_v40 }
 0x2fe   :  { %v924_v33 = vsel %vm569_vm15, %v4597_v30, -inf }
 0x2ff   :  { %v814_v49 = vsel %vm569_vm15, %v4556_v45, -inf }
 0x300   :  { %815 = vmax.xlane.f32.xlu0 %v814_v49  ;;  %v578_v47 = vpop.xlane.xlu1 %577 }
 0x301   :  { %v584_v54 = vsub.f32 %v565_v61, %v578_v47  ;;  %v4574_v61 = vadd.f32 %v687_v20, %v4524_v60 }
 0x303   :  { %v916_v50 = vpop.f32.mrf.mxu2  ;;  %v4560_v34 = vpop.eup %3849  ;;  %v698_v20 = vsel %vm569_vm15, %v4574_v61, -inf }
 0x304   :  { %v4562_v52 = vadd.f32 %v916_v50, %v221_v55  ;;  %v805_v53 = vpop.f32.mrf.mxu0  ;;  %v597_v39 = vsel %vm569_vm15, %v4560_v34, 0.0  ;;  %v590_v55 = vmul.f32 1.442695, %v584_v54 }
 0x305   :  { %v4565_v56 = vadd.f32 %v805_v53, %v4529_v63 }
 0x306   :  { %v927_v58 = vsel %vm569_vm15, %v4562_v52, -inf  ;;  %3851 = vpow2.f32 %v590_v55 }
 0x307   :  { %928 = vmax.xlane.f32.xlu1 %v927_v58  ;;  %v817_v59 = vsel %vm569_vm15, %v4565_v56, -inf }
 0x308   :  { %818 = vmax.xlane.f32.xlu2 %v817_v59  ;;  %598 = vadd.xlane.f32.xlu0 %v597_v39  ;;  %v581_v62 = vpop.xlane.xlu0 %580 }
 0x309   :  { %v585_v13 = vsub.f32 %v567_v44, %v581_v62  ;;  %v701_v44 = vsel %vm569_vm15, %v4577_v0, -inf }
 0x30b   :  { %v592_v1 = vmul.f32 1.442695, %v585_v13  ;;  %v919_v6 = vpop.f32.mrf.mxu2 }
 0x30c   :  { %v4580_v9 = vadd.f32 %v919_v6, %v4524_v60  ;;  %v4588_v24 = vpop.eup %3851 }
 0x30d   :  { %3853 = vpow2.f32 %v592_v1  ;;  %v600_v60 = vsel %vm569_vm15, %v4588_v24, 0.0 }
 0x30e   :  { %v930_v21 = vsel %vm569_vm15, %v4580_v9, -inf }
 0x30f   :  { %931 = vmax.xlane.f32.xlu1 %v930_v21 }
 0x310   :  { %702 = vmax.xlane.f32.xlu2 %v701_v44  ;;  %699 = vmax.xlane.f32.xlu0 %v698_v20 }
 0x313   :  { %v4590_v26 = vpop.eup %3853  ;;  %v921_v29 = vpop.f32.mrf.mxu2 }
 0x314   :  { %v603_v27 = vsel %vm569_vm15, %v4590_v26, 0.0  ;;  %v4600_v31 = vadd.f32 %v921_v29, %v4529_v63 }
 0x316   :  { %v933_v22 = vsel %vm569_vm15, %v4600_v31, -inf }
 0x318   :  { %601 = vadd.xlane.f32.xlu0 %v600_v60  ;;  %604 = vadd.xlane.f32.xlu2 %v603_v27 }
 0x320   :  { %934 = vmax.xlane.f32.xlu0 %v933_v22  ;;  %925 = vmax.xlane.f32.xlu2 %v924_v33 }
 0x352   :  { %v694_v35 = vpop.xlane.xlu1 %693 }
 0x353   :  { %v704_v36 = vsub.f32 %v4534_v2, %v694_v35 }
 0x355   :  { %v708_v40 = vmul.f32 1.442695, %v704_v36 }
 0x357   :  { %3855 = vpow2.f32 %v708_v40 }
 0x35d   :  { %v4607_v42 = vpop.eup %3855 }
 0x35e   :  { %v716_v51 = vsel %vm569_vm15, %v4607_v42, 0.0 }
 0x35f   :  { %717 = vadd.xlane.f32.xlu2 %v716_v51 }
 0x363   :  { %v810_v63 = vpop.xlane.xlu0 %809 }
 0x364   :  { %v820_v41 = vsub.f32 %v4539_v23, %v810_v63 }
 0x366   :  { %v824_v43 = vmul.f32 1.442695, %v820_v41 }
 0x368   :  { %3857 = vpow2.f32 %v824_v43 }
 0x36b   :  { %v813_v49 = vpop.xlane.xlu2 %812  ;;  %v697_v47 = vpop.xlane.xlu0 %696 }
 0x36c   :  { %v821_v50 = vsub.f32 %v4545_v32, %v813_v49  ;;  %v705_v53 = vsub.f32 %v4543_v28, %v697_v47 }
 0x36e   :  { %v4614_v2 = vpop.eup %3857  ;;  %v826_v54 = vmul.f32 1.442695, %v821_v50  ;;  %v710_v58 = vmul.f32 1.442695, %v705_v53 }
 0x36f   :  { %v832_v59 = vsel %vm569_vm15, %v4614_v2, 0.0 }
 0x370   :  { %3859 = vpow2.f32 %v826_v54  ;;  %833 = vadd.xlane.f32.xlu0 %v832_v59  ;;  %v596_v55 = vpop.xlane.xlu1 %595 }
 0x371   :  { %3861 = vpow2.f32 %v710_v58 }
 0x372   :  { %3863 = vrcp.f32 %v596_v55 }
 0x373   :  { %v4618_v39 = vpop.xlane.xlu0 %815 }
 0x376   :  { %v4620_v23 = vpop.eup %3859 }
 0x377   :  { %v4622_v62 = vpop.eup %3861  ;;  %970 = vrot.lane.b32.xlu2 %v4490_v3, %s4211_s1  ;;  %v835_v28 = vsel %vm569_vm15, %v4620_v23, 0.0 }
 0x378   :  { %836 = vadd.xlane.f32.xlu0 %v835_v28  ;;  %v719_v32 = vsel %vm569_vm15, %v4622_v62, 0.0  ;;  %v3864_v6 = vpop.eup %3863 }
 0x379   :  { %720 = vadd.xlane.f32.xlu1 %v719_v32  ;;  %v610_v44 = vmul.f32 %v3864_v6, %v4551_v38 }
 0x37a   :  { %v929_v63 = vpop.xlane.xlu1 %928 }
 0x37b   :  { %v4630_v13 = vpop.xlane.xlu2 %818  ;;  %v599_v1 = vpop.xlane.xlu0 %598 }
 0x37c   :  { %3865 = vrcp.f32 %v599_v1 }
 0x382   :  { %v3866_v21 = vpop.eup %3865 }
 0x383   :  { %v611_v20 = vmul.f32 %v3866_v21, %v4560_v34  ;;  %v703_v60 = vpop.xlane.xlu2 %702  ;;  %v700_v27 = vpop.xlane.xlu0 %699  ;;  %v937_v34 = vsub.f32 %v4562_v52, %v929_v63 }
 0x384   :  { %v706_v29 = vsub.f32 %v4574_v61, %v700_v27  ;;  %v707_v35 = vsub.f32 %v4577_v0, %v703_v60  ;;  %v932_v21 = vpop.xlane.xlu1 %931 }
 0x385   :  { %v614_v22 = vpack.c.bf16 %v611_v20, %v610_v44  ;;  %v942_v43 = vmul.f32 1.442695, %v937_v34  ;;  %v938_v44 = vsub.f32 %v4580_v9, %v932_v21  ;;  %v822_v20 = vsub.f32 %v4556_v45, %v4618_v39 }
 0x386   :  { %v712_v33 = vmul.f32 1.442695, %v706_v29  ;;  %v714_v36 = vmul.f32 1.442695, %v707_v35 }
 0x387   :  { %3241 = vmatmul.msk.bf16.vlgmr.msrb.gmra.mxu1 %vm569_vm15, %v614_v22  ;;  %v944_v60 = vmul.f32 1.442695, %v938_v44  ;;  %v828_v29 = vmul.f32 1.442695, %v822_v20  ;;  %v823_v22 = vsub.f32 %v4565_v56, %v4630_v13 }
 0x388   :  { %3867 = vpow2.f32 %v712_v33 }
 0x389   :  { %v830_v33 = vmul.f32 1.442695, %v823_v22 }
 0x38b   :  { %v605_v40 = vpop.xlane.xlu2 %604  ;;  %v602_v51 = vpop.xlane.xlu0 %601 }
 0x38c   :  { %3869 = vrcp.f32 %v605_v40 }
 0x38d   :  { %3871 = vrcp.f32 %v602_v51 }
 0x38e   :  { %v4637_v38 = vpop.eup %3867  ;;  %3873 = vpow2.f32 %v714_v36 }
 0x38f   :  { %v722_v61 = vsel %vm569_vm15, %v4637_v38, 0.0  ;;  %3875 = vpow2.f32 %v942_v43 }
 0x390   :  { %723 = vadd.xlane.f32.xlu0 %v722_v61 }
 0x392   :  { %v3870_v41 = vpop.eup %3869 }
 0x393   :  { %v3872_v0 = vpop.eup %3871  ;;  %v926_v49 = vpop.xlane.xlu2 %925  ;;  %v613_v50 = vmul.f32 %v3870_v41, %v4590_v26 }
 0x394   :  { %v935_v47 = vpop.xlane.xlu0 %934  ;;  %v936_v53 = vsub.f32 %v4597_v30, %v926_v49  ;;  %v612_v58 = vmul.f32 %v3872_v0, %v4588_v24  ;;  %v3874_v59 = vpop.eup %3873 }
 0x395   :  { %v939_v54 = vsub.f32 %v4600_v31, %v935_v47  ;;  %v725_v32 = vsel %vm569_vm15, %v3874_v59, 0.0  ;;  %v3876_v1 = vpop.eup %3875 }
 0x396   :  { %v940_v52 = vmul.f32 1.442695, %v936_v53  ;;  %v615_v28 = vpack.c.bf16 %v613_v50, %v612_v58  ;;  %v951_v24 = vsel %vm569_vm15, %v3876_v1, 0.0 }
 0x397   :  { %v946_v55 = vmul.f32 1.442695, %v939_v54 }
 0x398   :  { %3877 = vpow2.f32 %v940_v52  ;;  %3242 = vmatmul.msk.bf16.gmra.mxu1 %vm569_vm15, %v615_v28  ;;  %726 = vadd.xlane.f32.xlu0 %v725_v32 }
 0x399   :  { %3879 = vpow2.f32 %v946_v55 }
 0x39a   :  { %3881 = vpow2.f32 %v944_v60 }
 0x39b   :  { %3883 = vpow2.f32 %v828_v29 }
 0x39c   :  { %3885 = vpow2.f32 %v830_v33 }
 0x39e   :  { %v3878_v26 = vpop.eup %3877 }
 0x39f   :  { %v4648_v6 = vpop.eup %3879  ;;  %v948_v30 = vsel %vm569_vm15, %v3878_v26, 0.0 }
 0x3a0   :  { %949 = vadd.xlane.f32.xlu1 %v948_v30  ;;  %v957_v31 = vsel %vm569_vm15, %v4648_v6, 0.0  ;;  %952 = vadd.xlane.f32.xlu0 %v951_v24 }
 0x3a1   :  { %958 = vadd.xlane.f32.xlu2 %v957_v31 }
 0x3b4   :  { %854 = vrot.lane.b32.xlu0 %v4490_v3, %s4210_s15  ;;  %v4663_v3 = vpop.eup %3881 }
 0x3b5   :  { %v4667_v9 = vpop.eup %3883 }
 0x3b6   :  { %v838_v45 = vsel %vm569_vm15, %v4667_v9, 0.0  ;;  %v4671_v39 = vpop.eup %3885 }
 0x3b7   :  { %v841_v56 = vsel %vm569_vm15, %v4671_v39, 0.0 }
 0x3b9   :  { %856 = vrot.lane.b32.xlu1 %v4497_v25, %s4210_s15  ;;  %v954_v25 = vsel %vm569_vm15, %v4663_v3, 0.0 }
 0x3d2   :  { %v718_v27 = vpop.xlane.xlu2 %717 }
 0x3d3   :  { %3887 = vrcp.f32 %v718_v27 }
 0x3d9   :  { %v3888_v36 = vpop.eup %3887 }
 0x3da   :  { %v971_v35 = vpop.permute.xlu2 %970  ;;  %v732_v63 = vmul.f32 %v3888_v36, %v4607_v42 }
 0x3db   :  { %989 = vmatpush.bf16.msrb.mxu3 %v971_v35 }
 0x3de   :  { %955 = vadd.xlane.f32.xlu0 %v954_v25 }
 0x3e3   :  { %839 = vadd.xlane.f32.xlu1 %v838_v45  ;;  %v834_v40 = vpop.xlane.xlu0 %833 }
 0x3e6   :  { %842 = vadd.xlane.f32.xlu0 %v841_v56 }
 0x3eb   :  { %v837_v41 = vpop.xlane.xlu0 %836 }
 0x3ec   :  { %v721_v13 = vpop.xlane.xlu1 %720 }
 0x3ed   :  { %3889 = vrcp.f32 %v721_v13 }
 0x3f3   :  { %v3890_v51 = vpop.eup %3889 }
 0x3f4   :  { %v733_v34 = vmul.f32 %v3890_v51, %v4622_v62 }
 0x3f6   :  { %v736_v61 = vpack.c.bf16 %v733_v34, %v732_v63 }
 0x3f8   :  { %3245 = vmatmul.msk.bf16.vlgmr.msra.gmra.mxu3 %vm569_vm15, %v736_v61 }
 0x403   :  { %v724_v0 = vpop.xlane.xlu0 %723 }
 0x404   :  { %3891 = vrcp.f32 %v724_v0 }
 0x40a   :  { %v3892_v49 = vpop.eup %3891 }
 0x40b   :  { %v727_v43 = vpop.xlane.xlu0 %726  ;;  %v734_v50 = vmul.f32 %v3892_v49, %v4637_v38 }
 0x40c   :  { %3893 = vrcp.f32 %v727_v43 }
 0x412   :  { %v3894_v47 = vpop.eup %3893 }
 0x413   :  { %v735_v53 = vmul.f32 %v3894_v47, %v3874_v59  ;;  %v950_v54 = vpop.xlane.xlu1 %949  ;;  %v953_v58 = vpop.xlane.xlu0 %952 }
 0x414   :  { %3895 = vrcp.f32 %v950_v54 }
 0x415   :  { %v737_v52 = vpack.c.bf16 %v735_v53, %v734_v50  ;;  %3897 = vrcp.f32 %v953_v58  ;;  %v3681_v50 = vld [vmem:[%s5479_s5 + $0x78] sm:$0xff] }
 0x416   :  { %3899 = vrcp.f32 %v837_v41  ;;  %1107 = vmatpush.bf16.msrb.mxu0 %v3681_v50 }
 0x417   :  { %3246 = vmatmul.msk.bf16.gmra.mxu3 %vm569_vm15, %v737_v52  ;;  %3901 = vrcp.f32 %v834_v40 }
 0x41a   :  { %v3896_v42 = vpop.eup %3895 }
 0x41b   :  { %v3898_v62 = vpop.eup %3897  ;;  %v964_v55 = vmul.f32 %v3896_v42, %v3878_v26  ;;  %v959_v26 = vpop.xlane.xlu2 %958 }
 0x41c   :  { %v965_v28 = vmul.f32 %v3898_v62, %v3876_v1  ;;  %v3900_v30 = vpop.eup %3899  ;;  %3903 = vrcp.f32 %v959_v26 }
 0x41d   :  { %v3902_v38 = vpop.eup %3901  ;;  %v849_v59 = vmul.f32 %v3900_v30, %v4620_v23 }
 0x41e   :  { %v968_v32 = vpack.c.bf16 %v965_v28, %v964_v55  ;;  %v848_v31 = vmul.f32 %v3902_v38, %v4614_v2  ;;  %v3680_v55 = vld [vmem:[%s5479_s5 + $0x70] sm:$0xff]  ;;  %v3679_v28 = vld [vmem:[%s5479_s5 + $0x68] sm:$0xff] }
 0x41f   :  { %1108 = vmatpush.bf16.msrb.mxu0 %v3680_v55 }
 0x420   :  { %v852_v44 = vpack.c.bf16 %v849_v59, %v848_v31 }
 0x422   :  { %v3904_v60 = vpop.eup %3903 }
 0x423   :  { %v967_v23 = vmul.f32 %v3904_v60, %v4648_v6  ;;  %v643_v6 = vpop.f32.mrf.mxu1  ;;  %1109 = vmatpush.bf16.msrb.mxu0 %v3679_v28 }
 0x426   :  { %v855_v21 = vpop.permute.xlu0 %854 }
 0x427   :  { %3253 = vmatmul.msk.bf16.vlgmr.msrb.gmra.mxu3 %vm569_vm15, %v968_v32  ;;  %v3678_v32 = vld [vmem:[%s5479_s5 + $0x60] sm:$0xff] }
 0x428   :  { %1110 = vmatpush.bf16.msrb.mxu0 %v3678_v32 }
 0x42b   :  { %v857_v24 = vpop.permute.xlu1 %856 }
 0x42c   :  { %872 = vmatpush.bf16.msra.mxu1 %v857_v24 }
 0x430   :  { %873 = vmatpush.bf16.msra.mxu1 %v855_v21 }
 0x433   :  { %3249 = vmatmul.msk.bf16.vlgmr.msra.gmra.mxu1 %vm569_vm15, %v852_v44 }
 0x451   :  { %v956_v1 = vpop.xlane.xlu0 %955 }
 0x452   :  { %3905 = vrcp.f32 %v956_v1 }
 0x456   :  { %v840_v20 = vpop.xlane.xlu1 %839 }
 0x457   :  { %3907 = vrcp.f32 %v840_v20 }
 0x458   :  { %v3906_v27 = vpop.eup %3905 }
 0x459   :  { %v843_v29 = vpop.xlane.xlu0 %842  ;;  %v966_v22 = vmul.f32 %v3906_v27, %v4663_v3  ;;  %v645_v3 = vpop.f32.mrf.mxu1 }
 0x45a   :  { %3909 = vrcp.f32 %v843_v29 }
 0x45b   :  { %v969_v2 = vpack.c.bf16 %v967_v23, %v966_v22 }
 0x45d   :  { %3254 = vmatmul.msk.bf16.gmra.mxu3 %vm569_vm15, %v969_v2  ;;  %v3908_v33 = vpop.eup %3907 }
 0x45e   :  { %v850_v25 = vmul.f32 %v3908_v33, %v4667_v9 }
 0x460   :  { %v3910_v35 = vpop.eup %3909 }
 0x461   :  { %v851_v45 = vmul.f32 %v3910_v35, %v4671_v39  ;;  %v648_v63 = vpop.f32.mrf.mxu1 }
 0x463   :  { %v853_v56 = vpack.c.bf16 %v851_v45, %v850_v25 }
 0x465   :  { %3250 = vmatmul.msk.bf16.gmra.mxu1 %vm569_vm15, %v853_v56 }
 0x469   :  { %v650_v61 = vpop.f32.mrf.mxu1 }
 0x47b   :  { %v759_v13 = vpop.f32.mrf.mxu3 }
 0x483   :  { %v761_v36 = vpop.f32.mrf.mxu3 }
 0x484   :  { %v3775_v40 = vpack.i.bf16 %v761_v36, %v759_v13 }
 0x486   :  { %3776 = vrot.lane.b32.xlu2 %v3775_v40, %s4212_s18 }
 0x49a   :  { %v764_v51 = vpop.f32.mrf.mxu3 }
 0x4a2   :  { %v766_v34 = vpop.f32.mrf.mxu3 }
 0x4a3   :  { %v3790_v47 = vpack.i.bf16 %v766_v34, %v764_v51 }
 0x4aa   :  { %v991_v41 = vpop.f32.mrf.mxu3 }
 0x4b0   :  { %v875_v0 = vpop.f32.mrf.mxu1 }
 0x4b2   :  { %v993_v9 = vpop.f32.mrf.mxu3 }
 0x4b3   :  { %v3785_v43 = vpack.i.bf16 %v993_v9, %v991_v41 }
 0x4b5   :  { %3786 = vrot.lane.b32.xlu1 %v3785_v43, %s4213_s3 }
 0x4b8   :  { %v877_v39 = vpop.f32.mrf.mxu1 }
 0x4b9   :  { %v3780_v49 = vpack.i.bf16 %v877_v39, %v875_v0  ;;  %v4725_v39 = vld [vmem:[%s5482_s8] sm:$0xff] }
 0x4bb   :  { %3781 = vrot.lane.b32.xlu0 %v3780_v49, %s4214_s10 }
 0x4c3   :  { %3791 = vrot.lane.b32.xlu0 %v3790_v47, %s4212_s18 }
 0x4e0   :  { %v996_v53 = vpop.f32.mrf.mxu3  ;;  %v3777_v30 = vpop.permute.xlu2 %3776 }
 0x4e1   :  { %v3779_v24 = vunpack.i.h.bf16 %v3777_v30  ;;  %v3778_v38 = vunpack.i.l.bf16 %v3777_v30 }
 0x4e2   :  { %v880_v54 = vpop.f32.mrf.mxu1 }
 0x4e3   :  { %v1050_v26 = vsel %vm537_vm14, %v645_v3, %v3779_v24  ;;  %v1049_v1 = vsel %vm537_vm14, %v643_v6, %v3778_v38 }
 0x4e8   :  { %v998_v58 = vpop.f32.mrf.mxu3 }
 0x4e9   :  { %v3800_v52 = vpack.i.bf16 %v998_v58, %v996_v53 }
 0x4ea   :  { %v882_v42 = vpop.f32.mrf.mxu1 }
 0x4eb   :  { %v3795_v62 = vpack.i.bf16 %v882_v42, %v880_v54  ;;  %3801 = vrot.lane.b32.xlu0 %v3800_v52, %s4213_s3 }
 0x4ed   :  { %3796 = vrot.lane.b32.xlu2 %v3795_v62, %s4214_s10 }
 0x527   :  { %v3787_v59 = vpop.permute.xlu1 %3786 }
 0x528   :  { %v3789_v20 = vunpack.i.h.bf16 %v3787_v59  ;;  %v3788_v60 = vunpack.i.l.bf16 %v3787_v59 }
 0x52d   :  { %v3782_v31 = vpop.permute.xlu0 %3781 }
 0x52e   :  { %v3784_v21 = vunpack.i.h.bf16 %v3782_v31  ;;  %v3783_v44 = vunpack.i.l.bf16 %v3782_v31 }
 0x530   :  { %v1054_v27 = vsel %vm569_vm15, %v1050_v26, %v3784_v21  ;;  %v1053_v29 = vsel %vm569_vm15, %v1049_v1, %v3783_v44  ;;  %v3307_v1 = vld [vmem:[%s5480_s6 + $0x30] sm:$0xf] }
 0x531   :  { %v1059_v22 = vsel %vm1057_vm1, %v1054_v27, %v3789_v20  ;;  %v1058_v23 = vsel %vm1057_vm1, %v1053_v29, %v3788_v60  ;;  %v3688_v20 = vld [vmem:[%s5480_s6 + $0x34] sm:$0xf]  ;;  %v3309_v27 = vld [vmem:[%s5480_s6 + $0x38] sm:$0xf0] }
 0x532   :  { %v1062_v2 = vpack.c.bf16 %v1059_v22, %v1058_v23  ;;  %v3312_v29 = vor.u32 %v3688_v20, %v3309_v27  ;;  %v3299_v22 = vld [vmem:[%s5480_s6 + $0x20] sm:$0xf]  ;;  %v3687_v23 = vld [vmem:[%s5480_s6 + $0x24] sm:$0xf0] }
 0x534   :  { %3279 = vmatmul.msk.bf16.vlgmr.msrb.gmra.mxu0 %vm186_vm0, %v1062_v2  ;;  %1322 = vmatpush.bf16.msra.mxu2 %v3312_v29  ;;  %v3686_v2 = vld [vmem:[%s5480_s6 + $0x24] sm:$0xf]  ;;  %v1227_v29 = vperm.slane %v4725_v39, 6 }
 0x535   :  { %v3792_v33 = vpop.permute.xlu0 %3791 }
 0x536   :  { %v3794_v25 = vunpack.i.h.bf16 %v3792_v33  ;;  %v3793_v45 = vunpack.i.l.bf16 %v3792_v33 }
 0x538   :  { %v1052_v40 = vsel %vm537_vm14, %v650_v61, %v3794_v25  ;;  %v1051_v6 = vsel %vm537_vm14, %v648_v63, %v3793_v45  ;;  %v1126_v63 = vperm.slane %v4725_v39, 5  ;;  %v3301_v25 = vld [vmem:[%s5480_s6 + $0x28] sm:$0xf0] }
 0x547   :  { %v3797_v35 = vpop.permute.xlu2 %3796 }
 0x548   :  { %v3799_v56 = vunpack.i.h.bf16 %v3797_v35  ;;  %v3798_v13 = vunpack.i.l.bf16 %v3797_v35  ;;  %v3300_v35 = vor.u32 %v3687_v23, %v3299_v22 }
 0x54a   :  { %v1055_v34 = vsel %vm569_vm15, %v1051_v6, %v3798_v13  ;;  %v1056_v41 = vsel %vm569_vm15, %v1052_v40, %v3799_v56  ;;  %v3304_v56 = vor.u32 %v3686_v2, %v3301_v25  ;;  %v3291_v6 = vld [vmem:[%s5480_s6 + $0x10] sm:$0xf] }
 0x54c   :  { %1323 = vmatpush.bf16.msra.mxu2 %v3304_v56  ;;  %v1232_v56 = vperm.slane %v4725_v39, 7 }
 0x55d   :  { %v3802_v36 = vpop.permute.xlu0 %3801 }
 0x55e   :  { %v3804_v3 = vunpack.i.h.bf16 %v3802_v36  ;;  %v3803_v51 = vunpack.i.l.bf16 %v3802_v36 }
 0x560   :  { %v1060_v0 = vsel %vm1057_vm1, %v1055_v34, %v3803_v51  ;;  %v1061_v9 = vsel %vm1057_vm1, %v1056_v41, %v3804_v3  ;;  %v3685_v3 = vld [vmem:[%s5480_s6 + $0x14] sm:$0xf0]  ;;  %v3684_v51 = vld [vmem:[%s5480_s6 + $0x14] sm:$0xf]  ;;  %v3293_v41 = vld [vmem:[%s5480_s6 + $0x18] sm:$0xf0] }
 0x561   :  { %v1063_v43 = vpack.c.bf16 %v1061_v9, %v1060_v0  ;;  %v3292_v34 = vor.u32 %v3685_v3, %v3291_v6  ;;  %v3296_v9 = vor.u32 %v3684_v51, %v3293_v41 }
 0x563   :  { %3280 = vmatmul.msk.bf16.gmra.mxu0 %vm186_vm0, %v1063_v43  ;;  %v3283_v43 = vld [vmem:[%s5480_s6] sm:$0xf]  ;;  %1324 = vmatpush.bf16.msra.mxu2 %v3296_v9 }
 0x5b1   :  { %v1112_v61 = vpop.f32.mrf.mxu0 }
 0x5b2   :  { %v1122_v49 = vadd.f32 %v1112_v61, %v4366_v37  ;;  %v3682_v61 = vld [vmem:[%s5480_s6 + $0x4] sm:$0xf] }
 0x5b4   :  { %v4729_v47 = vadd.f32 %v1126_v63, %v1122_v49 }
 0x5b6   :  { %v1131_v50 = vsel %vm186_vm0, %v4729_v47, 0.0  ;;  %v1147_v53 = vmul.f32 %v4729_v47, %v4729_v47 }
 0x5b7   :  { %1132 = vadd.xlane.f32.xlu1 %v1131_v50  ;;  %v3285_v50 = vld [vmem:[%s5480_s6 + $0x8] sm:$0xf0] }
 0x5b8   :  { %v1151_v54 = vsel %vm186_vm0, %v1147_v53, 0.0 }
 0x5b9   :  { %1152 = vadd.xlane.f32.xlu0 %v1151_v54  ;;  %v1114_v58 = vpop.f32.mrf.mxu0  ;;  %v3288_v54 = vor.u32 %v3682_v61, %v3285_v50 }
 0x5ba   :  { %v1123_v52 = vadd.f32 %v1114_v58, %v4375_v48 }
 0x5bb   :  { %1325 = vmatpush.bf16.msra.mxu2 %v3288_v54 }
 0x5bc   :  { %v4737_v42 = vadd.f32 %v1126_v63, %v1123_v52 }
 0x5be   :  { %v1134_v37 = vsel %vm186_vm0, %v4737_v42, 0.0  ;;  %v1148_v62 = vmul.f32 %v4737_v42, %v4737_v42 }
 0x5bf   :  { %1135 = vadd.xlane.f32.xlu2 %v1134_v37 }
 0x5c0   :  { %v1154_v55 = vsel %vm186_vm0, %v1148_v62, 0.0 }
 0x5c1   :  { %1155 = vadd.xlane.f32.xlu1 %v1154_v55 }
 0x5e0   :  { %v1117_v28 = vpop.f32.mrf.mxu0 }
 0x5e1   :  { %v1124_v32 = vadd.f32 %v1117_v28, %v4373_v46 }
 0x5e3   :  { %v4745_v30 = vadd.f32 %v1126_v63, %v1124_v32 }
 0x5e5   :  { %v1137_v48 = vsel %vm186_vm0, %v4745_v30, 0.0  ;;  %v1149_v24 = vmul.f32 %v4745_v30, %v4745_v30 }
 0x5e6   :  { %1138 = vadd.xlane.f32.xlu2 %v1137_v48 }
 0x5e7   :  { %v1157_v38 = vsel %vm186_vm0, %v1149_v24, 0.0 }
 0x5e8   :  { %1158 = vadd.xlane.f32.xlu1 %v1157_v38  ;;  %v1119_v59 = vpop.f32.mrf.mxu0 }
 0x5e9   :  { %v1125_v31 = vadd.f32 %v1119_v59, %v4386_v57  ;;  %v3689_v57 = vld [vmem:[%s5480_s6 + $0x34] sm:$0xf0] }
 0x5ea   :  { %v3308_v60 = vor.u32 %v3689_v57, %v3307_v1 }
 0x5eb   :  { %v4753_v21 = vadd.f32 %v1126_v63, %v1125_v31  ;;  %v3683_v63 = vld [vmem:[%s5480_s6 + $0x4] sm:$0xf0] }
 0x5ec   :  { %1303 = vmatpush.bf16.msrb.mxu1 %v3308_v60  ;;  %v3284_v49 = vor.u32 %v3683_v63, %v3283_v43 }
 0x5ed   :  { %v1140_v46 = vsel %vm186_vm0, %v4753_v21, 0.0  ;;  %v1150_v44 = vmul.f32 %v4753_v21, %v4753_v21 }
 0x5ee   :  { %1141 = vadd.xlane.f32.xlu0 %v1140_v46 }
 0x5ef   :  { %v1160_v26 = vsel %vm186_vm0, %v1150_v44, 0.0 }
 0x5f0   :  { %1161 = vadd.xlane.f32.xlu2 %v1160_v26  ;;  %1304 = vmatpush.bf16.msrb.mxu1 %v3300_v35 }
 0x5f4   :  { %1305 = vmatpush.bf16.msrb.mxu1 %v3292_v34 }
 0x5f8   :  { %1306 = vmatpush.bf16.msrb.mxu1 %v3284_v49 }
 0x62a   :  { %v1133_v33 = vpop.xlane.xlu1 %1132 }
 0x62b   :  { %v1143_v45 = vmul.f32 %v1133_v33, %v4400_v10 }
 0x62c   :  { %v1153_v13 = vpop.xlane.xlu0 %1152 }
 0x62d   :  { %v1167_v36 = vmul.f32 %v1143_v45, %v1143_v45  ;;  %v1163_v40 = vmul.f32 %v1153_v13, %v4400_v10  ;;  %v1175_v60 = vsub.f32 %v4729_v47, %v1143_v45 }
 0x62f   :  { %v1171_v0 = vsub.f32 %v1163_v40, %v1167_v36 }
 0x631   :  { %v1179_v53 = vadd.f32 1e-06, %v1171_v0 }
 0x632   :  { %v1136_v58 = vpop.xlane.xlu2 %1135 }
 0x633   :  { %3911 = vrsqrt.f32 %v1179_v53  ;;  %v1144_v52 = vmul.f32 %v1136_v58, %v4400_v10  ;;  %vm1189_vm3 = vweird.f32 %v1179_v53 }
 0x634   :  { %v1156_v37 = vpop.xlane.xlu1 %1155 }
 0x635   :  { %v1168_v62 = vmul.f32 %v1144_v52, %v1144_v52  ;;  %v1164_v55 = vmul.f32 %v1156_v37, %v4400_v10  ;;  %v1176_v2 = vsub.f32 %v4737_v42, %v1144_v52 }
 0x637   :  { %v1172_v28 = vsub.f32 %v1164_v55, %v1168_v62 }
 0x639   :  { %v3912_v32 = vpop.eup %3911  ;;  %v1180_v48 = vadd.f32 1e-06, %v1172_v28 }
 0x63a   :  { %v1184_v24 = vmul.f32 %v3912_v32, %v1179_v53  ;;  %vm1190_vm2 = vweird.f32 %v3912_v32 }
 0x63b   :  { %3913 = vrsqrt.f32 %v1180_v48  ;;  %vm1191_vm4 = vmor %vm1189_vm3, %vm1190_vm2  ;;  %vm1199_vm6 = vweird.f32 %v1180_v48 }
 0x63c   :  { %v1185_v38 = vmul.f32 %v3912_v32, %v1184_v24 }
 0x63e   :  { %v1186_v59 = vmul.f32 0.5, %v1185_v38 }
 0x640   :  { %v1187_v31 = vsub.f32 1.5, %v1186_v59 }
 0x641   :  { %v3914_v46 = vpop.eup %3913 }
 0x642   :  { %v1188_v44 = vmul.f32 %v3912_v32, %v1187_v31  ;;  %v1194_v26 = vmul.f32 %v3914_v46, %v1180_v48  ;;  %vm1200_vm5 = vweird.f32 %v3914_v46 }
 0x643   :  { %vm1201_vm7 = vmor %vm1199_vm6, %vm1200_vm5 }
 0x644   :  { %v1195_v1 = vmul.f32 %v3914_v46, %v1194_v26  ;;  %v1192_v57 = vsel %vm1191_vm4, %v3912_v32, %v1188_v44 }
 0x645   :  { %v1223_v22 = vmul.f32 %v1192_v57, %v1175_v60 }
 0x646   :  { %v1196_v20 = vmul.f32 0.5, %v1195_v1 }
 0x647   :  { %v1228_v35 = vmul.f32 %v1227_v29, %v1223_v22 }
 0x648   :  { %v1197_v27 = vsub.f32 1.5, %v1196_v20 }
 0x649   :  { %v1233_v36 = vadd.f32 %v1232_v56, %v1228_v35  ;;  %v3695_v35 = vld [vmem:[%s5481_s7 + $0x28] sm:$0xff] }
 0x64a   :  { %v1198_v23 = vmul.f32 %v3914_v46, %v1197_v27 }
 0x64c   :  { %v1202_v33 = vsel %vm1201_vm7, %v3914_v46, %v1198_v23 }
 0x64d   :  { %v1224_v25 = vmul.f32 %v1202_v33, %v1176_v2  ;;  %v3697_v2 = vld [vmem:[%s5481_s7 + $0x38] sm:$0xff]  ;;  %v3696_v33 = vld [vmem:[%s5481_s7 + $0x30] sm:$0xff] }
 0x64e   :  { %1541 = vmatpush.bf16.msra.mxu3 %v3697_v2 }
 0x64f   :  { %v1229_v13 = vmul.f32 %v1227_v29, %v1224_v25  ;;  %v3704_v25 = vld [vmem:[%s5481_s7 + $0x70] sm:$0xff] }
 0x651   :  { %v1234_v40 = vadd.f32 %v1232_v56, %v1229_v13  ;;  %v3703_v13 = vld [vmem:[%s5481_s7 + $0x68] sm:$0xff] }
 0x652   :  { %1542 = vmatpush.bf16.msra.mxu3 %v3696_v33 }
 0x653   :  { %v1237_v6 = vpack.c.bf16 %v1234_v40, %v1233_v36  ;;  %v3693_v36 = vld [vmem:[%s5481_s7 + $0x18] sm:$0xff]  ;;  %v3702_v40 = vld [vmem:[%s5481_s7 + $0x60] sm:$0xff] }
 0x655   :  { %3313 = vmatmul.msk.bf16.vlgmr.msrb.gmra.mxu1 %vm186_vm0, %v1237_v6  ;;  %3315 = vmatmul.msk.bf16.vlgmr.msra.gmra.mxu2 %vm186_vm0, %v1237_v6  ;;  %v3692_v6 = vld [vmem:[%s5481_s7 + $0x10] sm:$0xff] }
 0x656   :  { %1543 = vmatpush.bf16.msra.mxu3 %v3695_v35 }
 0x659   :  { %v1139_v45 = vpop.xlane.xlu2 %1138 }
 0x65a   :  { %v1145_v3 = vmul.f32 %v1139_v45, %v4400_v10  ;;  %v1247_v45 = vld [vmem:[%s5483_s9] sm:$0x3] }
 0x65b   :  { %v1159_v51 = vpop.xlane.xlu1 %1158 }
 0x65c   :  { %v1169_v34 = vmul.f32 %v1145_v3, %v1145_v3  ;;  %v1165_v41 = vmul.f32 %v1159_v51, %v4400_v10  ;;  %v1177_v59 = vsub.f32 %v4745_v30, %v1145_v3  ;;  %v3701_v3 = vld [vmem:[%s5481_s7 + $0x58] sm:$0xff]  ;;  %v4862_v51 = vperm.slane %v1247_v45, 0 }
 0x65e   :  { %v1173_v0 = vsub.f32 %v1165_v41, %v1169_v34  ;;  %v3691_v34 = vld [vmem:[%s5481_s7 + $0x8] sm:$0xff]  ;;  %v3700_v41 = vld [vmem:[%s5481_s7 + $0x50] sm:$0xff] }
 0x660   :  { %v1181_v9 = vadd.f32 1e-06, %v1173_v0 }
 0x661   :  { %v1142_v43 = vpop.xlane.xlu0 %1141 }
 0x662   :  { %3915 = vrsqrt.f32 %v1181_v9  ;;  %v1146_v39 = vmul.f32 %v1142_v43, %v4400_v10  ;;  %vm1209_vm9 = vweird.f32 %v1181_v9  ;;  %v3690_v43 = vld [vmem:[%s5481_s7] sm:$0xff] }
 0x663   :  { %v1162_v63 = vpop.xlane.xlu2 %1161 }
 0x664   :  { %v1170_v61 = vmul.f32 %v1146_v39, %v1146_v39  ;;  %v1166_v49 = vmul.f32 %v1162_v63, %v4400_v10  ;;  %v1178_v26 = vsub.f32 %v4753_v21, %v1146_v39  ;;  %v4874_v63 = vperm.slane %v1247_v45, 1 }
 0x666   :  { %v1174_v50 = vsub.f32 %v1166_v49, %v1170_v61  ;;  %v3699_v61 = vld [vmem:[%s5481_s7 + $0x48] sm:$0xff] }
 0x668   :  { %v3916_v53 = vpop.eup %3915  ;;  %v1182_v54 = vadd.f32 1e-06, %v1174_v50 }
 0x669   :  { %v1204_v58 = vmul.f32 %v3916_v53, %v1181_v9  ;;  %vm1210_vm8 = vweird.f32 %v3916_v53 }
 0x66a   :  { %3917 = vrsqrt.f32 %v1182_v54  ;;  %vm1211_vm10 = vmor %vm1209_vm9, %vm1210_vm8  ;;  %vm1219_vm12 = vweird.f32 %v1182_v54 }
 0x66b   :  { %v1205_v52 = vmul.f32 %v3916_v53, %v1204_v58 }
 0x66d   :  { %v1206_v37 = vmul.f32 0.5, %v1205_v52 }
 0x66f   :  { %v1207_v62 = vsub.f32 1.5, %v1206_v37 }
 0x670   :  { %v3918_v55 = vpop.eup %3917 }
 0x671   :  { %v1208_v28 = vmul.f32 %v3916_v53, %v1207_v62  ;;  %v1214_v32 = vmul.f32 %v3918_v55, %v1182_v54  ;;  %vm1220_vm11 = vweird.f32 %v3918_v55 }
 0x672   :  { %vm1221_vm13 = vmor %vm1219_vm12, %vm1220_vm11 }
 0x673   :  { %v1215_v48 = vmul.f32 %v3918_v55, %v1214_v32  ;;  %v1212_v24 = vsel %vm1211_vm10, %v3916_v53, %v1208_v28  ;;  %v3698_v53 = vld [vmem:[%s5481_s7 + $0x40] sm:$0xff] }
 0x674   :  { %v1225_v46 = vmul.f32 %v1212_v24, %v1177_v59 }
 0x675   :  { %v1216_v38 = vmul.f32 0.5, %v1215_v48 }
 0x676   :  { %v1230_v20 = vmul.f32 %v1227_v29, %v1225_v46 }
 0x677   :  { %v1217_v31 = vsub.f32 1.5, %v1216_v38 }
 0x678   :  { %v1235_v27 = vadd.f32 %v1232_v56, %v1230_v20 }
 0x679   :  { %v1218_v44 = vmul.f32 %v3918_v55, %v1217_v31 }
 0x67b   :  { %v1222_v1 = vsel %vm1221_vm13, %v3918_v55, %v1218_v44 }
 0x67c   :  { %v1226_v57 = vmul.f32 %v1222_v1, %v1178_v26 }
 0x67e   :  { %v1231_v60 = vmul.f32 %v1227_v29, %v1226_v57  ;;  %v3705_v29 = vld [vmem:[%s5481_s7 + $0x78] sm:$0xff] }
 0x67f   :  { %1560 = vmatpush.bf16.msra.mxu0 %v3705_v29 }
 0x680   :  { %v1236_v22 = vadd.f32 %v1232_v56, %v1231_v60  ;;  %v3694_v56 = vld [vmem:[%s5481_s7 + $0x20] sm:$0xff] }
 0x681   :  { %1544 = vmatpush.bf16.msra.mxu3 %v3694_v56 }
 0x682   :  { %v1238_v23 = vpack.c.bf16 %v1236_v22, %v1235_v27 }
 0x683   :  { %1561 = vmatpush.bf16.msra.mxu0 %v3704_v25 }
 0x684   :  { %3314 = vmatmul.msk.bf16.gmra.mxu1 %vm186_vm0, %v1238_v23  ;;  %3316 = vmatmul.msk.bf16.gmra.mxu2 %vm186_vm0, %v1238_v23 }
 0x685   :  { %1545 = vmatpush.bf16.msra.mxu3 %v3693_v36 }
 0x687   :  { %1562 = vmatpush.bf16.msra.mxu0 %v3703_v13 }
 0x689   :  { %1546 = vmatpush.bf16.msra.mxu3 %v3692_v6 }
 0x68b   :  { %1563 = vmatpush.bf16.msra.mxu0 %v3702_v40 }
 0x68d   :  { %1547 = vmatpush.bf16.msra.mxu3 %v3691_v34 }
 0x68f   :  { %1564 = vmatpush.bf16.msra.mxu0 %v3701_v3 }
 0x691   :  { %1548 = vmatpush.bf16.msra.mxu3 %v3690_v43 }
 0x693   :  { %1565 = vmatpush.bf16.msra.mxu0 %v3700_v41 }
 0x697   :  { %1566 = vmatpush.bf16.msra.mxu0 %v3699_v61 }
 0x69b   :  { %1567 = vmatpush.bf16.msra.mxu0 %v3698_v53 }
 0x6d2   :  { %v1308_v0 = vpop.f32.mrf.mxu1 }
 0x6d3   :  { %v1309_v9 = vadd.f32 %v1308_v0, %v4862_v51 }
 0x6d5   :  { %v1337_v39 = vmul.f32 %v1309_v9, %v1309_v9 }
 0x6d7   :  { %v1345_v49 = vmul.f32 %v1337_v39, %v1309_v9 }
 0x6d8   :  { %v1327_v50 = vpop.f32.mrf.mxu2 }
 0x6d9   :  { %v1353_v54 = vmul.f32 0.044715, %v1345_v49  ;;  %v1328_v58 = vadd.f32 %v1327_v50, %v4874_v63 }
 0x6da   :  { %v1310_v52 = vpop.f32.mrf.mxu1 }
 0x6db   :  { %v1361_v37 = vadd.f32 %v1353_v54, %v1309_v9  ;;  %v1338_v62 = vmul.f32 %v1328_v58, %v1328_v58  ;;  %v1311_v55 = vadd.f32 %v1310_v52, %v4862_v51 }
 0x6dd   :  { %v1369_v28 = vmul.f32 0.7978846, %v1361_v37  ;;  %v1346_v32 = vmul.f32 %v1338_v62, %v1328_v58  ;;  %v1339_v48 = vmul.f32 %v1311_v55, %v1311_v55 }
 0x6df   :  { %v1354_v24 = vmul.f32 0.044715, %v1346_v32  ;;  %v1347_v38 = vmul.f32 %v1339_v48, %v1311_v55  ;;  %3919 = vtanh.f32 %v1369_v28 }
 0x6e0   :  { %v1329_v59 = vpop.f32.mrf.mxu2 }
 0x6e1   :  { %v1362_v31 = vadd.f32 %v1354_v24, %v1328_v58  ;;  %v1355_v46 = vmul.f32 0.044715, %v1347_v38  ;;  %v1330_v44 = vadd.f32 %v1329_v59, %v4874_v63 }
 0x6e3   :  { %v1370_v26 = vmul.f32 0.7978846, %v1362_v31  ;;  %v1363_v1 = vadd.f32 %v1355_v46, %v1311_v55  ;;  %v1340_v57 = vmul.f32 %v1330_v44, %v1330_v44 }
 0x6e5   :  { %v1371_v20 = vmul.f32 0.7978846, %v1363_v1  ;;  %v1348_v60 = vmul.f32 %v1340_v57, %v1330_v44  ;;  %3921 = vtanh.f32 %v1370_v26  ;;  %v3920_v27 = vpop.eup %3919 }
 0x6e6   :  { %v1385_v2 = vadd.f32 1.0, %v3920_v27 }
 0x6e7   :  { %3923 = vtanh.f32 %v1371_v20  ;;  %v1356_v22 = vmul.f32 0.044715, %v1348_v60 }
 0x6e8   :  { %v1393_v25 = vmul.f32 0.5, %v1385_v2 }
 0x6e9   :  { %v1364_v23 = vadd.f32 %v1356_v22, %v1330_v44 }
 0x6ea   :  { %v1401_v40 = vmul.f32 %v1393_v25, %v1309_v9 }
 0x6eb   :  { %v1372_v33 = vmul.f32 0.7978846, %v1364_v23  ;;  %v3922_v29 = vpop.eup %3921 }
 0x6ec   :  { %v1386_v13 = vadd.f32 1.0, %v3922_v29 }
 0x6ed   :  { %v3924_v35 = vpop.eup %3923  ;;  %3925 = vtanh.f32 %v1372_v33 }
 0x6ee   :  { %v1387_v56 = vadd.f32 1.0, %v3924_v35  ;;  %v1394_v3 = vmul.f32 0.5, %v1386_v13 }
 0x6f0   :  { %v1395_v36 = vmul.f32 0.5, %v1387_v56  ;;  %v1402_v43 = vmul.f32 %v1394_v3, %v1328_v58 }
 0x6f2   :  { %v1403_v6 = vmul.f32 %v1395_v36, %v1311_v55 }
 0x6f3   :  { %v3926_v45 = vpop.eup %3925 }
 0x6f4   :  { %v1388_v34 = vadd.f32 1.0, %v3926_v45  ;;  %v1409_v41 = vpack.c.bf16 %v1403_v6, %v1401_v40 }
 0x6f6   :  { %v1396_v0 = vmul.f32 0.5, %v1388_v34  ;;  %1549 = vmatmul.bf16.vlgmr.msra.gmra.mxu3 %v1409_v41 }
 0x6f8   :  { %v1404_v39 = vmul.f32 %v1396_v0, %v1330_v44 }
 0x6fa   :  { %v1410_v61 = vpack.c.bf16 %v1404_v39, %v1402_v43 }
 0x6fc   :  { %1568 = vmatmul.bf16.vlgmr.msra.gmra.mxu0 %v1410_v61 }
 0x701   :  { %v1313_v49 = vpop.f32.mrf.mxu1 }
 0x702   :  { %v1314_v50 = vadd.f32 %v1313_v49, %v4862_v51 }
 0x704   :  { %v1341_v53 = vmul.f32 %v1314_v50, %v1314_v50 }
 0x706   :  { %v1349_v54 = vmul.f32 %v1341_v53, %v1314_v50 }
 0x707   :  { %v1332_v52 = vpop.f32.mrf.mxu2 }
 0x708   :  { %v1357_v37 = vmul.f32 0.044715, %v1349_v54  ;;  %v1333_v9 = vadd.f32 %v1332_v52, %v4874_v63  ;;  %v3835_v54 = vld [vmem:[%s5482_s8 + $0x8] ss:$0 sm:$0xff] }
 0x709   :  { %v1315_v62 = vpop.f32.mrf.mxu1 }
 0x70a   :  { %v1365_v55 = vadd.f32 %v1357_v37, %v1314_v50  ;;  %v1342_v28 = vmul.f32 %v1333_v9, %v1333_v9  ;;  %v1316_v32 = vadd.f32 %v1315_v62, %v4862_v51 }
 0x70c   :  { %v1350_v48 = vmul.f32 %v1342_v28, %v1333_v9  ;;  %v1343_v24 = vmul.f32 %v1316_v32, %v1316_v32  ;;  %v1373_v58 = vmul.f32 0.7978846, %v1365_v55 }
 0x70e   :  { %v1358_v38 = vmul.f32 0.044715, %v1350_v48  ;;  %v1351_v59 = vmul.f32 %v1343_v24, %v1316_v32  ;;  %3927 = vtanh.f32 %v1373_v58 }
 0x70f   :  { %v1334_v31 = vpop.f32.mrf.mxu2 }
 0x710   :  { %v1366_v46 = vadd.f32 %v1358_v38, %v1333_v9  ;;  %v1359_v44 = vmul.f32 0.044715, %v1351_v59  ;;  %v1335_v26 = vadd.f32 %v1334_v31, %v4874_v63 }
 0x712   :  { %v1367_v1 = vadd.f32 %v1359_v44, %v1316_v32  ;;  %v1344_v57 = vmul.f32 %v1335_v26, %v1335_v26  ;;  %v1374_v20 = vmul.f32 0.7978846, %v1366_v46 }
 0x714   :  { %v1352_v60 = vmul.f32 %v1344_v57, %v1335_v26  ;;  %v1375_v27 = vmul.f32 0.7978846, %v1367_v1  ;;  %3929 = vtanh.f32 %v1374_v20  ;;  %v3928_v22 = vpop.eup %3927 }
 0x715   :  { %v1389_v2 = vadd.f32 1.0, %v3928_v22 }
 0x716   :  { %v1360_v23 = vmul.f32 0.044715, %v1352_v60  ;;  %3931 = vtanh.f32 %v1375_v27 }
 0x717   :  { %v1397_v56 = vmul.f32 0.5, %v1389_v2 }
 0x718   :  { %v1368_v51 = vadd.f32 %v1360_v23, %v1335_v26 }
 0x719   :  { %v1405_v36 = vmul.f32 %v1397_v56, %v1314_v50  ;;  %v3712_v56 = vld [vmem:[%s5479_s5 + $0xb0] sm:$0xff] }
 0x71a   :  { %v1376_v33 = vmul.f32 0.7978846, %v1368_v51  ;;  %v3930_v29 = vpop.eup %3929 }
 0x71b   :  { %v1390_v63 = vadd.f32 1.0, %v3930_v29  ;;  %v3717_v29 = vld [vmem:[%s5479_s5 + $0xd8] sm:$0xff] }
 0x71c   :  { %v3932_v35 = vpop.eup %3931  ;;  %3933 = vtanh.f32 %v1376_v33  ;;  %v3709_v33 = vld [vmem:[%s5479_s5 + $0x98] sm:$0xff]  ;;  %1849 = vmatpush.bf16.msrb.mxu3 %v3717_v29 }
 0x71d   :  { %v1391_v25 = vadd.f32 1.0, %v3932_v35  ;;  %v1398_v34 = vmul.f32 0.5, %v1390_v63  ;;  %1743 = vmatpush.bf16.msra.mxu1 %v3709_v33 }
 0x71f   :  { %v1399_v13 = vmul.f32 0.5, %v1391_v25  ;;  %v1406_v0 = vmul.f32 %v1398_v34, %v1333_v9  ;;  %v3708_v25 = vld [vmem:[%s5479_s5 + $0x90] sm:$0xff]  ;;  %v3715_v34 = vld [vmem:[%s5479_s5 + $0xc8] sm:$0xff] }
 0x721   :  { %v1407_v40 = vmul.f32 %v1399_v13, %v1316_v32  ;;  %v3716_v13 = vld [vmem:[%s5479_s5 + $0xd0] sm:$0xff]  ;;  %1744 = vmatpush.bf16.msra.mxu1 %v3708_v25 }
 0x722   :  { %v3934_v6 = vpop.eup %3933  ;;  %1850 = vmatpush.bf16.msrb.mxu3 %v3716_v13 }
 0x723   :  { %v1411_v45 = vpack.c.bf16 %v1407_v40, %v1405_v36  ;;  %v1392_v3 = vadd.f32 1.0, %v3934_v6 }
 0x725   :  { %1554 = vmatmul.bf16.gmra.mxu3 %v1411_v45  ;;  %v1400_v41 = vmul.f32 0.5, %v1392_v3  ;;  %v3707_v45 = vld [vmem:[%s5479_s5 + $0x88] sm:$0xff] }
 0x726   :  { %v3711_v3 = vld [vmem:[%s5479_s5 + $0xa8] sm:$0xff]  ;;  %1745 = vmatpush.bf16.msra.mxu1 %v3707_v45  ;;  %1851 = vmatpush.bf16.msrb.mxu3 %v3715_v34 }
 0x727   :  { %v1408_v43 = vmul.f32 %v1400_v41, %v1335_v26 }
 0x729   :  { %v1412_v39 = vpack.c.bf16 %v1408_v43, %v1406_v0  ;;  %v3706_v0 = vld [vmem:[%s5479_s5 + $0x80] sm:$0xff] }
 0x72a   :  { %v3710_v43 = vld [vmem:[%s5479_s5 + $0xa0] sm:$0xff]  ;;  %1746 = vmatpush.bf16.msra.mxu1 %v3706_v0 }
 0x72b   :  { %1573 = vmatmul.bf16.gmra.mxu0 %v1412_v39 }
 0x779   :  { %v1550_v61 = vpop.f32.mrf.mxu3  ;;  %v1569_v49 = vpop.f32.mrf.mxu0 }
 0x77a   :  { %v1570_v53 = vadd.f32 %v1569_v49, %v1550_v61  ;;  %v3714_v61 = vld [vmem:[%s5479_s5 + $0xc0] sm:$0xff] }
 0x77b   :  { %1852 = vmatpush.bf16.msrb.mxu3 %v3714_v61 }
 0x77c   :  { %v1579_v50 = vadd.f32 %v1570_v53, %v4729_v47 }
 0x77e   :  { %v4893_v52 = vadd.f32 %v3835_v54, %v1579_v50 }
 0x780   :  { %v1591_v37 = vsel %vm186_vm0, %v4893_v52, 0.0  ;;  %v1607_v9 = vmul.f32 %v4893_v52, %v4893_v52 }
 0x781   :  { %v1552_v62 = vpop.f32.mrf.mxu3  ;;  %v1571_v55 = vpop.f32.mrf.mxu0  ;;  %1592 = vadd.xlane.f32.xlu0 %v1591_v37 }
 0x782   :  { %v1572_v28 = vadd.f32 %v1571_v55, %v1552_v62  ;;  %v1611_v32 = vsel %vm186_vm0, %v1607_v9, 0.0 }
 0x783   :  { %1612 = vadd.xlane.f32.xlu2 %v1611_v32 }
 0x784   :  { %v1580_v48 = vadd.f32 %v1572_v28, %v4737_v42 }
 0x786   :  { %v4901_v24 = vadd.f32 %v3835_v54, %v1580_v48 }
 0x788   :  { %v1594_v47 = vsel %vm186_vm0, %v4901_v24, 0.0  ;;  %v1608_v58 = vmul.f32 %v4901_v24, %v4901_v24 }
 0x789   :  { %1595 = vadd.xlane.f32.xlu1 %v1594_v47 }
 0x78a   :  { %v1614_v38 = vsel %vm186_vm0, %v1608_v58, 0.0 }
 0x78b   :  { %1615 = vadd.xlane.f32.xlu0 %v1614_v38 }
 0x7a8   :  { %v1555_v59 = vpop.f32.mrf.mxu3  ;;  %v1574_v31 = vpop.f32.mrf.mxu0 }
 0x7a9   :  { %v1575_v46 = vadd.f32 %v1574_v31, %v1555_v59 }
 0x7ab   :  { %v1581_v44 = vadd.f32 %v1575_v46, %v4745_v30  ;;  %v4967_v46 = vld [vmem:[%s5482_s8 + $0x10] sm:$0xff] }
 0x7ac   :  { %v1692_v33 = vperm.slane %v4967_v46, 1 }
 0x7ad   :  { %v4909_v26 = vadd.f32 %v3835_v54, %v1581_v44 }
 0x7af   :  { %v1597_v42 = vsel %vm186_vm0, %v4909_v26, 0.0  ;;  %v1609_v1 = vmul.f32 %v4909_v26, %v4909_v26 }
 0x7b0   :  { %v1576_v57 = vpop.f32.mrf.mxu0  ;;  %1598 = vadd.xlane.f32.xlu1 %v1597_v42  ;;  %v1557_v20 = vpop.f32.mrf.mxu3 }
 0x7b1   :  { %v1577_v60 = vadd.f32 %v1576_v57, %v1557_v20  ;;  %v1617_v27 = vsel %vm186_vm0, %v1609_v1, 0.0  ;;  %v1687_v20 = vperm.slane %v4967_v46, 0 }
 0x7b2   :  { %1618 = vadd.xlane.f32.xlu0 %v1617_v27 }
 0x7b3   :  { %v1582_v22 = vadd.f32 %v1577_v60, %v4753_v21  ;;  %v3713_v21 = vld [vmem:[%s5479_s5 + $0xb8] sm:$0xff] }
 0x7b4   :  { %1796 = vmatpush.bf16.msrb.mxu2 %v3713_v21 }
 0x7b5   :  { %v4917_v23 = vadd.f32 %v3835_v54, %v1582_v22 }
 0x7b7   :  { %v1600_v30 = vsel %vm186_vm0, %v4917_v23, 0.0  ;;  %v1610_v51 = vmul.f32 %v4917_v23, %v4917_v23 }
 0x7b8   :  { %1601 = vadd.xlane.f32.xlu2 %v1600_v30  ;;  %1797 = vmatpush.bf16.msrb.mxu2 %v3712_v56 }
 0x7b9   :  { %v1620_v2 = vsel %vm186_vm0, %v1610_v51, 0.0 }
 0x7ba   :  { %1621 = vadd.xlane.f32.xlu1 %v1620_v2 }
 0x7bc   :  { %1798 = vmatpush.bf16.msrb.mxu2 %v3711_v3 }
 0x7c0   :  { %1799 = vmatpush.bf16.msrb.mxu2 %v3710_v43 }
 0x7f4   :  { %v1593_v35 = vpop.xlane.xlu0 %1592 }
 0x7f5   :  { %v1603_v63 = vmul.f32 %v1593_v35, %v4400_v10 }
 0x7f6   :  { %v1613_v36 = vpop.xlane.xlu2 %1612 }
 0x7f7   :  { %v1627_v40 = vmul.f32 %v1603_v63, %v1603_v63  ;;  %v1623_v6 = vmul.f32 %v1613_v36, %v4400_v10  ;;  %v1635_v1 = vsub.f32 %v4893_v52, %v1603_v63 }
 0x7f9   :  { %v1631_v41 = vsub.f32 %v1623_v6, %v1627_v40 }
 0x7fb   :  { %v1639_v39 = vadd.f32 1e-06, %v1631_v41 }
 0x7fc   :  { %v1596_v49 = vpop.xlane.xlu1 %1595 }
 0x7fd   :  { %3935 = vrsqrt.f32 %v1639_v39  ;;  %v1604_v53 = vmul.f32 %v1596_v49, %v4400_v10  ;;  %vm1649_vm3 = vweird.f32 %v1639_v39 }
 0x7fe   :  { %v1616_v54 = vpop.xlane.xlu0 %1615 }
 0x7ff   :  { %v1628_v50 = vmul.f32 %v1604_v53, %v1604_v53  ;;  %v1624_v37 = vmul.f32 %v1616_v54, %v4400_v10  ;;  %v1636_v22 = vsub.f32 %v4901_v24, %v1604_v53 }
 0x801   :  { %v1632_v9 = vsub.f32 %v1624_v37, %v1628_v50 }
 0x803   :  { %v3936_v62 = vpop.eup %3935  ;;  %v1640_v55 = vadd.f32 1e-06, %v1632_v9 }
 0x804   :  { %v1644_v28 = vmul.f32 %v3936_v62, %v1639_v39  ;;  %vm1650_vm2 = vweird.f32 %v3936_v62 }
 0x805   :  { %3937 = vrsqrt.f32 %v1640_v55  ;;  %vm1651_vm4 = vmor %vm1649_vm3, %vm1650_vm2  ;;  %vm1659_vm6 = vweird.f32 %v1640_v55 }
 0x806   :  { %v1645_v32 = vmul.f32 %v3936_v62, %v1644_v28 }
 0x808   :  { %v1646_v48 = vmul.f32 0.5, %v1645_v32 }
 0x80a   :  { %v1647_v47 = vsub.f32 1.5, %v1646_v48 }
 0x80b   :  { %v3938_v58 = vpop.eup %3937 }
 0x80c   :  { %v1648_v38 = vmul.f32 %v3936_v62, %v1647_v47  ;;  %v1654_v59 = vmul.f32 %v3938_v58, %v1640_v55  ;;  %vm1660_vm5 = vweird.f32 %v3938_v58 }
 0x80d   :  { %vm1661_vm7 = vmor %vm1659_vm6, %vm1660_vm5 }
 0x80e   :  { %v1655_v31 = vmul.f32 %v3938_v58, %v1654_v59  ;;  %v1652_v44 = vsel %vm1651_vm4, %v3936_v62, %v1648_v38 }
 0x80f   :  { %v1683_v60 = vmul.f32 %v1652_v44, %v1635_v1 }
 0x810   :  { %v1656_v42 = vmul.f32 0.5, %v1655_v31 }
 0x811   :  { %v1688_v51 = vmul.f32 %v1687_v20, %v1683_v60 }
 0x812   :  { %v1657_v57 = vsub.f32 1.5, %v1656_v42 }
 0x813   :  { %v1693_v29 = vadd.f32 %v1692_v33, %v1688_v51  ;;  %v1708_v51 = vperm.slane %v4967_v46, 2 }
 0x814   :  { %v1658_v27 = vmul.f32 %v3938_v58, %v1657_v57 }
 0x816   :  { %v1662_v30 = vsel %vm1661_vm7, %v3938_v58, %v1658_v27 }
 0x817   :  { %v1684_v2 = vmul.f32 %v1662_v30, %v1636_v22 }
 0x819   :  { %v1689_v21 = vmul.f32 %v1687_v20, %v1684_v2 }
 0x81b   :  { %v1694_v35 = vadd.f32 %v1692_v33, %v1689_v21 }
 0x81d   :  { %v1697_v25 = vpack.c.bf16 %v1694_v35, %v1693_v29  ;;  %v1767_v29 = vperm.slane %v4967_v46, 3 }
 0x81f   :  { %3407 = vmatmul.msk.bf16.vlgmr.msra.gmra.mxu1 %vm186_vm0, %v1697_v25  ;;  %3433 = vmatmul.msk.bf16.vlgmr.msrb.gmra.mxu2 %vm186_vm0, %v1697_v25 }
 0x820   :  { %3459 = vmatmul.msk.bf16.vlgmr.msrb.gmra.mxu3 %vm186_vm0, %v1697_v25 }
 0x823   :  { %v1599_v56 = vpop.xlane.xlu1 %1598 }
 0x824   :  { %v1605_v13 = vmul.f32 %v1599_v56, %v4400_v10 }
 0x825   :  { %v1619_v63 = vpop.xlane.xlu0 %1618 }
 0x826   :  { %v1629_v36 = vmul.f32 %v1605_v13, %v1605_v13  ;;  %v1625_v40 = vmul.f32 %v1619_v63, %v4400_v10  ;;  %v1637_v47 = vsub.f32 %v4909_v26, %v1605_v13 }
 0x828   :  { %v1633_v6 = vsub.f32 %v1625_v40, %v1629_v36 }
 0x82a   :  { %v1641_v45 = vadd.f32 1e-06, %v1633_v6 }
 0x82b   :  { %v1602_v3 = vpop.xlane.xlu2 %1601 }
 0x82c   :  { %3939 = vrsqrt.f32 %v1641_v45  ;;  %v1606_v34 = vmul.f32 %v1602_v3, %v4400_v10  ;;  %vm1669_vm9 = vweird.f32 %v1641_v45 }
 0x82d   :  { %v1622_v41 = vpop.xlane.xlu1 %1621 }
 0x82e   :  { %v1630_v0 = vmul.f32 %v1606_v34, %v1606_v34  ;;  %v1626_v43 = vmul.f32 %v1622_v41, %v4400_v10  ;;  %v1638_v31 = vsub.f32 %v4917_v23, %v1606_v34 }
 0x830   :  { %v1634_v39 = vsub.f32 %v1626_v43, %v1630_v0 }
 0x832   :  { %v3940_v61 = vpop.eup %3939  ;;  %v1642_v49 = vadd.f32 1e-06, %v1634_v39 }
 0x833   :  { %v1664_v53 = vmul.f32 %v3940_v61, %v1641_v45  ;;  %vm1670_vm8 = vweird.f32 %v3940_v61 }
 0x834   :  { %3941 = vrsqrt.f32 %v1642_v49  ;;  %vm1671_vm10 = vmor %vm1669_vm9, %vm1670_vm8  ;;  %vm1679_vm12 = vweird.f32 %v1642_v49 }
 0x835   :  { %v1665_v54 = vmul.f32 %v3940_v61, %v1664_v53 }
 0x837   :  { %v1666_v50 = vmul.f32 0.5, %v1665_v54  ;;  %v1820_v54 = vperm.slane %v4967_v46, 4 }
 0x839   :  { %v1667_v37 = vsub.f32 1.5, %v1666_v50 }
 0x83a   :  { %v3942_v9 = vpop.eup %3941 }
 0x83b   :  { %v1668_v62 = vmul.f32 %v3940_v61, %v1667_v37  ;;  %v1674_v55 = vmul.f32 %v3942_v9, %v1642_v49  ;;  %vm1680_vm11 = vweird.f32 %v3942_v9 }
 0x83c   :  { %vm1681_vm13 = vmor %vm1679_vm12, %vm1680_vm11 }
 0x83d   :  { %v1675_v28 = vmul.f32 %v3942_v9, %v1674_v55  ;;  %v1672_v32 = vsel %vm1671_vm10, %v3940_v61, %v1668_v62 }
 0x83e   :  { %v1685_v38 = vmul.f32 %v1672_v32, %v1637_v47 }
 0x83f   :  { %v1676_v48 = vmul.f32 0.5, %v1675_v28 }
 0x840   :  { %v1690_v1 = vmul.f32 %v1687_v20, %v1685_v38 }
 0x841   :  { %v1677_v58 = vsub.f32 1.5, %v1676_v48 }
 0x842   :  { %v1695_v60 = vadd.f32 %v1692_v33, %v1690_v1 }
 0x843   :  { %v1678_v59 = vmul.f32 %v3942_v9, %v1677_v58 }
 0x845   :  { %v1682_v44 = vsel %vm1681_vm13, %v3942_v9, %v1678_v59 }
 0x846   :  { %v1686_v42 = vmul.f32 %v1682_v44, %v1638_v31 }
 0x848   :  { %v1691_v57 = vmul.f32 %v1687_v20, %v1686_v42 }
 0x84a   :  { %v1696_v27 = vadd.f32 %v1692_v33, %v1691_v57 }
 0x84c   :  { %v1698_v22 = vpack.c.bf16 %v1696_v27, %v1695_v60 }
 0x84e   :  { %3408 = vmatmul.msk.bf16.gmra.mxu1 %vm186_vm0, %v1698_v22  ;;  %3434 = vmatmul.msk.bf16.gmra.mxu2 %vm186_vm0, %v1698_v22 }
 0x84f   :  { %3460 = vmatmul.msk.bf16.gmra.mxu3 %vm186_vm0, %v1698_v22 }
 0x89c   :  { %v1748_v30 = vpop.f32.mrf.mxu1 }
 0x89d   :  { %v1749_v2 = vadd.f32 %v1748_v30, %v1708_v51 }
 0x89f   :  { %v1864_v25 = vpack.c.bf16 %v1749_v2, %v1749_v2 }
 0x8a1   :  { %v1880_v33 = vunpack.c.l.b16 %v1864_v25 }
 0x8a2   :  { %v1801_v21 = vpop.f32.mrf.mxu2 }
 0x8a3   :  { %v1802_v20 = vadd.f32 %v1801_v21, %v1767_v29  ;;  %v1854_v43 = vpop.f32.mrf.mxu3 }
 0x8a4   :  { %v1750_v35 = vpop.f32.mrf.mxu1  ;;  %v1855_v47 = vadd.f32 %v1854_v43, %v1820_v54 }
 0x8a5   :  { %v1751_v56 = vadd.f32 %v1750_v35, %v1708_v51  ;;  %v1868_v40 = vpack.c.bf16 %v1802_v20, %v1802_v20 }
 0x8a6   :  { %v1872_v60 = vpack.c.bf16 %v1855_v47, %v1855_v47  ;;  %v5026_v47 = vld [vmem:[#allocation5] sm:$0xff] }
 0x8a7   :  { %v1865_v13 = vpack.c.bf16 %v1751_v56, %v1751_v56  ;;  %v1890_v34 = vunpack.c.l.b16 %v1868_v40 }
 0x8a8   :  { %v1977_v25 = vunpack.c.l.b16 %v1872_v60 }
 0x8a9   :  { %v1881_v63 = vunpack.c.l.b16 %v1865_v13 }
 0x8aa   :  { %v1803_v36 = vpop.f32.mrf.mxu2 }
 0x8ab   :  { %v1884_v6 = vpack.c.b16 %v1881_v63, %v1880_v33  ;;  %v1804_v45 = vadd.f32 %v1803_v36, %v1767_v29  ;;  %v1856_v39 = vpop.f32.mrf.mxu3 }
 0x8ac   :  { %v1857_v9 = vadd.f32 %v1856_v39, %v1820_v54 }
 0x8ad   :  { %v1869_v3 = vpack.c.bf16 %v1804_v45, %v1804_v45  ;;  %2010 = vrot.lane.b32.xlu1 %v1884_v6, %s4209_s14 }
 0x8ae   :  { %v1873_v31 = vpack.c.bf16 %v1857_v9, %v1857_v9 }
 0x8af   :  { %v1891_v41 = vunpack.c.l.b16 %v1869_v3 }
 0x8b0   :  { %v1978_v2 = vunpack.c.l.b16 %v1873_v31  ;;  %v4041_v31 = vld [vmem:[#allocation5 + $0x8] sm:$0xff] }
 0x8b1   :  { %v1894_v0 = vpack.c.b16 %v1891_v41, %v1890_v34 }
 0x8b3   :  { %2014 = vrot.lane.b32.xlu0 %v1894_v0, %s4209_s14  ;;  %v1903_v63 = vsel %vm537_vm14, %v1894_v0, 0 }
 0x8cb   :  { %v1753_v61 = vpop.f32.mrf.mxu1 }
 0x8cc   :  { %v1754_v27 = vadd.f32 %v1753_v61, %v1708_v51 }
 0x8ce   :  { %v1866_v56 = vpack.c.bf16 %v1754_v27, %v1754_v27 }
 0x8d0   :  { %v1882_v13 = vunpack.c.l.b16 %v1866_v56 }
 0x8d1   :  { %v1806_v49 = vpop.f32.mrf.mxu2 }
 0x8d2   :  { %v1859_v53 = vpop.f32.mrf.mxu3  ;;  %v1807_v50 = vadd.f32 %v1806_v49, %v1767_v29 }
 0x8d3   :  { %v1860_v37 = vadd.f32 %v1859_v53, %v1820_v54  ;;  %v1755_v28 = vpop.f32.mrf.mxu1 }
 0x8d4   :  { %v1870_v55 = vpack.c.bf16 %v1807_v50, %v1807_v50  ;;  %v1756_v44 = vadd.f32 %v1755_v28, %v1708_v51  ;;  %v4997_v51 = vpack.c.b16 %v1978_v2, %v1977_v25 }
 0x8d5   :  { %v1874_v58 = vpack.c.bf16 %v1860_v37, %v1860_v37 }
 0x8d6   :  { %v1892_v1 = vunpack.c.l.b16 %v1870_v55  ;;  %v1867_v21 = vpack.c.bf16 %v1756_v44, %v1756_v44 }
 0x8d7   :  { %v1979_v46 = vunpack.c.l.b16 %v1874_v58 }
 0x8d8   :  { %v1883_v20 = vunpack.c.l.b16 %v1867_v21 }
 0x8d9   :  { %v1808_v62 = vpop.f32.mrf.mxu2 }
 0x8da   :  { %v1809_v32 = vadd.f32 %v1808_v62, %v1767_v29  ;;  %v1861_v48 = vpop.f32.mrf.mxu3  ;;  %v1885_v33 = vpack.c.b16 %v1883_v20, %v1882_v13 }
 0x8db   :  { %v1862_v38 = vadd.f32 %v1861_v48, %v1820_v54 }
 0x8dc   :  { %v1871_v59 = vpack.c.bf16 %v1809_v32, %v1809_v32 }
 0x8dd   :  { %v1875_v42 = vpack.c.bf16 %v1862_v38, %v1862_v38 }
 0x8de   :  { %v1893_v57 = vunpack.c.l.b16 %v1871_v59 }
 0x8df   :  { %v1980_v22 = vunpack.c.l.b16 %v1875_v42 }
 0x8e0   :  { %v1895_v30 = vpack.c.b16 %v1893_v57, %v1892_v1  ;;  %v5033_v57 = vld [vmem:[#allocation5 + $0x10] sm:$0xff] }
 0x8e1   :  { %v4990_v35 = vpack.c.b16 %v1980_v22, %v1979_v46  ;;  %v5037_v22 = vld [vmem:[#allocation5 + $0x18] sm:$0xff] }
 0x8e2   :  { %2132 = vrot.lane.b32.xlu1 %v1895_v30, %s4210_s15  ;;  %2248 = vrot.lane.b32.xlu0 %v1895_v30, %s4211_s1  ;;  %v1906_v29 = vsel %vm537_vm14, %v1895_v30, 0 }
 0x8e3   :  { %1997 = vmatpush.bf16.msrb.mxu1 %v4990_v35  ;;  %2016 = vrot.lane.b32.xlu2 %v1895_v30, %s4209_s14 }
 0x8e4   :  { %1914 = vmatpush.bf16.xpose.msrb.mxu0 %v1906_v29 }
 0x8e7   :  { %1998 = vmatpush.bf16.msrb.mxu1 %v4997_v51 }
 0x8ea   :  { %2126 = vrot.lane.b32.xlu1 %v1884_v6, %s4210_s15  ;;  %2242 = vrot.lane.b32.xlu0 %v1884_v6, %s4211_s1 }
 0x8eb   :  { %2012 = vrot.lane.b32.xlu2 %v1885_v33, %s4209_s14 }
 0x8ec   :  { %1915 = vmatpush.bf16.xpose.msrb.mxu0 %v1903_v63 }
 0x8f2   :  { %2095 = vrot.lane.b32.xlu1 %v4997_v51, %s4209_s14  ;;  %2244 = vrot.lane.b32.xlu0 %v1885_v33, %s4211_s1 }
 0x8f3   :  { %3461 = vmatmul.msk.bf16.vlgmr.msrb.gmra.mxu0 %vm537_vm14, %v1884_v6  ;;  %2246 = vrot.lane.b32.xlu2 %v1894_v0, %s4211_s1 }
 0x8fa   :  { %2329 = vrot.lane.b32.xlu0 %v4990_v35, %s4211_s1 }
 0x8fb   :  { %2130 = vrot.lane.b32.xlu2 %v1894_v0, %s4210_s15 }
 0x903   :  { %2128 = vrot.lane.b32.xlu2 %v1885_v33, %s4210_s15  ;;  %3462 = vmatmul.msk.bf16.gmra.mxu0 %vm537_vm14, %v1885_v33 }
 0x90b   :  { %2097 = vrot.lane.b32.xlu2 %v4990_v35, %s4209_s14 }
 0x91f   :  { %v2011_v34 = vpop.permute.xlu1 %2010 }
 0x925   :  { %v2015_v45 = vpop.permute.xlu0 %2014 }
 0x926   :  { %v2025_v3 = vsel %vm537_vm14, %v2015_v45, 0 }
 0x93d   :  { %v2017_v36 = vpop.permute.xlu2 %2016 }
 0x93e   :  { %v2028_v40 = vsel %vm537_vm14, %v2017_v36, 0 }
 0x93f   :  { %2036 = vmatpush.bf16.xpose.msra.mxu2 %v2028_v40 }
 0x945   :  { %v2013_v6 = vpop.permute.xlu2 %2012 }
 0x947   :  { %2037 = vmatpush.bf16.xpose.msra.mxu2 %v2025_v3 }
 0x94d   :  { %v2247_v41 = vpop.permute.xlu2 %2246 }
 0x94e   :  { %3465 = vmatmul.msk.bf16.vlgmr.msra.gmra.mxu2 %vm537_vm14, %v2011_v34  ;;  %v2257_v37 = vsel %vm537_vm14, %v2247_v41, 0 }
 0x954   :  { %v2133_v0 = vpop.permute.xlu1 %2132  ;;  %v2249_v43 = vpop.permute.xlu0 %2248 }
 0x955   :  { %v2144_v39 = vsel %vm537_vm14, %v2133_v0, 0  ;;  %v2131_v61 = vpop.permute.xlu2 %2130  ;;  %v2260_v49 = vsel %vm537_vm14, %v2249_v43, 0 }
 0x956   :  { %2152 = vmatpush.bf16.xpose.msra.mxu0 %v2144_v39  ;;  %2268 = vmatpush.bf16.xpose.msrb.mxu2 %v2260_v49  ;;  %v2141_v54 = vsel %vm537_vm14, %v2131_v61, 0 }
 0x95c   :  { %v2243_v53 = vpop.permute.xlu0 %2242  ;;  %v2127_v9 = vpop.permute.xlu1 %2126 }
 0x95d   :  { %v2129_v50 = vpop.permute.xlu2 %2128 }
 0x95e   :  { %3466 = vmatmul.msk.bf16.gmra.mxu2 %vm537_vm14, %v2013_v6  ;;  %2153 = vmatpush.bf16.xpose.msra.mxu0 %v2141_v54 }
 0x95f   :  { %2269 = vmatpush.bf16.xpose.msrb.mxu2 %v2257_v37 }
 0x964   :  { %v2245_v62 = vpop.permute.xlu0 %2244  ;;  %v2096_v28 = vpop.permute.xlu1 %2095 }
 0x965   :  { %v2098_v55 = vpop.permute.xlu2 %2097  ;;  %3469 = vmatmul.msk.bf16.vlgmr.msra.gmra.mxu0 %vm537_vm14, %v2127_v9 }
 0x966   :  { %2113 = vmatpush.bf16.msra.mxu3 %v2098_v55 }
 0x96a   :  { %2114 = vmatpush.bf16.msra.mxu3 %v2096_v28 }
 0x96c   :  { %v2330_v32 = vpop.permute.xlu0 %2329 }
 0x96e   :  { %2345 = vmatpush.bf16.msrb.mxu3 %v2330_v32  ;;  %3473 = vmatmul.msk.bf16.vlgmr.msrb.gmra.mxu2 %vm537_vm14, %v2243_v53 }
 0x970   :  { %v1917_v48 = vpop.f32.mrf.mxu0 }
 0x971   :  { %v1918_v58 = vadd.f32 %v5026_v47, %v1917_v48 }
 0x973   :  { %v1927_v38 = vsel %vm569_vm15, %v1918_v58, -inf }
 0x974   :  { %1928 = vmax.xlane.f32.xlu2 %v1927_v38 }
 0x975   :  { %3470 = vmatmul.msk.bf16.gmra.mxu0 %vm537_vm14, %v2129_v50 }
 0x978   :  { %v1919_v59 = vpop.f32.mrf.mxu0 }
 0x979   :  { %v1920_v44 = vadd.f32 %v4041_v31, %v1919_v59 }
 0x97b   :  { %v1930_v42 = vsel %vm569_vm15, %v1920_v44, -inf }
 0x97c   :  { %1931 = vmax.xlane.f32.xlu1 %v1930_v42 }
 0x97e   :  { %3474 = vmatmul.msk.bf16.gmra.mxu2 %vm537_vm14, %v2245_v62 }
 0x980   :  { %v1922_v1 = vpop.f32.mrf.mxu0 }
 0x981   :  { %v1923_v60 = vadd.f32 %v5033_v57, %v1922_v1 }
 0x983   :  { %v1933_v27 = vsel %vm569_vm15, %v1923_v60, -inf }
 0x984   :  { %1934 = vmax.xlane.f32.xlu1 %v1933_v27 }
 0x988   :  { %v1924_v46 = vpop.f32.mrf.mxu0 }
 0x989   :  { %v1925_v30 = vadd.f32 %v5037_v22, %v1924_v46 }
 0x98b   :  { %v1936_v2 = vsel %vm569_vm15, %v1925_v30, -inf }
 0x98c   :  { %1937 = vmax.xlane.f32.xlu0 %v1936_v2 }
 0x9d1   :  { %v2039_v21 = vpop.f32.mrf.mxu2 }
 0x9d2   :  { %v5042_v29 = vadd.f32 %v5026_v47, %v2039_v21 }
 0x9d4   :  { %v2049_v25 = vsel %vm569_vm15, %v5042_v29, -inf }
 0x9d5   :  { %2050 = vmax.xlane.f32.xlu1 %v2049_v25 }
 0x9d9   :  { %v2041_v56 = vpop.f32.mrf.mxu2 }
 0x9da   :  { %v5051_v45 = vadd.f32 %v4041_v31, %v2041_v56 }
 0x9dc   :  { %v2052_v43 = vsel %vm569_vm15, %v5051_v45, -inf }
 0x9e1   :  { %v2044_v20 = vpop.f32.mrf.mxu2 }
 0x9e2   :  { %v2155_v13 = vpop.f32.mrf.mxu0 }
 0x9e3   :  { %v5047_v33 = vadd.f32 %v5026_v47, %v2155_v13 }
 0x9e5   :  { %v2165_v63 = vsel %vm569_vm15, %v5047_v33, -inf }
 0x9e6   :  { %2166 = vmax.xlane.f32.xlu0 %v2165_v63 }
 0x9e7   :  { %v1929_v36 = vpop.xlane.xlu2 %1928 }
 0x9e8   :  { %v1939_v40 = vsub.f32 %v1918_v58, %v1929_v36 }
 0x9e9   :  { %v2046_v6 = vpop.f32.mrf.mxu2 }
 0x9ea   :  { %v1943_v3 = vmul.f32 1.442695, %v1939_v40  ;;  %v2157_v34 = vpop.f32.mrf.mxu0  ;;  %v5085_v2 = vadd.f32 %v5037_v22, %v2046_v6 }
 0x9eb   :  { %v5053_v41 = vadd.f32 %v4041_v31, %v2157_v34 }
 0x9ec   :  { %3943 = vpow2.f32 %v1943_v3 }
 0x9ed   :  { %v2168_v0 = vsel %vm569_vm15, %v5053_v41, -inf }
 0x9ee   :  { %2169 = vmax.xlane.f32.xlu2 %v2168_v0  ;;  %2053 = vmax.xlane.f32.xlu0 %v2052_v43 }
 0x9ef   :  { %v1932_v39 = vpop.xlane.xlu1 %1931 }
 0x9f0   :  { %v1940_v61 = vsub.f32 %v1920_v44, %v1932_v39 }
 0x9f1   :  { %v2271_v49 = vpop.f32.mrf.mxu2 }
 0x9f2   :  { %v5059_v53 = vpop.eup %3943  ;;  %v1945_v54 = vmul.f32 1.442695, %v1940_v61  ;;  %v2160_v50 = vpop.f32.mrf.mxu0  ;;  %v5105_v3 = vadd.f32 %v5026_v47, %v2271_v49 }
 0x9f3   :  { %v5062_v37 = vadd.f32 %v5033_v57, %v2160_v50  ;;  %v1951_v9 = vsel %vm569_vm15, %v5059_v53, 0.0 }
 0x9f4   :  { %3945 = vpow2.f32 %v1945_v54  ;;  %1952 = vadd.xlane.f32.xlu1 %v1951_v9  ;;  %v2281_v43 = vsel %vm569_vm15, %v5105_v3, -inf }
 0x9f5   :  { %v2171_v62 = vsel %vm569_vm15, %v5062_v37, -inf }
 0x9f6   :  { %2172 = vmax.xlane.f32.xlu0 %v2171_v62 }
 0x9f7   :  { %v1935_v55 = vpop.xlane.xlu1 %1934 }
 0x9f8   :  { %v1941_v38 = vsub.f32 %v1923_v60, %v1935_v55  ;;  %v5082_v60 = vadd.f32 %v5033_v57, %v2044_v20 }
 0x9f9   :  { %v2273_v28 = vpop.f32.mrf.mxu2 }
 0x9fa   :  { %v5068_v32 = vpop.eup %3945  ;;  %v5070_v48 = vadd.f32 %v4041_v31, %v2273_v28  ;;  %v2162_v58 = vpop.f32.mrf.mxu0  ;;  %v1947_v27 = vmul.f32 1.442695, %v1941_v38  ;;  %v2055_v20 = vsel %vm569_vm15, %v5082_v60, -inf }
 0x9fb   :  { %v5073_v59 = vadd.f32 %v5037_v22, %v2162_v58  ;;  %v1954_v1 = vsel %vm569_vm15, %v5068_v32, 0.0 }
 0x9fc   :  { %v2284_v44 = vsel %vm569_vm15, %v5070_v48, -inf  ;;  %3947 = vpow2.f32 %v1947_v27 }
 0x9fd   :  { %2285 = vmax.xlane.f32.xlu1 %v2284_v44  ;;  %v2174_v42 = vsel %vm569_vm15, %v5073_v59, -inf }
 0x9fe   :  { %2175 = vmax.xlane.f32.xlu2 %v2174_v42  ;;  %1955 = vadd.xlane.f32.xlu0 %v1954_v1 }
 0x9ff   :  { %v1938_v31 = vpop.xlane.xlu0 %1937 }
 0xa00   :  { %v1942_v46 = vsub.f32 %v1925_v30, %v1938_v31  ;;  %v2058_v30 = vsel %vm569_vm15, %v5085_v2, -inf }
 0xa01   :  { %v2276_v21 = vpop.f32.mrf.mxu2 }
 0xa02   :  { %v1949_v25 = vmul.f32 1.442695, %v1942_v46  ;;  %v5088_v56 = vadd.f32 %v5033_v57, %v2276_v21  ;;  %v5096_v63 = vpop.eup %3947 }
 0xa03   :  { %v1957_v57 = vsel %vm569_vm15, %v5096_v63, 0.0 }
 0xa04   :  { %3949 = vpow2.f32 %v1949_v25  ;;  %v2287_v13 = vsel %vm569_vm15, %v5088_v56, -inf }
 0xa05   :  { %2288 = vmax.xlane.f32.xlu1 %v2287_v13 }
 0xa06   :  { %2059 = vmax.xlane.f32.xlu2 %v2058_v30  ;;  %2056 = vmax.xlane.f32.xlu0 %v2055_v20 }
 0xa09   :  { %v2278_v6 = vpop.f32.mrf.mxu2 }
 0xa0a   :  { %v5098_v36 = vpop.eup %3949  ;;  %v5108_v34 = vadd.f32 %v5037_v22, %v2278_v6 }
 0xa0b   :  { %v1960_v40 = vsel %vm569_vm15, %v5098_v36, 0.0 }
 0xa0c   :  { %v2290_v0 = vsel %vm569_vm15, %v5108_v34, -inf }
 0xa0e   :  { %1958 = vadd.xlane.f32.xlu0 %v1957_v57  ;;  %1961 = vadd.xlane.f32.xlu2 %v1960_v40 }
 0xa16   :  { %2291 = vmax.xlane.f32.xlu0 %v2290_v0  ;;  %2282 = vmax.xlane.f32.xlu2 %v2281_v43 }
 0xa48   :  { %v2051_v39 = vpop.xlane.xlu1 %2050 }
 0xa49   :  { %v2061_v61 = vsub.f32 %v5042_v29, %v2051_v39 }
 0xa4b   :  { %v2065_v54 = vmul.f32 1.442695, %v2061_v61 }
 0xa4d   :  { %3951 = vpow2.f32 %v2065_v54 }
 0xa53   :  { %v5115_v50 = vpop.eup %3951 }
 0xa54   :  { %v2073_v47 = vsel %vm569_vm15, %v5115_v50, 0.0 }
 0xa55   :  { %2074 = vadd.xlane.f32.xlu2 %v2073_v47 }
 0xa59   :  { %v2167_v22 = vpop.xlane.xlu0 %2166 }
 0xa5a   :  { %v2177_v49 = vsub.f32 %v5047_v33, %v2167_v22 }
 0xa5c   :  { %v2181_v9 = vmul.f32 1.442695, %v2177_v49 }
 0xa5e   :  { %3953 = vpow2.f32 %v2181_v9 }
 0xa61   :  { %v2170_v62 = vpop.xlane.xlu2 %2169  ;;  %v2054_v55 = vpop.xlane.xlu0 %2053 }
 0xa62   :  { %v2178_v28 = vsub.f32 %v5053_v41, %v2170_v62  ;;  %v2062_v58 = vsub.f32 %v5051_v45, %v2054_v55 }
 0xa64   :  { %v5122_v29 = vpop.eup %3953  ;;  %v2183_v38 = vmul.f32 1.442695, %v2178_v28  ;;  %v2067_v44 = vmul.f32 1.442695, %v2062_v58 }
 0xa65   :  { %v2189_v42 = vsel %vm569_vm15, %v5122_v29, 0.0 }
 0xa66   :  { %3955 = vpow2.f32 %v2183_v38  ;;  %2190 = vadd.xlane.f32.xlu0 %v2189_v42 }
 0xa67   :  { %3957 = vpow2.f32 %v2067_v44  ;;  %v1953_v1 = vpop.xlane.xlu1 %1952 }
 0xa68   :  { %3959 = vrcp.f32 %v1953_v1 }
 0xa69   :  { %v5126_v33 = vpop.xlane.xlu0 %2172 }
 0xa6c   :  { %v5128_v27 = vpop.eup %3955 }
 0xa6d   :  { %v5130_v31 = vpop.eup %3957  ;;  %2327 = vrot.lane.b32.xlu2 %v4997_v51, %s4211_s1  ;;  %v2192_v45 = vsel %vm569_vm15, %v5128_v27, 0.0 }
 0xa6e   :  { %2193 = vadd.xlane.f32.xlu0 %v2192_v45  ;;  %v2076_v41 = vsel %vm569_vm15, %v5130_v31, 0.0  ;;  %v3960_v20 = vpop.eup %3959 }
 0xa6f   :  { %2077 = vadd.xlane.f32.xlu1 %v2076_v41  ;;  %v1967_v40 = vmul.f32 %v3960_v20, %v5059_v53 }
 0xa70   :  { %v2286_v46 = vpop.xlane.xlu1 %2285 }
 0xa71   :  { %v2294_v21 = vsub.f32 %v5070_v48, %v2286_v46  ;;  %v5139_v25 = vpop.xlane.xlu2 %2175  ;;  %v1956_v13 = vpop.xlane.xlu0 %1955 }
 0xa72   :  { %3961 = vrcp.f32 %v1956_v13 }
 0xa73   :  { %v2299_v30 = vmul.f32 1.442695, %v2294_v21 }
 0xa75   :  { %3963 = vpow2.f32 %v2299_v30 }
 0xa78   :  { %v3962_v57 = vpop.eup %3961 }
 0xa79   :  { %v1968_v6 = vmul.f32 %v3962_v57, %v5068_v32  ;;  %v2060_v0 = vpop.xlane.xlu2 %2059  ;;  %v2057_v43 = vpop.xlane.xlu0 %2056 }
 0xa7a   :  { %v2063_v39 = vsub.f32 %v5082_v60, %v2057_v43  ;;  %v2064_v22 = vsub.f32 %v5085_v2, %v2060_v0  ;;  %v2180_v43 = vsub.f32 %v5073_v59, %v5139_v25 }
 0xa7b   :  { %v5144_v61 = vpop.eup %3963  ;;  %v1971_v54 = vpack.c.bf16 %v1968_v6, %v1967_v40  ;;  %v2289_v40 = vpop.xlane.xlu1 %2288 }
 0xa7c   :  { %v2069_v48 = vmul.f32 1.442695, %v2063_v39  ;;  %v2308_v47 = vsel %vm569_vm15, %v5144_v61, 0.0  ;;  %v2071_v53 = vmul.f32 1.442695, %v2064_v22 }
 0xa7d   :  { %2309 = vadd.xlane.f32.xlu1 %v2308_v47  ;;  %3463 = vmatmul.msk.bf16.vlgmr.msrb.gmra.mxu1 %vm569_vm15, %v1971_v54 }
 0xa7e   :  { %3965 = vpow2.f32 %v2069_v48 }
 0xa81   :  { %v1962_v49 = vpop.xlane.xlu2 %1961  ;;  %v1959_v32 = vpop.xlane.xlu0 %1958 }
 0xa82   :  { %3967 = vrcp.f32 %v1962_v49 }
 0xa83   :  { %3969 = vrcp.f32 %v1959_v32 }
 0xa84   :  { %v5150_v9 = vpop.eup %3965  ;;  %3971 = vpow2.f32 %v2071_v53 }
 0xa85   :  { %v2079_v60 = vsel %vm569_vm15, %v5150_v9, 0.0 }
 0xa86   :  { %2080 = vadd.xlane.f32.xlu0 %v2079_v60 }
 0xa88   :  { %v3968_v62 = vpop.eup %3967 }
 0xa89   :  { %v3970_v55 = vpop.eup %3969  ;;  %v2283_v28 = vpop.xlane.xlu2 %2282  ;;  %v1970_v58 = vmul.f32 %v3968_v62, %v5098_v36 }
 0xa8a   :  { %v2292_v2 = vpop.xlane.xlu0 %2291  ;;  %v2293_v38 = vsub.f32 %v5105_v3, %v2283_v28  ;;  %v1969_v42 = vmul.f32 %v3970_v55, %v5096_v63  ;;  %v3972_v1 = vpop.eup %3971  ;;  %v2179_v3 = vsub.f32 %v5062_v37, %v5126_v33 }
 0xa8b   :  { %v2296_v44 = vsub.f32 %v5108_v34, %v2292_v2  ;;  %v2082_v21 = vsel %vm569_vm15, %v3972_v1, 0.0 }
 0xa8c   :  { %v2297_v45 = vmul.f32 1.442695, %v2293_v38  ;;  %v1972_v46 = vpack.c.bf16 %v1970_v58, %v1969_v42  ;;  %v2185_v34 = vmul.f32 1.442695, %v2179_v3 }
 0xa8d   :  { %v2303_v41 = vmul.f32 1.442695, %v2296_v44 }
 0xa8e   :  { %3973 = vpow2.f32 %v2297_v45  ;;  %3464 = vmatmul.msk.bf16.gmra.mxu1 %vm569_vm15, %v1972_v46  ;;  %2083 = vadd.xlane.f32.xlu0 %v2082_v21 }
 0xa8f   :  { %3975 = vpow2.f32 %v2303_v41 }
 0xa90   :  { %3977 = vpow2.f32 %v2185_v34 }
 0xa94   :  { %v3974_v13 = vpop.eup %3973 }
 0xa95   :  { %v5160_v30 = vpop.eup %3975  ;;  %v2305_v36 = vsel %vm569_vm15, %v3974_v13, 0.0 }
 0xa96   :  { %2213 = vrot.lane.b32.xlu1 %v4990_v35, %s4210_s15  ;;  %v2314_v63 = vsel %vm569_vm15, %v5160_v30, 0.0  ;;  %2306 = vadd.xlane.f32.xlu0 %v2305_v36  ;;  %v5171_v20 = vpop.eup %3977  ;;  %v2295_v35 = vsub.f32 %v5088_v56, %v2289_v40 }
 0xa97   :  { %2315 = vadd.xlane.f32.xlu2 %v2314_v63  ;;  %v2195_v57 = vsel %vm569_vm15, %v5171_v20, 0.0 }
 0xa98   :  { %v2301_v6 = vmul.f32 1.442695, %v2295_v35 }
 0xa9a   :  { %3979 = vpow2.f32 %v2301_v6 }
 0xaa0   :  { %v3980_v37 = vpop.eup %3979 }
 0xaa1   :  { %v2311_v33 = vsel %vm569_vm15, %v3980_v37, 0.0 }
 0xaaa   :  { %2211 = vrot.lane.b32.xlu0 %v4997_v51, %s4210_s15  ;;  %v2187_v51 = vmul.f32 1.442695, %v2180_v43 }
 0xaac   :  { %3981 = vpow2.f32 %v2187_v51 }
 0xab2   :  { %v5179_v54 = vpop.eup %3981 }
 0xab3   :  { %v2198_v48 = vsel %vm569_vm15, %v5179_v54, 0.0 }
 0xac0   :  { %2196 = vadd.xlane.f32.xlu1 %v2195_v57 }
 0xac8   :  { %v2075_v0 = vpop.xlane.xlu2 %2074 }
 0xac9   :  { %3983 = vrcp.f32 %v2075_v0 }
 0xacf   :  { %v3984_v47 = vpop.eup %3983 }
 0xad0   :  { %v2328_v39 = vpop.permute.xlu2 %2327  ;;  %v2089_v22 = vmul.f32 %v3984_v47, %v5115_v50 }
 0xad1   :  { %2346 = vmatpush.bf16.msrb.mxu3 %v2328_v39 }
 0xad4   :  { %2312 = vadd.xlane.f32.xlu0 %v2311_v33 }
 0xad9   :  { %v2191_v59 = vpop.xlane.xlu0 %2190 }
 0xadc   :  { %2199 = vadd.xlane.f32.xlu0 %v2198_v48 }
 0xae1   :  { %v2194_v32 = vpop.xlane.xlu0 %2193 }
 0xae2   :  { %v2078_v56 = vpop.xlane.xlu1 %2077 }
 0xae3   :  { %3985 = vrcp.f32 %v2078_v56 }
 0xae9   :  { %v3986_v25 = vpop.eup %3985 }
 0xaea   :  { %v2090_v53 = vmul.f32 %v3986_v25, %v5130_v31 }
 0xaec   :  { %v2093_v49 = vpack.c.bf16 %v2090_v53, %v2089_v22 }
 0xaee   :  { %3467 = vmatmul.msk.bf16.vlgmr.msra.gmra.mxu3 %vm569_vm15, %v2093_v49 }
 0xaf0   :  { %v2310_v62 = vpop.xlane.xlu1 %2309 }
 0xaf9   :  { %v2081_v60 = vpop.xlane.xlu0 %2080 }
 0xafa   :  { %3987 = vrcp.f32 %v2081_v60  ;;  %v2000_v47 = vpop.f32.mrf.mxu1 }
 0xb00   :  { %v3988_v28 = vpop.eup %3987 }
 0xb01   :  { %v2084_v55 = vpop.xlane.xlu0 %2083  ;;  %v2091_v38 = vmul.f32 %v3988_v28, %v5150_v9 }
 0xb02   :  { %3989 = vrcp.f32 %v2084_v55 }
 0xb08   :  { %v2214_v2 = vpop.permute.xlu1 %2213  ;;  %v3990_v58 = vpop.eup %3989 }
 0xb09   :  { %2229 = vmatpush.bf16.msra.mxu1 %v2214_v2  ;;  %v2092_v44 = vmul.f32 %v3990_v58, %v3972_v1  ;;  %v2307_v42 = vpop.xlane.xlu0 %2306 }
 0xb0a   :  { %3991 = vrcp.f32 %v2307_v42  ;;  %v2316_v57 = vpop.xlane.xlu2 %2315 }
 0xb0b   :  { %v2094_v50 = vpack.c.bf16 %v2092_v44, %v2091_v38  ;;  %3993 = vrcp.f32 %v2310_v62 }
 0xb0c   :  { %3995 = vrcp.f32 %v2194_v32 }
 0xb0d   :  { %3468 = vmatmul.msk.bf16.gmra.mxu3 %vm569_vm15, %v2094_v50  ;;  %3997 = vrcp.f32 %v2191_v59 }
 0xb0e   :  { %3999 = vrcp.f32 %v2316_v57 }
 0xb10   :  { %v3992_v31 = vpop.eup %3991 }
 0xb11   :  { %v3994_v45 = vpop.eup %3993  ;;  %v2321_v46 = vmul.f32 %v3992_v31, %v3974_v13  ;;  %v3721_v31 = vld [vmem:[%s5479_s5 + $0xf8] sm:$0xff] }
 0xb12   :  { %v3996_v41 = vpop.eup %3995  ;;  %v2322_v36 = vmul.f32 %v3994_v45, %v5144_v61  ;;  %2463 = vmatpush.bf16.msrb.mxu0 %v3721_v31  ;;  %v3720_v45 = vld [vmem:[%s5479_s5 + $0xf0] sm:$0xff] }
 0xb13   :  { %v3998_v21 = vpop.eup %3997  ;;  %v2206_v63 = vmul.f32 %v3996_v41, %v5128_v27  ;;  %v3719_v41 = vld [vmem:[%s5479_s5 + $0xe8] sm:$0xff] }
 0xb14   :  { %v2325_v3 = vpack.c.bf16 %v2322_v36, %v2321_v46  ;;  %v2205_v9 = vmul.f32 %v3998_v21, %v5122_v29  ;;  %v4000_v35 = vpop.eup %3999  ;;  %v3718_v46 = vld [vmem:[%s5479_s5 + $0xe0] sm:$0xff] }
 0xb15   :  { %v2324_v27 = vmul.f32 %v4000_v35, %v5160_v30  ;;  %v2002_v30 = vpop.f32.mrf.mxu1 }
 0xb16   :  { %v2209_v34 = vpack.c.bf16 %v2206_v63, %v2205_v9  ;;  %2464 = vmatpush.bf16.msrb.mxu0 %v3720_v45 }
 0xb1a   :  { %2465 = vmatpush.bf16.msrb.mxu0 %v3719_v41 }
 0xb1c   :  { %v2212_v1 = vpop.permute.xlu0 %2211 }
 0xb1d   :  { %2230 = vmatpush.bf16.msra.mxu1 %v2212_v1  ;;  %3475 = vmatmul.msk.bf16.vlgmr.msrb.gmra.mxu3 %vm569_vm15, %v2325_v3 }
 0xb1e   :  { %2466 = vmatpush.bf16.msrb.mxu0 %v3718_v46 }
 0xb20   :  { %3471 = vmatmul.msk.bf16.vlgmr.msra.gmra.mxu1 %vm569_vm15, %v2209_v34 }
 0xb33   :  { %v2197_v13 = vpop.xlane.xlu1 %2196 }
 0xb47   :  { %v2313_v40 = vpop.xlane.xlu0 %2312 }
 0xb48   :  { %4001 = vrcp.f32 %v2313_v40 }
 0xb49   :  { %4003 = vrcp.f32 %v2197_v13 }
 0xb4e   :  { %v4002_v6 = vpop.eup %4001 }
 0xb4f   :  { %v2323_v61 = vmul.f32 %v4002_v6, %v3980_v37  ;;  %v2200_v0 = vpop.xlane.xlu0 %2199  ;;  %v4004_v43 = vpop.eup %4003 }
 0xb50   :  { %4005 = vrcp.f32 %v2200_v0  ;;  %v2207_v39 = vmul.f32 %v4004_v43, %v5171_v20  ;;  %v2005_v37 = vpop.f32.mrf.mxu1 }
 0xb51   :  { %v2326_v29 = vpack.c.bf16 %v2324_v27, %v2323_v61 }
 0xb53   :  { %3476 = vmatmul.msk.bf16.gmra.mxu3 %vm569_vm15, %v2326_v29 }
 0xb56   :  { %v4006_v51 = vpop.eup %4005 }
 0xb57   :  { %v2208_v33 = vmul.f32 %v4006_v51, %v5179_v54 }
 0xb58   :  { %v2007_v53 = vpop.f32.mrf.mxu1 }
 0xb59   :  { %v2210_v48 = vpack.c.bf16 %v2208_v33, %v2207_v39 }
 0xb5b   :  { %3472 = vmatmul.msk.bf16.gmra.mxu1 %vm569_vm15, %v2210_v48 }
 0xb71   :  { %v2116_v56 = vpop.f32.mrf.mxu3 }
 0xb79   :  { %v2118_v59 = vpop.f32.mrf.mxu3 }
 0xb7a   :  { %v3805_v25 = vpack.i.bf16 %v2118_v59, %v2116_v56 }
 0xb7c   :  { %3806 = vrot.lane.b32.xlu0 %v3805_v25, %s4212_s18 }
 0xb90   :  { %v2121_v22 = vpop.f32.mrf.mxu3 }
 0xb98   :  { %v2123_v49 = vpop.f32.mrf.mxu3 }
 0xb99   :  { %v3820_v32 = vpack.i.bf16 %v2123_v49, %v2121_v22 }
 0xb9b   :  { %3821 = vrot.lane.b32.xlu0 %v3820_v32, %s4212_s18 }
 0xb9d   :  { %v2232_v20 = vpop.f32.mrf.mxu1 }
 0xba0   :  { %v2348_v60 = vpop.f32.mrf.mxu3 }
 0xba5   :  { %v2234_v54 = vpop.f32.mrf.mxu1 }
 0xba6   :  { %v3810_v62 = vpack.i.bf16 %v2234_v54, %v2232_v20 }
 0xba8   :  { %v2350_v55 = vpop.f32.mrf.mxu3  ;;  %3811 = vrot.lane.b32.xlu2 %v3810_v62, %s4214_s10  ;;  %v5233_v62 = vld [vmem:[%s5482_s8 + $0x10] sm:$0xff] }
 0xba9   :  { %v3815_v28 = vpack.i.bf16 %v2350_v55, %v2348_v60 }
 0xbab   :  { %3816 = vrot.lane.b32.xlu1 %v3815_v28, %s4213_s3 }
 0xbd6   :  { %v2353_v2 = vpop.f32.mrf.mxu3 }
 0xbd8   :  { %v2237_v58 = vpop.f32.mrf.mxu1 }
 0xbde   :  { %v2355_v38 = vpop.f32.mrf.mxu3 }
 0xbdf   :  { %v3830_v44 = vpack.i.bf16 %v2355_v38, %v2353_v2 }
 0xbe0   :  { %v2239_v42 = vpop.f32.mrf.mxu1 }
 0xbe1   :  { %v3825_v50 = vpack.i.bf16 %v2239_v42, %v2237_v58  ;;  %3831 = vrot.lane.b32.xlu0 %v3830_v44, %s4213_s3 }
 0xbe3   :  { %3826 = vrot.lane.b32.xlu2 %v3825_v50, %s4214_s10 }
 0xbee   :  { %v3807_v21 = vpop.permute.xlu0 %3806 }
 0xbef   :  { %v3809_v63 = vunpack.i.h.bf16 %v3807_v21  ;;  %v3808_v3 = vunpack.i.l.bf16 %v3807_v21 }
 0xbf1   :  { %v2407_v57 = vsel %vm537_vm14, %v2002_v30, %v3809_v63  ;;  %v2406_v40 = vsel %vm537_vm14, %v2000_v47, %v3808_v3 }
 0xc02   :  { %v3812_v36 = vpop.permute.xlu2 %3811 }
 0xc03   :  { %v3814_v9 = vunpack.i.h.bf16 %v3812_v36  ;;  %v3813_v1 = vunpack.i.l.bf16 %v3812_v36 }
 0xc05   :  { %v2410_v6 = vsel %vm569_vm15, %v2406_v40, %v3813_v1  ;;  %v2411_v27 = vsel %vm569_vm15, %v2407_v57, %v3814_v9  ;;  %v3538_v40 = vld [vmem:[%s5480_s6 + $0x70] sm:$0xf] }
 0xc0d   :  { %v3822_v43 = vpop.permute.xlu0 %3821 }
 0xc0e   :  { %v3824_v39 = vunpack.i.h.bf16 %v3822_v43  ;;  %v3823_v33 = vunpack.i.l.bf16 %v3822_v43 }
 0xc10   :  { %v2409_v59 = vsel %vm537_vm14, %v2007_v53, %v3824_v39  ;;  %v2408_v25 = vsel %vm537_vm14, %v2005_v37, %v3823_v33  ;;  %v2482_v37 = vperm.slane %v5233_v62, 5 }
 0xc1d   :  { %v3817_v34 = vpop.permute.xlu1 %3816 }
 0xc1e   :  { %v3819_v13 = vunpack.i.h.bf16 %v3817_v34  ;;  %v3818_v35 = vunpack.i.l.bf16 %v3817_v34 }
 0xc20   :  { %v2414_v61 = vsel %vm1057_vm1, %v2410_v6, %v3818_v35  ;;  %v2415_v0 = vsel %vm1057_vm1, %v2411_v27, %v3819_v13  ;;  %v3728_v13 = vld [vmem:[%s5480_s6 + $0x74] sm:$0xf]  ;;  %v3540_v6 = vld [vmem:[%s5480_s6 + $0x78] sm:$0xf0] }
 0xc21   :  { %v2418_v29 = vpack.c.bf16 %v2415_v0, %v2414_v61  ;;  %v3543_v27 = vor.u32 %v3728_v13, %v3540_v6  ;;  %v3530_v61 = vld [vmem:[%s5480_s6 + $0x60] sm:$0xf]  ;;  %v3727_v0 = vld [vmem:[%s5480_s6 + $0x64] sm:$0xf0] }
 0xc22   :  { %v3531_v43 = vor.u32 %v3727_v0, %v3530_v61 }
 0xc23   :  { %3501 = vmatmul.msk.bf16.vlgmr.msrb.gmra.mxu0 %vm186_vm0, %v2418_v29  ;;  %2680 = vmatpush.bf16.msra.mxu2 %v3543_v27  ;;  %v3726_v29 = vld [vmem:[%s5480_s6 + $0x64] sm:$0xf]  ;;  %v2583_v27 = vperm.slane %v5233_v62, 6 }
 0xc3d   :  { %v3827_v51 = vpop.permute.xlu2 %3826 }
 0xc3e   :  { %v3829_v48 = vunpack.i.h.bf16 %v3827_v51  ;;  %v3828_v56 = vunpack.i.l.bf16 %v3827_v51  ;;  %v3532_v51 = vld [vmem:[%s5480_s6 + $0x68] sm:$0xf0] }
 0xc3f   :  { %v3535_v33 = vor.u32 %v3726_v29, %v3532_v51  ;;  %v2588_v51 = vperm.slane %v5233_v62, 7 }
 0xc40   :  { %v2412_v49 = vsel %vm569_vm15, %v2408_v25, %v3828_v56  ;;  %v2413_v32 = vsel %vm569_vm15, %v2409_v59, %v3829_v48  ;;  %v3725_v59 = vld [vmem:[%s5480_s6 + $0x54] sm:$0xf0]  ;;  %v3724_v25 = vld [vmem:[%s5480_s6 + $0x54] sm:$0xf] }
 0xc41   :  { %2681 = vmatpush.bf16.msra.mxu2 %v3535_v33 }
 0xc53   :  { %v3832_v47 = vpop.permute.xlu0 %3831 }
 0xc54   :  { %v3834_v30 = vunpack.i.h.bf16 %v3832_v47  ;;  %v3833_v22 = vunpack.i.l.bf16 %v3832_v47  ;;  %v3522_v47 = vld [vmem:[%s5480_s6 + $0x50] sm:$0xf] }
 0xc56   :  { %v2416_v20 = vsel %vm1057_vm1, %v2412_v49, %v3833_v22  ;;  %v2417_v60 = vsel %vm1057_vm1, %v2413_v32, %v3834_v30  ;;  %v3523_v49 = vor.u32 %v3725_v59, %v3522_v47  ;;  %v3524_v32 = vld [vmem:[%s5480_s6 + $0x58] sm:$0xf0] }
 0xc57   :  { %v2419_v54 = vpack.c.bf16 %v2417_v60, %v2416_v20  ;;  %v3527_v20 = vor.u32 %v3724_v25, %v3524_v32 }
 0xc59   :  { %3502 = vmatmul.msk.bf16.gmra.mxu0 %vm186_vm0, %v2419_v54  ;;  %2682 = vmatpush.bf16.msra.mxu2 %v3527_v20  ;;  %v3514_v54 = vld [vmem:[%s5480_s6 + $0x40] sm:$0xf] }
 0xca0   :  { %v2468_v53 = vpop.f32.mrf.mxu0 }
 0xca1   :  { %v2478_v55 = vadd.f32 %v2468_v53, %v4893_v52  ;;  %v3722_v53 = vld [vmem:[%s5480_s6 + $0x44] sm:$0xf] }
 0xca3   :  { %v5237_v28 = vadd.f32 %v2482_v37, %v2478_v55 }
 0xca5   :  { %v2487_v2 = vsel %vm186_vm0, %v5237_v28, 0.0  ;;  %v2503_v58 = vmul.f32 %v5237_v28, %v5237_v28 }
 0xca6   :  { %2488 = vadd.xlane.f32.xlu1 %v2487_v2 }
 0xca7   :  { %v2507_v38 = vsel %vm186_vm0, %v2503_v58, 0.0  ;;  %v3516_v58 = vld [vmem:[%s5480_s6 + $0x48] sm:$0xf0] }
 0xca8   :  { %2508 = vadd.xlane.f32.xlu0 %v2507_v38  ;;  %v2470_v44 = vpop.f32.mrf.mxu0 }
 0xca9   :  { %v2479_v42 = vadd.f32 %v2470_v44, %v4901_v24  ;;  %v3519_v44 = vor.u32 %v3722_v53, %v3516_v58 }
 0xcab   :  { %v5245_v50 = vadd.f32 %v2482_v37, %v2479_v42  ;;  %2683 = vmatpush.bf16.msra.mxu2 %v3519_v44 }
 0xcad   :  { %v2490_v52 = vsel %vm186_vm0, %v5245_v50, 0.0  ;;  %v2504_v31 = vmul.f32 %v5245_v50, %v5245_v50 }
 0xcae   :  { %2491 = vadd.xlane.f32.xlu2 %v2490_v52 }
 0xcaf   :  { %v2510_v45 = vsel %vm186_vm0, %v2504_v31, 0.0 }
 0xcb0   :  { %2511 = vadd.xlane.f32.xlu1 %v2510_v45 }
 0xcd6   :  { %v2473_v41 = vpop.f32.mrf.mxu0 }
 0xcd7   :  { %v2480_v46 = vadd.f32 %v2473_v41, %v4909_v26 }
 0xcd9   :  { %v5253_v21 = vadd.f32 %v2482_v37, %v2480_v46 }
 0xcdb   :  { %v2493_v24 = vsel %vm186_vm0, %v5253_v21, 0.0  ;;  %v2505_v36 = vmul.f32 %v5253_v21, %v5253_v21 }
 0xcdc   :  { %2494 = vadd.xlane.f32.xlu2 %v2493_v24 }
 0xcdd   :  { %v2513_v63 = vsel %vm186_vm0, %v2505_v36, 0.0 }
 0xcde   :  { %2514 = vadd.xlane.f32.xlu1 %v2513_v63  ;;  %v2475_v3 = vpop.f32.mrf.mxu0 }
 0xcdf   :  { %v2481_v9 = vadd.f32 %v2475_v3, %v4917_v23  ;;  %v3729_v23 = vld [vmem:[%s5480_s6 + $0x74] sm:$0xf0] }
 0xce0   :  { %v3539_v35 = vor.u32 %v3729_v23, %v3538_v40 }
 0xce1   :  { %v5261_v1 = vadd.f32 %v2482_v37, %v2481_v9  ;;  %v3723_v37 = vld [vmem:[%s5480_s6 + $0x44] sm:$0xf0] }
 0xce2   :  { %2661 = vmatpush.bf16.msrb.mxu1 %v3539_v35  ;;  %v3515_v2 = vor.u32 %v3723_v37, %v3514_v54 }
 0xce3   :  { %v2496_v26 = vsel %vm186_vm0, %v5261_v1, 0.0  ;;  %v2506_v34 = vmul.f32 %v5261_v1, %v5261_v1 }
 0xce4   :  { %2497 = vadd.xlane.f32.xlu0 %v2496_v26 }
 0xce5   :  { %v2516_v57 = vsel %vm186_vm0, %v2506_v34, 0.0 }
 0xce6   :  { %2517 = vadd.xlane.f32.xlu2 %v2516_v57  ;;  %2662 = vmatpush.bf16.msrb.mxu1 %v3531_v43 }
 0xcea   :  { %2663 = vmatpush.bf16.msrb.mxu1 %v3523_v49 }
 0xcee   :  { %2664 = vmatpush.bf16.msrb.mxu1 %v3515_v2 }
 0xd19   :  { %v2489_v39 = vpop.xlane.xlu1 %2488 }
 0xd1a   :  { %v2499_v48 = vmul.f32 %v2489_v39, %v4400_v10 }
 0xd1b   :  { %v2509_v56 = vpop.xlane.xlu0 %2508 }
 0xd1c   :  { %v2523_v30 = vmul.f32 %v2499_v48, %v2499_v48  ;;  %v2519_v22 = vmul.f32 %v2509_v56, %v4400_v10  ;;  %v2531_v35 = vsub.f32 %v5237_v28, %v2499_v48 }
 0xd1e   :  { %v2527_v60 = vsub.f32 %v2519_v22, %v2523_v30 }
 0xd20   :  { %v2535_v55 = vadd.f32 1e-06, %v2527_v60 }
 0xd21   :  { %v2492_v38 = vpop.xlane.xlu2 %2491 }
 0xd22   :  { %4007 = vrsqrt.f32 %v2535_v55  ;;  %v2500_v42 = vmul.f32 %v2492_v38, %v4400_v10  ;;  %vm2545_vm15 = vweird.f32 %v2535_v55 }
 0xd23   :  { %v2512_v52 = vpop.xlane.xlu1 %2511 }
 0xd24   :  { %v2524_v31 = vmul.f32 %v2500_v42, %v2500_v42  ;;  %v2520_v45 = vmul.f32 %v2512_v52, %v4400_v10  ;;  %v2532_v29 = vsub.f32 %v5245_v50, %v2500_v42 }
 0xd26   :  { %v2528_v41 = vsub.f32 %v2520_v45, %v2524_v31 }
 0xd28   :  { %v4008_v46 = vpop.eup %4007  ;;  %v2536_v24 = vadd.f32 1e-06, %v2528_v41 }
 0xd29   :  { %v2540_v36 = vmul.f32 %v4008_v46, %v2535_v55  ;;  %vm2546_vm14 = vweird.f32 %v4008_v46 }
 0xd2a   :  { %4009 = vrsqrt.f32 %v2536_v24  ;;  %vm2547_vm1 = vmor %vm2545_vm15, %vm2546_vm14  ;;  %vm2555_vm3 = vweird.f32 %v2536_v24 }
 0xd2b   :  { %v2541_v63 = vmul.f32 %v4008_v46, %v2540_v36 }
 0xd2d   :  { %v2542_v3 = vmul.f32 0.5, %v2541_v63 }
 0xd2f   :  { %v2543_v9 = vsub.f32 1.5, %v2542_v3 }
 0xd30   :  { %v4010_v26 = vpop.eup %4009 }
 0xd31   :  { %v2544_v34 = vmul.f32 %v4008_v46, %v2543_v9  ;;  %v2550_v57 = vmul.f32 %v4010_v26, %v2536_v24  ;;  %vm2556_vm2 = vweird.f32 %v4010_v26 }
 0xd32   :  { %vm2557_vm4 = vmor %vm2555_vm3, %vm2556_vm2 }
 0xd33   :  { %v2551_v40 = vmul.f32 %v4010_v26, %v2550_v57  ;;  %v2548_v23 = vsel %vm2547_vm1, %v4008_v46, %v2544_v34 }
 0xd34   :  { %v2579_v61 = vmul.f32 %v2548_v23, %v2531_v35 }
 0xd35   :  { %v2552_v13 = vmul.f32 0.5, %v2551_v40 }
 0xd36   :  { %v2584_v39 = vmul.f32 %v2583_v27, %v2579_v61 }
 0xd37   :  { %v2553_v6 = vsub.f32 1.5, %v2552_v13 }
 0xd38   :  { %v2589_v47 = vadd.f32 %v2588_v51, %v2584_v39  ;;  %v3744_v39 = vld [vmem:[%s5481_s7 + $0xf0] sm:$0xff] }
 0xd39   :  { %v2554_v0 = vmul.f32 %v4010_v26, %v2553_v6 }
 0xd3b   :  { %v2558_v43 = vsel %vm2557_vm4, %v4010_v26, %v2554_v0 }
 0xd3c   :  { %v2580_v33 = vmul.f32 %v2558_v43, %v2532_v29  ;;  %v3737_v29 = vld [vmem:[%s5481_s7 + $0xb8] sm:$0xff]  ;;  %v3736_v43 = vld [vmem:[%s5481_s7 + $0xb0] sm:$0xff] }
 0xd3d   :  { %2900 = vmatpush.bf16.msra.mxu3 %v3737_v29 }
 0xd3e   :  { %v2585_v56 = vmul.f32 %v2583_v27, %v2580_v33  ;;  %v3734_v33 = vld [vmem:[%s5481_s7 + $0xa0] sm:$0xff] }
 0xd40   :  { %v2590_v59 = vadd.f32 %v2588_v51, %v2585_v56  ;;  %v3743_v56 = vld [vmem:[%s5481_s7 + $0xe8] sm:$0xff] }
 0xd41   :  { %2901 = vmatpush.bf16.msra.mxu3 %v3736_v43 }
 0xd42   :  { %v2593_v25 = vpack.c.bf16 %v2590_v59, %v2589_v47  ;;  %v3733_v47 = vld [vmem:[%s5481_s7 + $0x98] sm:$0xff]  ;;  %v3742_v59 = vld [vmem:[%s5481_s7 + $0xe0] sm:$0xff] }
 0xd44   :  { %3544 = vmatmul.msk.bf16.vlgmr.msrb.gmra.mxu1 %vm186_vm0, %v2593_v25  ;;  %3546 = vmatmul.msk.bf16.vlgmr.msra.gmra.mxu2 %vm186_vm0, %v2593_v25  ;;  %v3732_v25 = vld [vmem:[%s5481_s7 + $0x90] sm:$0xff] }
 0xd4f   :  { %v2495_v48 = vpop.xlane.xlu2 %2494 }
 0xd50   :  { %v2501_v30 = vmul.f32 %v2495_v48, %v4400_v10  ;;  %v3511_v48 = vld [vmem:[%s5483_s9 + $0x2] sm:$0x3] }
 0xd51   :  { %v2515_v22 = vpop.xlane.xlu1 %2514 }
 0xd52   :  { %v2525_v49 = vmul.f32 %v2501_v30, %v2501_v30  ;;  %v2521_v32 = vmul.f32 %v2515_v22, %v4400_v10  ;;  %v2533_v3 = vsub.f32 %v5253_v21, %v2501_v30  ;;  %v3741_v30 = vld [vmem:[%s5481_s7 + $0xd8] sm:$0xff]  ;;  %v3731_v22 = vld [vmem:[%s5481_s7 + $0x88] sm:$0xff] }
 0xd54   :  { %v2529_v20 = vsub.f32 %v2521_v32, %v2525_v49  ;;  %v5373_v49 = vperm.slane %v3511_v48, 0  ;;  %v3740_v32 = vld [vmem:[%s5481_s7 + $0xd0] sm:$0xff] }
 0xd56   :  { %v2537_v60 = vadd.f32 1e-06, %v2529_v20 }
 0xd57   :  { %v2498_v62 = vpop.xlane.xlu0 %2497 }
 0xd58   :  { %4011 = vrsqrt.f32 %v2537_v60  ;;  %v2502_v54 = vmul.f32 %v2498_v62, %v4400_v10  ;;  %vm2565_vm6 = vweird.f32 %v2537_v60 }
 0xd59   :  { %v2518_v37 = vpop.xlane.xlu2 %2517 }
 0xd5a   :  { %v2526_v53 = vmul.f32 %v2502_v54, %v2502_v54  ;;  %v2522_v55 = vmul.f32 %v2518_v37, %v4400_v10  ;;  %v2534_v57 = vsub.f32 %v5261_v1, %v2502_v54  ;;  %v3739_v54 = vld [vmem:[%s5481_s7 + $0xc8] sm:$0xff] }
 0xd5c   :  { %v2530_v2 = vsub.f32 %v2522_v55, %v2526_v53  ;;  %v5385_v53 = vperm.slane %v3511_v48, 1 }
 0xd5e   :  { %v4012_v58 = vpop.eup %4011  ;;  %v2538_v38 = vadd.f32 1e-06, %v2530_v2 }
 0xd5f   :  { %v2560_v44 = vmul.f32 %v4012_v58, %v2537_v60  ;;  %vm2566_vm5 = vweird.f32 %v4012_v58  ;;  %v3730_v60 = vld [vmem:[%s5481_s7 + $0x80] sm:$0xff] }
 0xd60   :  { %4013 = vrsqrt.f32 %v2538_v38  ;;  %vm2567_vm7 = vmor %vm2565_vm6, %vm2566_vm5  ;;  %vm2575_vm9 = vweird.f32 %v2538_v38 }
 0xd61   :  { %v2561_v42 = vmul.f32 %v4012_v58, %v2560_v44 }
 0xd63   :  { %v2562_v52 = vmul.f32 0.5, %v2561_v42 }
 0xd65   :  { %v2563_v31 = vsub.f32 1.5, %v2562_v52 }
 0xd66   :  { %v4014_v45 = vpop.eup %4013 }
 0xd67   :  { %v2564_v41 = vmul.f32 %v4012_v58, %v2563_v31  ;;  %v2570_v46 = vmul.f32 %v4014_v45, %v2538_v38  ;;  %vm2576_vm8 = vweird.f32 %v4014_v45 }
 0xd68   :  { %vm2577_vm10 = vmor %vm2575_vm9, %vm2576_vm8 }
 0xd69   :  { %v2571_v24 = vmul.f32 %v4014_v45, %v2570_v46  ;;  %v2568_v36 = vsel %vm2567_vm7, %v4012_v58, %v2564_v41  ;;  %v3738_v58 = vld [vmem:[%s5481_s7 + $0xc0] sm:$0xff] }
 0xd6a   :  { %v2581_v26 = vmul.f32 %v2568_v36, %v2533_v3 }
 0xd6b   :  { %v2572_v63 = vmul.f32 0.5, %v2571_v24 }
 0xd6c   :  { %v2586_v13 = vmul.f32 %v2583_v27, %v2581_v26 }
 0xd6d   :  { %v2573_v9 = vsub.f32 1.5, %v2572_v63 }
 0xd6e   :  { %v2591_v6 = vadd.f32 %v2588_v51, %v2586_v13 }
 0xd6f   :  { %v2574_v34 = vmul.f32 %v4014_v45, %v2573_v9 }
 0xd71   :  { %v2578_v40 = vsel %vm2577_vm10, %v4014_v45, %v2574_v34 }
 0xd72   :  { %v2582_v23 = vmul.f32 %v2578_v40, %v2534_v57 }
 0xd74   :  { %v2587_v35 = vmul.f32 %v2583_v27, %v2582_v23  ;;  %v3745_v27 = vld [vmem:[%s5481_s7 + $0xf8] sm:$0xff] }
 0xd75   :  { %2919 = vmatpush.bf16.msra.mxu0 %v3745_v27 }
 0xd76   :  { %v2592_v61 = vadd.f32 %v2588_v51, %v2587_v35  ;;  %v3735_v51 = vld [vmem:[%s5481_s7 + $0xa8] sm:$0xff] }
 0xd77   :  { %2902 = vmatpush.bf16.msra.mxu3 %v3735_v51 }
 0xd78   :  { %v2594_v0 = vpack.c.bf16 %v2592_v61, %v2591_v6 }
 0xd79   :  { %2920 = vmatpush.bf16.msra.mxu0 %v3744_v39 }
 0xd7a   :  { %3545 = vmatmul.msk.bf16.gmra.mxu1 %vm186_vm0, %v2594_v0  ;;  %3547 = vmatmul.msk.bf16.gmra.mxu2 %vm186_vm0, %v2594_v0 }
 0xd7b   :  { %2903 = vmatpush.bf16.msra.mxu3 %v3734_v33 }
 0xd7d   :  { %2921 = vmatpush.bf16.msra.mxu0 %v3743_v56 }
 0xd7f   :  { %2904 = vmatpush.bf16.msra.mxu3 %v3733_v47 }
 0xd81   :  { %2922 = vmatpush.bf16.msra.mxu0 %v3742_v59 }
 0xd83   :  { %2905 = vmatpush.bf16.msra.mxu3 %v3732_v25 }
 0xd85   :  { %2923 = vmatpush.bf16.msra.mxu0 %v3741_v30 }
 0xd87   :  { %2906 = vmatpush.bf16.msra.mxu3 %v3731_v22 }
 0xd89   :  { %2924 = vmatpush.bf16.msra.mxu0 %v3740_v32 }
 0xd8b   :  { %2907 = vmatpush.bf16.msra.mxu3 %v3730_v60 }
 0xd8d   :  { %2925 = vmatpush.bf16.msra.mxu0 %v3739_v54 }
 0xd91   :  { %2926 = vmatpush.bf16.msra.mxu0 %v3738_v58 }
 0xdc1   :  { %v2666_v20 = vpop.f32.mrf.mxu1 }
 0xdc2   :  { %v2667_v62 = vadd.f32 %v2666_v20, %v5373_v49 }
 0xdc4   :  { %v2695_v37 = vmul.f32 %v2667_v62, %v2667_v62 }
 0xdc6   :  { %v2703_v55 = vmul.f32 %v2695_v37, %v2667_v62 }
 0xdc7   :  { %v2685_v2 = vpop.f32.mrf.mxu2 }
 0xdc8   :  { %v2711_v38 = vmul.f32 0.044715, %v2703_v55  ;;  %v2686_v44 = vadd.f32 %v2685_v2, %v5385_v53 }
 0xdc9   :  { %v2668_v42 = vpop.f32.mrf.mxu1 }
 0xdca   :  { %v2719_v52 = vadd.f32 %v2711_v38, %v2667_v62  ;;  %v2696_v31 = vmul.f32 %v2686_v44, %v2686_v44  ;;  %v2669_v45 = vadd.f32 %v2668_v42, %v5373_v49 }
 0xdcc   :  { %v2727_v41 = vmul.f32 0.7978846, %v2719_v52  ;;  %v2704_v46 = vmul.f32 %v2696_v31, %v2686_v44  ;;  %v2697_v24 = vmul.f32 %v2669_v45, %v2669_v45 }
 0xdce   :  { %v2712_v36 = vmul.f32 0.044715, %v2704_v46  ;;  %v2705_v63 = vmul.f32 %v2697_v24, %v2669_v45  ;;  %4015 = vtanh.f32 %v2727_v41 }
 0xdcf   :  { %v2687_v3 = vpop.f32.mrf.mxu2 }
 0xdd0   :  { %v2720_v9 = vadd.f32 %v2712_v36, %v2686_v44  ;;  %v2713_v26 = vmul.f32 0.044715, %v2705_v63  ;;  %v2688_v34 = vadd.f32 %v2687_v3, %v5385_v53 }
 0xdd2   :  { %v2728_v57 = vmul.f32 0.7978846, %v2720_v9  ;;  %v2721_v40 = vadd.f32 %v2713_v26, %v2669_v45  ;;  %v2698_v23 = vmul.f32 %v2688_v34, %v2688_v34 }
 0xdd4   :  { %v2729_v13 = vmul.f32 0.7978846, %v2721_v40  ;;  %v2706_v35 = vmul.f32 %v2698_v23, %v2688_v34  ;;  %4017 = vtanh.f32 %v2728_v57  ;;  %v4016_v6 = vpop.eup %4015 }
 0xdd5   :  { %v2743_v29 = vadd.f32 1.0, %v4016_v6 }
 0xdd6   :  { %4019 = vtanh.f32 %v2729_v13  ;;  %v2714_v61 = vmul.f32 0.044715, %v2706_v35 }
 0xdd7   :  { %v2751_v39 = vmul.f32 0.5, %v2743_v29 }
 0xdd8   :  { %v2722_v0 = vadd.f32 %v2714_v61, %v2688_v34 }
 0xdd9   :  { %v2759_v59 = vmul.f32 %v2751_v39, %v2667_v62 }
 0xdda   :  { %v2730_v43 = vmul.f32 0.7978846, %v2722_v0  ;;  %v4018_v27 = vpop.eup %4017 }
 0xddb   :  { %v2744_v56 = vadd.f32 1.0, %v4018_v27 }
 0xddc   :  { %v4020_v51 = vpop.eup %4019  ;;  %4021 = vtanh.f32 %v2730_v43 }
 0xddd   :  { %v2745_v33 = vadd.f32 1.0, %v4020_v51  ;;  %v2752_v30 = vmul.f32 0.5, %v2744_v56 }
 0xddf   :  { %v2753_v47 = vmul.f32 0.5, %v2745_v33  ;;  %v2760_v60 = vmul.f32 %v2752_v30, %v2686_v44 }
 0xde1   :  { %v2761_v25 = vmul.f32 %v2753_v47, %v2669_v45 }
 0xde2   :  { %v4022_v48 = vpop.eup %4021 }
 0xde3   :  { %v2767_v22 = vpack.c.bf16 %v2761_v25, %v2759_v59  ;;  %v2746_v32 = vadd.f32 1.0, %v4022_v48 }
 0xde5   :  { %v2754_v20 = vmul.f32 0.5, %v2746_v32  ;;  %2908 = vmatmul.bf16.vlgmr.msra.gmra.mxu3 %v2767_v22 }
 0xde7   :  { %v2762_v54 = vmul.f32 %v2754_v20, %v2688_v34 }
 0xde9   :  { %v2768_v37 = vpack.c.bf16 %v2762_v54, %v2760_v60 }
 0xdeb   :  { %2927 = vmatmul.bf16.vlgmr.msra.gmra.mxu0 %v2768_v37 }
 0xdf7   :  { %v2671_v55 = vpop.f32.mrf.mxu1 }
 0xdf8   :  { %v2672_v2 = vadd.f32 %v2671_v55, %v5373_v49 }
 0xdfa   :  { %v2699_v58 = vmul.f32 %v2672_v2, %v2672_v2 }
 0xdfc   :  { %v2707_v38 = vmul.f32 %v2699_v58, %v2672_v2 }
 0xdfd   :  { %v2690_v42 = vpop.f32.mrf.mxu2 }
 0xdfe   :  { %v2715_v52 = vmul.f32 0.044715, %v2707_v38  ;;  %v2691_v62 = vadd.f32 %v2690_v42, %v5385_v53  ;;  %v3836_v38 = vld [vmem:[%s5482_s8 + $0x18] ss:$0 sm:$0xff] }
 0xdff   :  { %v2673_v31 = vpop.f32.mrf.mxu1 }
 0xe00   :  { %v2723_v45 = vadd.f32 %v2715_v52, %v2672_v2  ;;  %v2700_v41 = vmul.f32 %v2691_v62, %v2691_v62  ;;  %v2674_v46 = vadd.f32 %v2673_v31, %v5373_v49 }
 0xe02   :  { %v2731_v24 = vmul.f32 0.7978846, %v2723_v45  ;;  %v2708_v36 = vmul.f32 %v2700_v41, %v2691_v62  ;;  %v2701_v44 = vmul.f32 %v2674_v46, %v2674_v46 }
 0xe04   :  { %v2716_v63 = vmul.f32 0.044715, %v2708_v36  ;;  %v2709_v3 = vmul.f32 %v2701_v44, %v2674_v46  ;;  %4023 = vtanh.f32 %v2731_v24 }
 0xe05   :  { %v2692_v9 = vpop.f32.mrf.mxu2 }
 0xe06   :  { %v2724_v26 = vadd.f32 %v2716_v63, %v2691_v62  ;;  %v2717_v34 = vmul.f32 0.044715, %v2709_v3  ;;  %v2693_v57 = vadd.f32 %v2692_v9, %v5385_v53 }
 0xe08   :  { %v2732_v40 = vmul.f32 0.7978846, %v2724_v26  ;;  %v2725_v23 = vadd.f32 %v2717_v34, %v2674_v46  ;;  %v2702_v13 = vmul.f32 %v2693_v57, %v2693_v57 }
 0xe0a   :  { %v2733_v35 = vmul.f32 0.7978846, %v2725_v23  ;;  %v2710_v6 = vmul.f32 %v2702_v13, %v2693_v57  ;;  %4025 = vtanh.f32 %v2732_v40  ;;  %v4024_v61 = vpop.eup %4023 }
 0xe0b   :  { %v2747_v29 = vadd.f32 1.0, %v4024_v61 }
 0xe0c   :  { %4027 = vtanh.f32 %v2733_v35  ;;  %v2718_v49 = vmul.f32 0.044715, %v2710_v6 }
 0xe0d   :  { %v2755_v33 = vmul.f32 0.5, %v2747_v29 }
 0xe0e   :  { %v2726_v0 = vadd.f32 %v2718_v49, %v2693_v57 }
 0xe0f   :  { %v2763_v53 = vmul.f32 %v2755_v33, %v2672_v2 }
 0xe10   :  { %v2734_v43 = vmul.f32 0.7978846, %v2726_v0  ;;  %v4026_v27 = vpop.eup %4025 }
 0xe11   :  { %v2748_v47 = vadd.f32 1.0, %v4026_v27  ;;  %v3748_v27 = vld [vmem:[#allocation10 + $0x10] sm:$0xff] }
 0xe12   :  { %v4028_v51 = vpop.eup %4027  ;;  %4029 = vtanh.f32 %v2734_v43  ;;  %v3749_v43 = vld [vmem:[#allocation10 + $0x18] sm:$0xff] }
 0xe13   :  { %v2749_v39 = vadd.f32 1.0, %v4028_v51  ;;  %v2756_v22 = vmul.f32 0.5, %v2748_v47  ;;  %3098 = vmatpush.bf16.msra.mxu1 %v3749_v43  ;;  %v3747_v47 = vld [vmem:[#allocation10 + $0x8] sm:$0xff] }
 0xe15   :  { %v2757_v56 = vmul.f32 0.5, %v2749_v39  ;;  %v2764_v20 = vmul.f32 %v2756_v22, %v2691_v62 }
 0xe17   :  { %v2765_v59 = vmul.f32 %v2757_v56, %v2674_v46  ;;  %3099 = vmatpush.bf16.msra.mxu1 %v3748_v27 }
 0xe18   :  { %v4030_v25 = vpop.eup %4029 }
 0xe19   :  { %v2769_v48 = vpack.c.bf16 %v2765_v59, %v2763_v53  ;;  %v2750_v30 = vadd.f32 1.0, %v4030_v25  ;;  %v3746_v25 = vld [vmem:[#allocation10] sm:$0xff] }
 0xe1b   :  { %2913 = vmatmul.bf16.gmra.mxu3 %v2769_v48  ;;  %v2758_v32 = vmul.f32 0.5, %v2750_v30  ;;  %3100 = vmatpush.bf16.msra.mxu1 %v3747_v47 }
 0xe1d   :  { %v2766_v60 = vmul.f32 %v2758_v32, %v2693_v57 }
 0xe1f   :  { %v2770_v54 = vpack.c.bf16 %v2766_v60, %v2764_v20  ;;  %3101 = vmatpush.bf16.msra.mxu1 %v3746_v25 }
 0xe21   :  { %2932 = vmatmul.bf16.gmra.mxu0 %v2770_v54 }
 0xe68   :  { %v2909_v37 = vpop.f32.mrf.mxu3  ;;  %v2928_v55 = vpop.f32.mrf.mxu0 }
 0xe69   :  { %v2929_v58 = vadd.f32 %v2928_v55, %v2909_v37 }
 0xe6b   :  { %v2938_v2 = vadd.f32 %v2929_v58, %v5237_v28 }
 0xe6d   :  { %v5401_v42 = vadd.f32 %v3836_v38, %v2938_v2 }
 0xe6f   :  { %v2947_v52 = vsel %vm186_vm0, %v5401_v42, 0.0  ;;  %v2963_v62 = vmul.f32 %v5401_v42, %v5401_v42 }
 0xe70   :  { %v2911_v31 = vpop.f32.mrf.mxu3  ;;  %v2930_v45 = vpop.f32.mrf.mxu0  ;;  %2948 = vadd.xlane.f32.xlu0 %v2947_v52 }
 0xe71   :  { %v2931_v41 = vadd.f32 %v2930_v45, %v2911_v31  ;;  %v2967_v46 = vsel %vm186_vm0, %v2963_v62, 0.0 }
 0xe72   :  { %2968 = vadd.xlane.f32.xlu2 %v2967_v46 }
 0xe73   :  { %v2939_v24 = vadd.f32 %v2931_v41, %v5245_v50 }
 0xe75   :  { %v5409_v36 = vadd.f32 %v3836_v38, %v2939_v24 }
 0xe77   :  { %v2950_v28 = vsel %vm186_vm0, %v5409_v36, 0.0  ;;  %v2964_v44 = vmul.f32 %v5409_v36, %v5409_v36 }
 0xe78   :  { %2951 = vadd.xlane.f32.xlu1 %v2950_v28 }
 0xe79   :  { %v2970_v63 = vsel %vm186_vm0, %v2964_v44, 0.0  ;;  %v4045_v44 = vld [vmem:[%s5486_s12] sm:$0x7] }
 0xe7a   :  { %2971 = vadd.xlane.f32.xlu0 %v2970_v63  ;;  %v3043_v63 = vperm.slane %v4045_v44, 1 }
 0xe9e   :  { %v2914_v3 = vpop.f32.mrf.mxu3  ;;  %v2933_v9 = vpop.f32.mrf.mxu0 }
 0xe9f   :  { %v2934_v26 = vadd.f32 %v2933_v9, %v2914_v3 }
 0xea1   :  { %v2940_v34 = vadd.f32 %v2934_v26, %v5253_v21 }
 0xea3   :  { %v5417_v57 = vadd.f32 %v3836_v38, %v2940_v34 }
 0xea5   :  { %v2953_v50 = vsel %vm186_vm0, %v5417_v57, 0.0  ;;  %v2965_v40 = vmul.f32 %v5417_v57, %v5417_v57 }
 0xea6   :  { %v2935_v23 = vpop.f32.mrf.mxu0  ;;  %2954 = vadd.xlane.f32.xlu1 %v2953_v50  ;;  %v2916_v13 = vpop.f32.mrf.mxu3  ;;  %v3048_v50 = vperm.slane %v4045_v44, 2 }
 0xea7   :  { %v2936_v35 = vadd.f32 %v2935_v23, %v2916_v13  ;;  %v2973_v6 = vsel %vm186_vm0, %v2965_v40, 0.0 }
 0xea8   :  { %2974 = vadd.xlane.f32.xlu0 %v2973_v6 }
 0xea9   :  { %v2941_v61 = vadd.f32 %v2936_v35, %v5261_v1 }
 0xeab   :  { %v5425_v49 = vadd.f32 %v3836_v38, %v2941_v61 }
 0xead   :  { %v2956_v21 = vsel %vm186_vm0, %v5425_v49, 0.0  ;;  %v2966_v0 = vmul.f32 %v5425_v49, %v5425_v49 }
 0xeae   :  { %2957 = vadd.xlane.f32.xlu2 %v2956_v21 }
 0xeaf   :  { %v2976_v29 = vsel %vm186_vm0, %v2966_v0, 0.0 }
 0xeb0   :  { %2977 = vadd.xlane.f32.xlu1 %v2976_v29 }
 0xee3   :  { %v2949_v51 = vpop.xlane.xlu0 %2948 }
 0xee4   :  { %v2959_v39 = vmul.f32 %v2949_v51, %v4400_v10 }
 0xee5   :  { %v2969_v1 = vpop.xlane.xlu2 %2968 }
 0xee6   :  { %v2983_v33 = vmul.f32 %v2959_v39, %v2959_v39  ;;  %v2979_v56 = vmul.f32 %v2969_v1, %v4400_v10  ;;  %v2991_v24 = vsub.f32 %v5401_v42, %v2959_v39 }
 0xee8   :  { %v2987_v53 = vsub.f32 %v2979_v56, %v2983_v33 }
 0xeea   :  { %v2995_v59 = vadd.f32 1e-06, %v2987_v53 }
 0xeeb   :  { %v2952_v48 = vpop.xlane.xlu1 %2951 }
 0xeec   :  { %4031 = vrsqrt.f32 %v2995_v59  ;;  %v2960_v30 = vmul.f32 %v2952_v48, %v4400_v10  ;;  %vm3005_vm12 = vweird.f32 %v2995_v59 }
 0xeed   :  { %v2972_v22 = vpop.xlane.xlu0 %2971 }
 0xeee   :  { %v2984_v32 = vmul.f32 %v2960_v30, %v2960_v30  ;;  %v2980_v20 = vmul.f32 %v2972_v22, %v4400_v10  ;;  %v2992_v26 = vsub.f32 %v5409_v36, %v2960_v30 }
 0xef0   :  { %v2988_v60 = vsub.f32 %v2980_v20, %v2984_v32 }
 0xef2   :  { %v4032_v54 = vpop.eup %4031  ;;  %v2996_v37 = vadd.f32 1e-06, %v2988_v60 }
 0xef3   :  { %v3000_v55 = vmul.f32 %v4032_v54, %v2995_v59  ;;  %vm3006_vm11 = vweird.f32 %v4032_v54 }
 0xef4   :  { %4033 = vrsqrt.f32 %v2996_v37  ;;  %vm3007_vm13 = vmor %vm3005_vm12, %vm3006_vm11  ;;  %vm3015_vm15 = vweird.f32 %v2996_v37 }
 0xef5   :  { %v3001_v58 = vmul.f32 %v4032_v54, %v3000_v55 }
 0xef7   :  { %v3002_v38 = vmul.f32 0.5, %v3001_v58 }
 0xef9   :  { %v3003_v2 = vsub.f32 1.5, %v3002_v38 }
 0xefa   :  { %v4034_v52 = vpop.eup %4033 }
 0xefb   :  { %v3004_v62 = vmul.f32 %v4032_v54, %v3003_v2  ;;  %v3010_v31 = vmul.f32 %v4034_v52, %v2996_v37  ;;  %vm3016_vm14 = vweird.f32 %v4034_v52 }
 0xefc   :  { %vm3017_vm1 = vmor %vm3015_vm15, %vm3016_vm14 }
 0xefd   :  { %v3011_v45 = vmul.f32 %v4034_v52, %v3010_v31  ;;  %v3008_v41 = vsel %vm3007_vm13, %v4032_v54, %v3004_v62 }
 0xefe   :  { %v3039_v3 = vmul.f32 %v3008_v41, %v2991_v24 }
 0xeff   :  { %v3012_v46 = vmul.f32 0.5, %v3011_v45 }
 0xf00   :  { %v3044_v40 = vmul.f32 %v3043_v63, %v3039_v3 }
 0xf01   :  { %v3013_v28 = vsub.f32 1.5, %v3012_v46 }
 0xf02   :  { %v3049_v35 = vadd.f32 %v3048_v50, %v3044_v40 }
 0xf03   :  { %v3014_v9 = vmul.f32 %v4034_v52, %v3013_v28 }
 0xf05   :  { %v3018_v34 = vsel %vm3017_vm1, %v4034_v52, %v3014_v9 }
 0xf06   :  { %v3040_v23 = vmul.f32 %v3018_v34, %v2992_v26 }
 0xf08   :  { %v3045_v13 = vmul.f32 %v3043_v63, %v3040_v23 }
 0xf0a   :  { %v3050_v42 = vadd.f32 %v3048_v50, %v3045_v13 }
 0xf0c   :  { %v3053_v6 = vpack.c.bf16 %v3050_v42, %v3049_v35 }
 0xf0e   :  { %3660 = vmatmul.msk.bf16.vlgmr.msra.gmra.mxu1 %vm186_vm0, %v3053_v6 }
 0xf19   :  { %v2955_v61 = vpop.xlane.xlu1 %2954 }
 0xf1a   :  { %v2961_v21 = vmul.f32 %v2955_v61, %v4400_v10 }
 0xf1b   :  { %v2975_v0 = vpop.xlane.xlu0 %2974 }
 0xf1c   :  { %v2985_v29 = vmul.f32 %v2961_v21, %v2961_v21  ;;  %v2981_v43 = vmul.f32 %v2975_v0, %v4400_v10  ;;  %v2993_v58 = vsub.f32 %v5417_v57, %v2961_v21  ;;  %v4046_v57 = vld [vmem:[%s5485_s11] sm:$0x7]  ;;  %s4215_s11 = smov [#allocation11]  }
 0xf1d   :  { %v3113_v44 = vperm.slane %v4046_v57, 1  ;;  %v3063_v9 = vperm.slane %v4046_v57, 2  ;;  %s3134_s10 = sshll.u32 %s4215_s11, 4  ;;  %s3135_s10 = int_to_ptr.vmem [resolvable:$true] %s3134_s10 }
 0xf1e   :  { %v2989_v27 = vsub.f32 %v2981_v43, %v2985_v29 }
 0xf1f   :  { %v3114_v3 = vmul.f32 %v3113_v44, %v132_v7  ;;  %v3116_v4 = vmul.f32 %v3113_v44, %v134_v15  ;;  %v3117_v5 = vmul.f32 %v3113_v44, %v135_v17 }
 0xf20   :  { %v2997_v36 = vadd.f32 1e-06, %v2989_v27 }
 0xf21   :  { %v2958_v51 = vpop.xlane.xlu2 %2957  ;;  %v3120_v7 = vadd.f32 %v3116_v4, %v4344_v18 }
 0xf22   :  { %4035 = vrsqrt.f32 %v2997_v36  ;;  %v2962_v39 = vmul.f32 %v2958_v51, %v4400_v10  ;;  %vm3025_vm3 = vweird.f32 %v2997_v36 }
 0xf23   :  { %v2978_v1 = vpop.xlane.xlu1 %2977 }
 0xf24   :  { %v2986_v33 = vmul.f32 %v2962_v39, %v2962_v39  ;;  %v2982_v56 = vmul.f32 %v2978_v1, %v4400_v10  ;;  %v2994_v52 = vsub.f32 %v5425_v49, %v2962_v39  ;;  %v3118_v49 = vadd.f32 %v3114_v3, %v4334_v12 }
 0xf26   :  { %v2990_v47 = vsub.f32 %v2982_v56, %v2986_v33 }
 0xf28   :  { %v4036_v53 = vpop.eup %4035  ;;  %v2998_v59 = vadd.f32 1e-06, %v2990_v47 }
 0xf29   :  { %v3020_v25 = vmul.f32 %v4036_v53, %v2997_v36  ;;  %vm3026_vm2 = vweird.f32 %v4036_v53 }
 0xf2a   :  { %4037 = vrsqrt.f32 %v2998_v59  ;;  %vm3027_vm4 = vmor %vm3025_vm3, %vm3026_vm2  ;;  %vm3035_vm6 = vweird.f32 %v2998_v59 }
 0xf2b   :  { %v3021_v48 = vmul.f32 %v4036_v53, %v3020_v25 }
 0xf2d   :  { %v3022_v30 = vmul.f32 0.5, %v3021_v48 }
 0xf2f   :  { %v3023_v22 = vsub.f32 1.5, %v3022_v30 }
 0xf30   :  { %v4038_v32 = vpop.eup %4037 }
 0xf31   :  { %v3024_v20 = vmul.f32 %v4036_v53, %v3023_v22  ;;  %v3030_v60 = vmul.f32 %v4038_v32, %v2998_v59  ;;  %vm3036_vm5 = vweird.f32 %v4038_v32 }
 0xf32   :  { %vm3037_vm7 = vmor %vm3035_vm6, %vm3036_vm5 }
 0xf33   :  { %v3031_v54 = vmul.f32 %v4038_v32, %v3030_v60  ;;  %v3028_v37 = vsel %vm3027_vm4, %v4036_v53, %v3024_v20 }
 0xf34   :  { %v3041_v38 = vmul.f32 %v3028_v37, %v2993_v58 }
 0xf35   :  { %v3032_v55 = vmul.f32 0.5, %v3031_v54 }
 0xf36   :  { %v3046_v45 = vmul.f32 %v3043_v63, %v3041_v38 }
 0xf37   :  { %v3033_v10 = vsub.f32 1.5, %v3032_v55 }
 0xf38   :  { %v3051_v46 = vadd.f32 %v3048_v50, %v3046_v45 }
 0xf39   :  { %v3034_v2 = vmul.f32 %v4038_v32, %v3033_v10 }
 0xf3b   :  { %v3038_v62 = vsel %vm3037_vm7, %v4038_v32, %v3034_v2 }
 0xf3c   :  { %v3042_v31 = vmul.f32 %v3038_v62, %v2994_v52 }
 0xf3e   :  { %v3047_v41 = vmul.f32 %v3043_v63, %v3042_v31  ;;  %v3115_v63 = vmul.f32 %v3113_v44, %v133_v8  ;;  %v3121_v8 = vadd.f32 %v3117_v5, %v4347_v19 }
 0xf40   :  { %v3052_v24 = vadd.f32 %v3048_v50, %v3047_v41  ;;  %v3119_v50 = vadd.f32 %v3115_v63, %v4340_v16 }
 0xf42   :  { %v3054_v28 = vpack.c.bf16 %v3052_v24, %v3051_v46 }
 0xf44   :  { %3661 = vmatmul.msk.bf16.gmra.mxu1 %vm186_vm0, %v3054_v28 }
 0xf8b   :  { %v3103_v26 = vpop.f32.mrf.mxu1 }
 0xf8c   :  { %v3104_v34 = vadd.f32 %v3103_v26, %v3063_v9 }
 0xf8e   :  { %v3122_v40 = vadd.f32 %v3118_v49, %v3104_v34 }
 0xf90   :  { %3126 = vst.msk [vmem:[#allocation11] sm:$0xff] %vm186_vm0, %v3122_v40 }
 0xf93   :  { %v3105_v23 = vpop.f32.mrf.mxu1 }
 0xf94   :  { %v3106_v13 = vadd.f32 %v3105_v23, %v3063_v9 }
 0xf96   :  { %v3123_v35 = vadd.f32 %v3119_v50, %v3106_v13 }
 0xf98   :  { %3127 = vst.msk [vmem:[#allocation11 + $0x8] sm:$0xff] %vm186_vm0, %v3123_v35 }
 0xfc1   :  { %v3108_v12 = vpop.f32.mrf.mxu1 }
 0xfc2   :  { %v3109_v42 = vadd.f32 %v3108_v12, %v3063_v9 }
 0xfc4   :  { %v3124_v6 = vadd.f32 %v3120_v7, %v3109_v42 }
 0xfc6   :  { %3128 = vst.msk [vmem:[#allocation11 + $0x10] sm:$0xff] %vm186_vm0, %v3124_v6 }
 0xfc9   :  { %v3110_v16 = vpop.f32.mrf.mxu1 }
 0xfca   :  { %v3111_v11 = vadd.f32 %v3110_v16, %v3063_v9 }
 0xfcc   :  { %v3125_v15 = vadd.f32 %v3121_v8, %v3111_v11 }
 0xfce   :  { %3129 = vst.msk [vmem:[#allocation11 + $0x18] sm:$0xff] %vm186_vm0, %v3125_v15 }
 0xfcf   :  { %3142 = dma.vmem_to_hbm [thread:$0]  %s3135_s10, 512, %s3137_s23, [#allocation4], %s4200_s16, %s4200_s16, %s4201_s17  }
 0xfd0   :  { %4197 = dma.done.wait [#allocation4], 512  }
 0xfd1   :  { %4198 = vsyncadd [#allocation4], 4294966784 }
 0xfd2   :  { %3147 = vsyncpa [#allocation3], 1 }
 0xfd3   :  { %3148 = vsyncpa [#allocation6], 1 }
 0xfd4   :  { %3149 = vsyncpa [#allocation9], 1 }
 0xfd5   :  { %3150 = vsyncpa [#allocation4], 1 }

</bundles_post_ra>
